<compile_context>
chip_gen: v5e
topology: v5e:2x2
jax: 0.10.0
libtpu: 0.0.40
codegen_flags: <defaults>
</compile_context>

<pallas_src>
import functools

import jax
import jax.numpy as jnp
from jax import lax
from jax.experimental import pallas as pl
from jax.experimental.pallas import tpu as pltpu

F32 = jnp.float32


def _conv_out(size, k, stride, pad):
    return (size + 2 * pad - k) // stride + 1


# ---------------------------------------------------------------------------
# Fused kernel:  [optional BN-affine] -> ReLU -> depthwise KxK (stride) -> 1x1
#                + per-image partial BN stats of the 1x1 output.
# Grid: one step per batch image ("parallel").
# ---------------------------------------------------------------------------
def _make_block_kernel(K, stride, padding, H, W, Cin, Cout, apply_affine_in):
    Ho = _conv_out(H, K, stride, padding)
    Wo = _conv_out(W, K, stride, padding)

    def kernel(*refs):
        if apply_affine_in:
            (x_ref, scale_ref, shift_ref, dw_ref, pw_ref,
             y_ref, stats_ref, xp_ref) = refs
        else:
            (x_ref, dw_ref, pw_ref, y_ref, stats_ref, xp_ref) = refs

        x = x_ref[0]                                    # (H, W, Cin)
        if apply_affine_in:
            x = x * scale_ref[...] + shift_ref[...]     # previous block's BN affine
        x = jnp.maximum(x, 0.0)                         # ReLU

        # Zero-padded copy in VMEM scratch (ReLU(0)=0, so padding after ReLU is exact).
        xp_ref[...] = jnp.zeros(xp_ref.shape, xp_ref.dtype)
        xp_ref[padding:padding + H, padding:padding + W, :] = x

        # Depthwise KxK convolution; strided outputs are computed directly.
        acc = jnp.zeros((Ho, Wo, Cin), F32)
        for dy in range(K):
            for dx in range(K):
                if stride == 1:
                    tap = xp_ref[dy:dy + Ho, dx:dx + Wo, :]
                else:
                    tap = xp_ref[pl.ds(dy, Ho, stride), pl.ds(dx, Wo, stride), :]
                w_tap = dw_ref[dy * K + dx:dy * K + dx + 1, :]      # (1, Cin)
                acc = acc + tap * w_tap

        # Pointwise 1x1 convolution (contraction over channels).
        y2d = jnp.dot(acc.reshape(Ho * Wo, Cin), pw_ref[...],
                      preferred_element_type=F32)                    # (Ho*Wo, Cout)

        # Per-image partial BatchNorm statistics (exact under batch tiling).
        stats_ref[0, 0:1, :] = jnp.sum(y2d, axis=0, keepdims=True)
        stats_ref[0, 1:2, :] = jnp.sum(y2d * y2d, axis=0, keepdims=True)

        y_ref[0] = y2d.reshape(Ho, Wo, Cout)

    return kernel, Ho, Wo


def _fused_block(x_nhwc, dw_kkc, pw_io, *, K, stride, padding, scale=None, shift=None):
    """One fused SepConv block. Returns (pre-BN output NHWC, partial stats (N,2,Cout))."""
    N, H, W, Cin = x_nhwc.shape
    Cout = pw_io.shape[1]
    apply_affine_in = scale is not None

    kernel, Ho, Wo = _make_block_kernel(K, stride, padding, H, W, Cin, Cout,
                                        apply_affine_in)
    Hp, Wp = H + 2 * padding, W + 2 * padding
    dw2d = dw_kkc.reshape(K * K, Cin)

    # TODO(synk): for images too large to fit one (H,W,C) block in VMEM (esp. v7x's
    # 64 MiB), tile H with halo via manual DMA (memory_space=pl.ANY + make_async_copy).
    in_specs = [pl.BlockSpec((1, H, W, Cin), lambda n: (n, 0, 0, 0))]
    args = [x_nhwc]
    if apply_affine_in:
        in_specs += [pl.BlockSpec((1, Cin), lambda n: (0, 0)),
                     pl.BlockSpec((1, Cin), lambda n: (0, 0))]
        args += [scale.reshape(1, Cin).astype(F32), shift.reshape(1, Cin).astype(F32)]
    in_specs += [pl.BlockSpec((K * K, Cin), lambda n: (0, 0)),
                 pl.BlockSpec((Cin, Cout), lambda n: (0, 0))]
    args += [dw2d, pw_io]

    out_shape = (jax.ShapeDtypeStruct((N, Ho, Wo, Cout), F32),
                 jax.ShapeDtypeStruct((N, 2, Cout), F32))
    out_specs = (pl.BlockSpec((1, Ho, Wo, Cout), lambda n: (n, 0, 0, 0)),
                 pl.BlockSpec((1, 2, Cout), lambda n: (n, 0, 0)))

    # VMEM budget: double-buffered in/out blocks + scratch, with headroom,
    # capped well below v7x's 64 MiB physical VMEM.
    blk_bytes = 4 * (H * W * Cin + Ho * Wo * Cout + 2 * Cout
                     + K * K * Cin + Cin * Cout + (2 * Cin if apply_affine_in else 0))
    scratch_bytes = 4 * Hp * Wp * Cin
    vmem_limit = int(min(max(4 * blk_bytes + 2 * scratch_bytes, 4 << 20), 40 << 20))

    flops = 2 * N * Ho * Wo * Cin * (K * K + Cout)
    bytes_accessed = 4 * (N * H * W * Cin + N * Ho * Wo * Cout + N * 2 * Cout
                          + K * K * Cin + Cin * Cout)

    y, stats = pl.pallas_call(
        kernel,
        out_shape=out_shape,
        grid=(N,),
        in_specs=in_specs,
        out_specs=out_specs,
        scratch_shapes=[pltpu.VMEM((Hp, Wp, Cin), F32)],
        compiler_params=pltpu.CompilerParams(
            dimension_semantics=("parallel",),
            vmem_limit_bytes=vmem_limit),
        cost_estimate=pl.CostEstimate(flops=flops, transcendentals=0,
                                      bytes_accessed=bytes_accessed),
    )(*args)
    return y, stats


# ---------------------------------------------------------------------------
# Final BatchNorm affine apply (per-channel scale/shift), tiled over batch.
# ---------------------------------------------------------------------------
def _affine_kernel(y_ref, scale_ref, shift_ref, o_ref):
    o_ref[...] = y_ref[...] * scale_ref[...] + shift_ref[...]


def _apply_affine(y_nhwc, scale, shift):
    N, H, W, C = y_nhwc.shape
    return pl.pallas_call(
        _affine_kernel,
        out_shape=jax.ShapeDtypeStruct((N, H, W, C), F32),
        grid=(N,),
        in_specs=[pl.BlockSpec((1, H, W, C), lambda n: (n, 0, 0, 0)),
                  pl.BlockSpec((1, C), lambda n: (0, 0)),
                  pl.BlockSpec((1, C), lambda n: (0, 0))],
        out_specs=pl.BlockSpec((1, H, W, C), lambda n: (n, 0, 0, 0)),
        compiler_params=pltpu.CompilerParams(dimension_semantics=("parallel",)),
        cost_estimate=pl.CostEstimate(flops=2 * N * H * W * C, transcendentals=0,
                                      bytes_accessed=8 * N * H * W * C),
    )(y_nhwc, scale.reshape(1, C).astype(F32), shift.reshape(1, C).astype(F32))


# ---------------------------------------------------------------------------
# Cross-batch BN statistics -> per-channel (scale, shift)   (tiny, plain JAX)
# ---------------------------------------------------------------------------
def _bn_scale_shift(partial_stats, count, gamma, beta, eps=1e-5):
    total = jnp.sum(partial_stats, axis=0)                # (2, C)
    mean = total[0] / count
    var = jnp.maximum(total[1] / count - mean * mean, 0.0)  # biased (train-mode) var
    scale = gamma * lax.rsqrt(var + eps)
    shift = beta - mean * scale
    return scale, shift


# ---------------------------------------------------------------------------
# Public forward (NCHW in / NCHW out, matching the PyTorch module)
# ---------------------------------------------------------------------------
def sep_conv(x_nchw, params, *, kernel_size, stride, padding, eps=1e-5):
    x = jnp.transpose(x_nchw, (0, 2, 3, 1)).astype(F32)   # NCHW -> NHWC
    N = x.shape[0]

    # block 1: ReLU -> dw(k,stride) -> 1x1(C_in->C_in), emit BN1 partial stats
    y1, st1 = _fused_block(x, params["dw1"], params["pw1"],
                           K=kernel_size, stride=stride, padding=padding)
    cnt1 = N * y1.shape[1] * y1.shape[2]
    s1, b1 = _bn_scale_shift(st1, cnt1, params["g1"], params["b1"], eps)

    # block 2: BN1-affine -> ReLU -> dw(k,1) -> 1x1(C_in->C_out), emit BN2 partial stats
    y2, st2 = _fused_block(y1, params["dw2"], params["pw2"],
                           K=kernel_size, stride=1, padding=padding,
                           scale=s1, shift=b1)
    cnt2 = N * y2.shape[1] * y2.shape[2]
    s2, b2 = _bn_scale_shift(st2, cnt2, params["g2"], params["b2"], eps)

    out = _apply_affine(y2, s2, b2)                        # BN2 affine
    return jnp.transpose(out, (0, 3, 1, 2))                # NHWC -> NCHW


# ---------------------------------------------------------------------------
# Pure-JAX reference (semantics match the torch training-mode forward)
# ---------------------------------------------------------------------------
def _ref_dw(x_nchw, w_kkc, stride, padding):
    C = x_nchw.shape[1]
    w = jnp.transpose(w_kkc, (2, 0, 1))[:, None, :, :]    # (C,1,K,K)
    return lax.conv_general_dilated(
        x_nchw, w, (stride, stride),
        [(padding, padding), (padding, padding)],
        dimension_numbers=("NCHW", "OIHW", "NCHW"),
        feature_group_count=C)


def _ref_pw(x_nchw, w_io):
    w = jnp.transpose(w_io, (1, 0))[:, :, None, None]     # (Cout,Cin,1,1)
    return lax.conv_general_dilated(
        x_nchw, w, (1, 1), [(0, 0), (0, 0)],
        dimension_numbers=("NCHW", "OIHW", "NCHW"))


def _ref_bn(x_nchw, gamma, beta, eps=1e-5):
    mean = jnp.mean(x_nchw, axis=(0, 2, 3), keepdims=True)
    var = jnp.mean((x_nchw - mean) ** 2, axis=(0, 2, 3), keepdims=True)
    return ((x_nchw - mean) * lax.rsqrt(var + eps)
            * gamma[None, :, None, None] + beta[None, :, None, None])


def sep_conv_ref(x, params, kernel_size, stride, padding):
    y = jax.nn.relu(x)
    y = _ref_dw(y, params["dw1"], stride, padding)
    y = _ref_pw(y, params["pw1"])
    y = _ref_bn(y, params["g1"], params["b1"])
    y = jax.nn.relu(y)
    y = _ref_dw(y, params["dw2"], 1, padding)
    y = _ref_pw(y, params["pw2"])
    y = _ref_bn(y, params["g2"], params["b2"])
    return y


if __name__ == "__main__":
    N, C_in, C_out, H, W = 2, 4, 8, 16, 16
    K, stride, padding = 3, 1, 1

    key = jax.random.PRNGKey(0)
    kx, k1, k2, k3, k4 = jax.random.split(key, 5)
    x = jax.random.normal(kx, (N, C_in, H, W), jnp.float32)

    params = {
        # torch dw weight (C_in, 1, K, K) stored here as (K, K, C_in)
        "dw1": 0.2 * jax.random.normal(k1, (K, K, C_in), jnp.float32),
        # torch 1x1 weight (C_out, C_in, 1, 1) stored transposed as (C_in, C_out)
        "pw1": 0.2 * jax.random.normal(k2, (C_in, C_in), jnp.float32),
        "g1": jnp.ones((C_in,), jnp.float32),
        "b1": jnp.zeros((C_in,), jnp.float32),
        "dw2": 0.2 * jax.random.normal(k3, (K, K, C_in), jnp.float32),
        "pw2": 0.2 * jax.random.normal(k4, (C_in, C_out), jnp.float32),
        "g2": jnp.ones((C_out,), jnp.float32),
        "b2": jnp.zeros((C_out,), jnp.float32),
    }

    fwd = jax.jit(functools.partial(sep_conv, kernel_size=K, stride=stride,
                                    padding=padding))
    out = jax.block_until_ready(fwd(x, params))
    ref = jax.block_until_ready(sep_conv_ref(x, params, K, stride, padding))

    assert out.shape == (N, C_out, H, W), out.shape
    err = float(jnp.max(jnp.abs(out - ref)))
    assert err < 1e-3, f"mismatch vs reference: {err}"
    print("KERNEL_OK")
</pallas_src>

<mosaic_0001>
module attributes {stable_mosaic.version = 11 : i64} {
  func.func @kernel(%arg0: i32, %arg1: memref<1x16x16x4xf32, #tpu.memory_space<vmem>>, %arg2: memref<9x4xf32, #tpu.memory_space<vmem>>, %arg3: memref<4x4xf32, #tpu.memory_space<vmem>>, %arg4: memref<1x16x16x4xf32, #tpu.memory_space<vmem>>, %arg5: memref<1x2x4xf32, #tpu.memory_space<vmem>>, %arg6: memref<18x18x4xf32, #tpu.memory_space<vmem>>) attributes {dimension_semantics = [#tpu.dimension_semantics<parallel>], iteration_bounds = array<i64: 2>, scalar_prefetch = 0 : i64, scratch_operands = 1 : i64, tpu.core_type = #tpu.core_type<tc>, window_params = [{transform_indices = @transform_0, window_bounds = array<i64: 1, 16, 16, 4>}, {pipeline_mode = #tpu.pipeline_mode<synchronous>, transform_indices = @transform_1, window_bounds = array<i64: 9, 4>}, {pipeline_mode = #tpu.pipeline_mode<synchronous>, transform_indices = @transform_2, window_bounds = array<i64: 4, 4>}, {transform_indices = @transform_3, window_bounds = array<i64: 1, 16, 16, 4>}, {transform_indices = @transform_4, window_bounds = array<i64: 1, 2, 4>}]} {
    %c0 = arith.constant 0 : index
    %c0_0 = arith.constant 0 : index
    %c0_1 = arith.constant 0 : index
    %c0_2 = arith.constant 0 : index
    %0 = vector.load %arg1[%c0, %c0_0, %c0_1, %c0_2] : memref<1x16x16x4xf32, #tpu.memory_space<vmem>>, vector<1x16x16x4xf32>
    %1 = vector.shape_cast %0 : vector<1x16x16x4xf32> to vector<16x16x4xf32>
    %cst = arith.constant 0.000000e+00 : f32
    %2 = vector.broadcast %cst : f32 to vector<16x16x4xf32>
    %3 = arith.maximumf %1, %2 : vector<16x16x4xf32>
    %cst_3 = arith.constant 0.000000e+00 : f32
    %4 = vector.broadcast %cst_3 : f32 to vector<18x18x4xf32>
    %c0_4 = arith.constant 0 : index
    %c0_5 = arith.constant 0 : index
    %c0_6 = arith.constant 0 : index
    %5 = vector.load %arg6[%c0_4, %c0_5, %c0_6] : memref<18x18x4xf32, #tpu.memory_space<vmem>>, vector<18x18x4xf32>
    tpu.vector_store %arg6[%c0_4, %c0_5, %c0_6], %4 {strides = array<i32>} : memref<18x18x4xf32, #tpu.memory_space<vmem>>, vector<18x18x4xf32>,
    %c1 = arith.constant 1 : index
    %c1_7 = arith.constant 1 : index
    %c0_8 = arith.constant 0 : index
    %6 = vector.load %arg6[%c1, %c1_7, %c0_8] : memref<18x18x4xf32, #tpu.memory_space<vmem>>, vector<16x16x4xf32>
    tpu.vector_store %arg6[%c1, %c1_7, %c0_8], %3 {strides = array<i32>} : memref<18x18x4xf32, #tpu.memory_space<vmem>>, vector<16x16x4xf32>,
    %cst_9 = arith.constant 0.000000e+00 : f32
    %7 = vector.broadcast %cst_9 : f32 to vector<16x16x4xf32>
    %c0_10 = arith.constant 0 : index
    %c0_11 = arith.constant 0 : index
    %c0_12 = arith.constant 0 : index
    %8 = vector.load %arg6[%c0_10, %c0_11, %c0_12] : memref<18x18x4xf32, #tpu.memory_space<vmem>>, vector<16x16x4xf32>
    %c0_13 = arith.constant 0 : index
    %c0_14 = arith.constant 0 : index
    %9 = vector.load %arg2[%c0_13, %c0_14] : memref<9x4xf32, #tpu.memory_space<vmem>>, vector<1x4xf32>
    %10 = vector.shape_cast %9 : vector<1x4xf32> to vector<1x1x4xf32>
    %11 = vector.broadcast %10 : vector<1x1x4xf32> to vector<16x16x4xf32>
    %12 = arith.mulf %8, %11 : vector<16x16x4xf32>
    %13 = arith.addf %7, %12 : vector<16x16x4xf32>
    %c0_15 = arith.constant 0 : index
    %c1_16 = arith.constant 1 : index
    %c0_17 = arith.constant 0 : index
    %14 = vector.load %arg6[%c0_15, %c1_16, %c0_17] : memref<18x18x4xf32, #tpu.memory_space<vmem>>, vector<16x16x4xf32>
    %c1_18 = arith.constant 1 : index
    %c0_19 = arith.constant 0 : index
    %15 = vector.load %arg2[%c1_18, %c0_19] : memref<9x4xf32, #tpu.memory_space<vmem>>, vector<1x4xf32>
    %16 = vector.shape_cast %15 : vector<1x4xf32> to vector<1x1x4xf32>
    %17 = vector.broadcast %16 : vector<1x1x4xf32> to vector<16x16x4xf32>
    %18 = arith.mulf %14, %17 : vector<16x16x4xf32>
    %19 = arith.addf %13, %18 : vector<16x16x4xf32>
    %c0_20 = arith.constant 0 : index
    %c2 = arith.constant 2 : index
    %c0_21 = arith.constant 0 : index
    %20 = vector.load %arg6[%c0_20, %c2, %c0_21] : memref<18x18x4xf32, #tpu.memory_space<vmem>>, vector<16x16x4xf32>
    %c2_22 = arith.constant 2 : index
    %c0_23 = arith.constant 0 : index
    %21 = vector.load %arg2[%c2_22, %c0_23] : memref<9x4xf32, #tpu.memory_space<vmem>>, vector<1x4xf32>
    %22 = vector.shape_cast %21 : vector<1x4xf32> to vector<1x1x4xf32>
    %23 = vector.broadcast %22 : vector<1x1x4xf32> to vector<16x16x4xf32>
    %24 = arith.mulf %20, %23 : vector<16x16x4xf32>
    %25 = arith.addf %19, %24 : vector<16x16x4xf32>
    %c1_24 = arith.constant 1 : index
    %c0_25 = arith.constant 0 : index
    %c0_26 = arith.constant 0 : index
    %26 = vector.load %arg6[%c1_24, %c0_25, %c0_26] : memref<18x18x4xf32, #tpu.memory_space<vmem>>, vector<16x16x4xf32>
    %c3 = arith.constant 3 : index
    %c0_27 = arith.constant 0 : index
    %27 = vector.load %arg2[%c3, %c0_27] : memref<9x4xf32, #tpu.memory_space<vmem>>, vector<1x4xf32>
    %28 = vector.shape_cast %27 : vector<1x4xf32> to vector<1x1x4xf32>
    %29 = vector.broadcast %28 : vector<1x1x4xf32> to vector<16x16x4xf32>
    %30 = arith.mulf %26, %29 : vector<16x16x4xf32>
    %31 = arith.addf %25, %30 : vector<16x16x4xf32>
    %c1_28 = arith.constant 1 : index
    %c1_29 = arith.constant 1 : index
    %c0_30 = arith.constant 0 : index
    %32 = vector.load %arg6[%c1_28, %c1_29, %c0_30] : memref<18x18x4xf32, #tpu.memory_space<vmem>>, vector<16x16x4xf32>
    %c4 = arith.constant 4 : index
    %c0_31 = arith.constant 0 : index
    %33 = vector.load %arg2[%c4, %c0_31] : memref<9x4xf32, #tpu.memory_space<vmem>>, vector<1x4xf32>
    %34 = vector.shape_cast %33 : vector<1x4xf32> to vector<1x1x4xf32>
    %35 = vector.broadcast %34 : vector<1x1x4xf32> to vector<16x16x4xf32>
    %36 = arith.mulf %32, %35 : vector<16x16x4xf32>
    %37 = arith.addf %31, %36 : vector<16x16x4xf32>
    %c1_32 = arith.constant 1 : index
    %c2_33 = arith.constant 2 : index
    %c0_34 = arith.constant 0 : index
    %38 = vector.load %arg6[%c1_32, %c2_33, %c0_34] : memref<18x18x4xf32, #tpu.memory_space<vmem>>, vector<16x16x4xf32>
    %c5 = arith.constant 5 : index
    %c0_35 = arith.constant 0 : index
    %39 = vector.load %arg2[%c5, %c0_35] : memref<9x4xf32, #tpu.memory_space<vmem>>, vector<1x4xf32>
    %40 = vector.shape_cast %39 : vector<1x4xf32> to vector<1x1x4xf32>
    %41 = vector.broadcast %40 : vector<1x1x4xf32> to vector<16x16x4xf32>
    %42 = arith.mulf %38, %41 : vector<16x16x4xf32>
    %43 = arith.addf %37, %42 : vector<16x16x4xf32>
    %c2_36 = arith.constant 2 : index
    %c0_37 = arith.constant 0 : index
    %c0_38 = arith.constant 0 : index
    %44 = vector.load %arg6[%c2_36, %c0_37, %c0_38] : memref<18x18x4xf32, #tpu.memory_space<vmem>>, vector<16x16x4xf32>
    %c6 = arith.constant 6 : index
    %c0_39 = arith.constant 0 : index
    %45 = vector.load %arg2[%c6, %c0_39] : memref<9x4xf32, #tpu.memory_space<vmem>>, vector<1x4xf32>
    %46 = vector.shape_cast %45 : vector<1x4xf32> to vector<1x1x4xf32>
    %47 = vector.broadcast %46 : vector<1x1x4xf32> to vector<16x16x4xf32>
    %48 = arith.mulf %44, %47 : vector<16x16x4xf32>
    %49 = arith.addf %43, %48 : vector<16x16x4xf32>
    %c2_40 = arith.constant 2 : index
    %c1_41 = arith.constant 1 : index
    %c0_42 = arith.constant 0 : index
    %50 = vector.load %arg6[%c2_40, %c1_41, %c0_42] : memref<18x18x4xf32, #tpu.memory_space<vmem>>, vector<16x16x4xf32>
    %c7 = arith.constant 7 : index
    %c0_43 = arith.constant 0 : index
    %51 = vector.load %arg2[%c7, %c0_43] : memref<9x4xf32, #tpu.memory_space<vmem>>, vector<1x4xf32>
    %52 = vector.shape_cast %51 : vector<1x4xf32> to vector<1x1x4xf32>
    %53 = vector.broadcast %52 : vector<1x1x4xf32> to vector<16x16x4xf32>
    %54 = arith.mulf %50, %53 : vector<16x16x4xf32>
    %55 = arith.addf %49, %54 : vector<16x16x4xf32>
    %c2_44 = arith.constant 2 : index
    %c2_45 = arith.constant 2 : index
    %c0_46 = arith.constant 0 : index
    %56 = vector.load %arg6[%c2_44, %c2_45, %c0_46] : memref<18x18x4xf32, #tpu.memory_space<vmem>>, vector<16x16x4xf32>
    %c8 = arith.constant 8 : index
    %c0_47 = arith.constant 0 : index
    %57 = vector.load %arg2[%c8, %c0_47] : memref<9x4xf32, #tpu.memory_space<vmem>>, vector<1x4xf32>
    %58 = vector.shape_cast %57 : vector<1x4xf32> to vector<1x1x4xf32>
    %59 = vector.broadcast %58 : vector<1x1x4xf32> to vector<16x16x4xf32>
    %60 = arith.mulf %56, %59 : vector<16x16x4xf32>
    %61 = arith.addf %55, %60 : vector<16x16x4xf32>
    %62 = vector.shape_cast %61 : vector<16x16x4xf32> to vector<256x4xf32>
    %c0_48 = arith.constant 0 : index
    %c0_49 = arith.constant 0 : index
    %63 = vector.load %arg3[%c0_48, %c0_49] : memref<4x4xf32, #tpu.memory_space<vmem>>, vector<4x4xf32>
    %cst_50 = arith.constant dense<0.000000e+00> : vector<256x4xf32>
    %64 = tpu.matmul %62, %63, %cst_50 {dimension_numbers = #tpu.dot_dimension_numbers<[1], [0], [0], [1], [0, 0, 1, 1], [], []>} : vector<256x4xf32>, vector<4x4xf32>, vector<256x4xf32> -> vector<256x4xf32>
    %cst_51 = arith.constant dense<0.000000e+00> : vector<4xf32>
    %65 = vector.multi_reduction <add>, %64, %cst_51 [0] : vector<256x4xf32> to vector<4xf32>
    %66 = vector.shape_cast %65 : vector<4xf32> to vector<1x4xf32>
    %c0_52 = arith.constant 0 : index
    %c0_53 = arith.constant 0 : index
    %c0_54 = arith.constant 0 : index
    %67 = vector.load %arg5[%c0_52, %c0_53, %c0_54] : memref<1x2x4xf32, #tpu.memory_space<vmem>>, vector<1x1x4xf32>
    %68 = vector.shape_cast %67 : vector<1x1x4xf32> to vector<1x4xf32>
    %69 = vector.shape_cast %66 : vector<1x4xf32> to vector<1x1x4xf32>
    tpu.vector_store %arg5[%c0_52, %c0_53, %c0_54], %69 {strides = array<i32>} : memref<1x2x4xf32, #tpu.memory_space<vmem>>, vector<1x1x4xf32>,
    %70 = arith.mulf %64, %64 : vector<256x4xf32>
    %cst_55 = arith.constant dense<0.000000e+00> : vector<4xf32>
    %71 = vector.multi_reduction <add>, %70, %cst_55 [0] : vector<256x4xf32> to vector<4xf32>
    %72 = vector.shape_cast %71 : vector<4xf32> to vector<1x4xf32>
    %c0_56 = arith.constant 0 : index
    %c1_57 = arith.constant 1 : index
    %c0_58 = arith.constant 0 : index
    %73 = vector.load %arg5[%c0_56, %c1_57, %c0_58] : memref<1x2x4xf32, #tpu.memory_space<vmem>>, vector<1x1x4xf32>
    %74 = vector.shape_cast %73 : vector<1x1x4xf32> to vector<1x4xf32>
    %75 = vector.shape_cast %72 : vector<1x4xf32> to vector<1x1x4xf32>
    tpu.vector_store %arg5[%c0_56, %c1_57, %c0_58], %75 {strides = array<i32>} : memref<1x2x4xf32, #tpu.memory_space<vmem>>, vector<1x1x4xf32>,
    %76 = vector.shape_cast %64 : vector<256x4xf32> to vector<16x16x4xf32>
    %c0_59 = arith.constant 0 : index
    %c0_60 = arith.constant 0 : index
    %c0_61 = arith.constant 0 : index
    %c0_62 = arith.constant 0 : index
    %77 = vector.load %arg4[%c0_59, %c0_60, %c0_61, %c0_62] : memref<1x16x16x4xf32, #tpu.memory_space<vmem>>, vector<1x16x16x4xf32>
    %78 = vector.shape_cast %77 : vector<1x16x16x4xf32> to vector<16x16x4xf32>
    %79 = vector.shape_cast %76 : vector<16x16x4xf32> to vector<1x16x16x4xf32>
    tpu.vector_store %arg4[%c0_59, %c0_60, %c0_61, %c0_62], %79 {strides = array<i32>} : memref<1x16x16x4xf32, #tpu.memory_space<vmem>>, vector<1x16x16x4xf32>,
    return
  }
  func.func @transform_0(%arg0: i32) -> (i32, i32, i32, i32) {
    %c0_i32 = arith.constant 0 : i32
    %c0_i32_0 = arith.constant 0 : i32
    %c0_i32_1 = arith.constant 0 : i32
    %c0_i32_2 = arith.constant 0 : i32
    return %arg0, %c0_i32, %c0_i32_0, %c0_i32_1 : i32, i32, i32, i32
  }
  func.func @transform_1(%arg0: i32) -> (i32, i32) {
    %c0_i32 = arith.constant 0 : i32
    %c0_i32_0 = arith.constant 0 : i32
    %c0_i32_1 = arith.constant 0 : i32
    return %c0_i32, %c0_i32_0 : i32, i32
  }
  func.func @transform_2(%arg0: i32) -> (i32, i32) {
    %c0_i32 = arith.constant 0 : i32
    %c0_i32_0 = arith.constant 0 : i32
    %c0_i32_1 = arith.constant 0 : i32
    return %c0_i32, %c0_i32_0 : i32, i32
  }
  func.func @transform_3(%arg0: i32) -> (i32, i32, i32, i32) {
    %c0_i32 = arith.constant 0 : i32
    %c0_i32_0 = arith.constant 0 : i32
    %c0_i32_1 = arith.constant 0 : i32
    %c0_i32_2 = arith.constant 0 : i32
    return %arg0, %c0_i32, %c0_i32_0, %c0_i32_1 : i32, i32, i32, i32
  }
  func.func @transform_4(%arg0: i32) -> (i32, i32, i32) {
    %c0_i32 = arith.constant 0 : i32
    %c0_i32_0 = arith.constant 0 : i32
    %c0_i32_1 = arith.constant 0 : i32
    return %arg0, %c0_i32, %c0_i32_0 : i32, i32, i32
  }
}

module attributes {stable_mosaic.version = 11 : i64} {
  func.func @kernel(%arg0: i32, %arg1: memref<1x16x16x4xf32, #tpu.memory_space<vmem>>, %arg2: memref<1x4xf32, #tpu.memory_space<vmem>>, %arg3: memref<1x4xf32, #tpu.memory_space<vmem>>, %arg4: memref<9x4xf32, #tpu.memory_space<vmem>>, %arg5: memref<4x8xf32, #tpu.memory_space<vmem>>, %arg6: memref<1x16x16x8xf32, #tpu.memory_space<vmem>>, %arg7: memref<1x2x8xf32, #tpu.memory_space<vmem>>, %arg8: memref<18x18x4xf32, #tpu.memory_space<vmem>>) attributes {dimension_semantics = [#tpu.dimension_semantics<parallel>], iteration_bounds = array<i64: 2>, scalar_prefetch = 0 : i64, scratch_operands = 1 : i64, tpu.core_type = #tpu.core_type<tc>, window_params = [{transform_indices = @transform_0, window_bounds = array<i64: 1, 16, 16, 4>}, {pipeline_mode = #tpu.pipeline_mode<synchronous>, transform_indices = @transform_1, window_bounds = array<i64: 1, 4>}, {pipeline_mode = #tpu.pipeline_mode<synchronous>, transform_indices = @transform_2, window_bounds = array<i64: 1, 4>}, {pipeline_mode = #tpu.pipeline_mode<synchronous>, transform_indices = @transform_3, window_bounds = array<i64: 9, 4>}, {pipeline_mode = #tpu.pipeline_mode<synchronous>, transform_indices = @transform_4, window_bounds = array<i64: 4, 8>}, {transform_indices = @transform_5, window_bounds = array<i64: 1, 16, 16, 8>}, {transform_indices = @transform_6, window_bounds = array<i64: 1, 2, 8>}]} {
    %c0 = arith.constant 0 : index
    %c0_0 = arith.constant 0 : index
    %c0_1 = arith.constant 0 : index
    %c0_2 = arith.constant 0 : index
    %0 = vector.load %arg1[%c0, %c0_0, %c0_1, %c0_2] : memref<1x16x16x4xf32, #tpu.memory_space<vmem>>, vector<1x16x16x4xf32>
    %1 = vector.shape_cast %0 : vector<1x16x16x4xf32> to vector<16x16x4xf32>
    %c0_3 = arith.constant 0 : index
    %c0_4 = arith.constant 0 : index
    %2 = vector.load %arg2[%c0_3, %c0_4] : memref<1x4xf32, #tpu.memory_space<vmem>>, vector<1x4xf32>
    %3 = vector.shape_cast %2 : vector<1x4xf32> to vector<1x1x4xf32>
    %4 = vector.broadcast %3 : vector<1x1x4xf32> to vector<16x16x4xf32>
    %5 = arith.mulf %1, %4 : vector<16x16x4xf32>
    %c0_5 = arith.constant 0 : index
    %c0_6 = arith.constant 0 : index
    %6 = vector.load %arg3[%c0_5, %c0_6] : memref<1x4xf32, #tpu.memory_space<vmem>>, vector<1x4xf32>
    %7 = vector.shape_cast %6 : vector<1x4xf32> to vector<1x1x4xf32>
    %8 = vector.broadcast %7 : vector<1x1x4xf32> to vector<16x16x4xf32>
    %9 = arith.addf %5, %8 : vector<16x16x4xf32>
    %cst = arith.constant 0.000000e+00 : f32
    %10 = vector.broadcast %cst : f32 to vector<16x16x4xf32>
    %11 = arith.maximumf %9, %10 : vector<16x16x4xf32>
    %cst_7 = arith.constant 0.000000e+00 : f32
    %12 = vector.broadcast %cst_7 : f32 to vector<18x18x4xf32>
    %c0_8 = arith.constant 0 : index
    %c0_9 = arith.constant 0 : index
    %c0_10 = arith.constant 0 : index
    %13 = vector.load %arg8[%c0_8, %c0_9, %c0_10] : memref<18x18x4xf32, #tpu.memory_space<vmem>>, vector<18x18x4xf32>
    tpu.vector_store %arg8[%c0_8, %c0_9, %c0_10], %12 {strides = array<i32>} : memref<18x18x4xf32, #tpu.memory_space<vmem>>, vector<18x18x4xf32>,
    %c1 = arith.constant 1 : index
    %c1_11 = arith.constant 1 : index
    %c0_12 = arith.constant 0 : index
    %14 = vector.load %arg8[%c1, %c1_11, %c0_12] : memref<18x18x4xf32, #tpu.memory_space<vmem>>, vector<16x16x4xf32>
    tpu.vector_store %arg8[%c1, %c1_11, %c0_12], %11 {strides = array<i32>} : memref<18x18x4xf32, #tpu.memory_space<vmem>>, vector<16x16x4xf32>,
    %cst_13 = arith.constant 0.000000e+00 : f32
    %15 = vector.broadcast %cst_13 : f32 to vector<16x16x4xf32>
    %c0_14 = arith.constant 0 : index
    %c0_15 = arith.constant 0 : index
    %c0_16 = arith.constant 0 : index
    %16 = vector.load %arg8[%c0_14, %c0_15, %c0_16] : memref<18x18x4xf32, #tpu.memory_space<vmem>>, vector<16x16x4xf32>
    %c0_17 = arith.constant 0 : index
    %c0_18 = arith.constant 0 : index
    %17 = vector.load %arg4[%c0_17, %c0_18] : memref<9x4xf32, #tpu.memory_space<vmem>>, vector<1x4xf32>
    %18 = vector.shape_cast %17 : vector<1x4xf32> to vector<1x1x4xf32>
    %19 = vector.broadcast %18 : vector<1x1x4xf32> to vector<16x16x4xf32>
    %20 = arith.mulf %16, %19 : vector<16x16x4xf32>
    %21 = arith.addf %15, %20 : vector<16x16x4xf32>
    %c0_19 = arith.constant 0 : index
    %c1_20 = arith.constant 1 : index
    %c0_21 = arith.constant 0 : index
    %22 = vector.load %arg8[%c0_19, %c1_20, %c0_21] : memref<18x18x4xf32, #tpu.memory_space<vmem>>, vector<16x16x4xf32>
    %c1_22 = arith.constant 1 : index
    %c0_23 = arith.constant 0 : index
    %23 = vector.load %arg4[%c1_22, %c0_23] : memref<9x4xf32, #tpu.memory_space<vmem>>, vector<1x4xf32>
    %24 = vector.shape_cast %23 : vector<1x4xf32> to vector<1x1x4xf32>
    %25 = vector.broadcast %24 : vector<1x1x4xf32> to vector<16x16x4xf32>
    %26 = arith.mulf %22, %25 : vector<16x16x4xf32>
    %27 = arith.addf %21, %26 : vector<16x16x4xf32>
    %c0_24 = arith.constant 0 : index
    %c2 = arith.constant 2 : index
    %c0_25 = arith.constant 0 : index
    %28 = vector.load %arg8[%c0_24, %c2, %c0_25] : memref<18x18x4xf32, #tpu.memory_space<vmem>>, vector<16x16x4xf32>
    %c2_26 = arith.constant 2 : index
    %c0_27 = arith.constant 0 : index
    %29 = vector.load %arg4[%c2_26, %c0_27] : memref<9x4xf32, #tpu.memory_space<vmem>>, vector<1x4xf32>
    %30 = vector.shape_cast %29 : vector<1x4xf32> to vector<1x1x4xf32>
    %31 = vector.broadcast %30 : vector<1x1x4xf32> to vector<16x16x4xf32>
    %32 = arith.mulf %28, %31 : vector<16x16x4xf32>
    %33 = arith.addf %27, %32 : vector<16x16x4xf32>
    %c1_28 = arith.constant 1 : index
    %c0_29 = arith.constant 0 : index
    %c0_30 = arith.constant 0 : index
    %34 = vector.load %arg8[%c1_28, %c0_29, %c0_30] : memref<18x18x4xf32, #tpu.memory_space<vmem>>, vector<16x16x4xf32>
    %c3 = arith.constant 3 : index
    %c0_31 = arith.constant 0 : index
    %35 = vector.load %arg4[%c3, %c0_31] : memref<9x4xf32, #tpu.memory_space<vmem>>, vector<1x4xf32>
    %36 = vector.shape_cast %35 : vector<1x4xf32> to vector<1x1x4xf32>
    %37 = vector.broadcast %36 : vector<1x1x4xf32> to vector<16x16x4xf32>
    %38 = arith.mulf %34, %37 : vector<16x16x4xf32>
    %39 = arith.addf %33, %38 : vector<16x16x4xf32>
    %c1_32 = arith.constant 1 : index
    %c1_33 = arith.constant 1 : index
    %c0_34 = arith.constant 0 : index
    %40 = vector.load %arg8[%c1_32, %c1_33, %c0_34] : memref<18x18x4xf32, #tpu.memory_space<vmem>>, vector<16x16x4xf32>
    %c4 = arith.constant 4 : index
    %c0_35 = arith.constant 0 : index
    %41 = vector.load %arg4[%c4, %c0_35] : memref<9x4xf32, #tpu.memory_space<vmem>>, vector<1x4xf32>
    %42 = vector.shape_cast %41 : vector<1x4xf32> to vector<1x1x4xf32>
    %43 = vector.broadcast %42 : vector<1x1x4xf32> to vector<16x16x4xf32>
    %44 = arith.mulf %40, %43 : vector<16x16x4xf32>
    %45 = arith.addf %39, %44 : vector<16x16x4xf32>
    %c1_36 = arith.constant 1 : index
    %c2_37 = arith.constant 2 : index
    %c0_38 = arith.constant 0 : index
    %46 = vector.load %arg8[%c1_36, %c2_37, %c0_38] : memref<18x18x4xf32, #tpu.memory_space<vmem>>, vector<16x16x4xf32>
    %c5 = arith.constant 5 : index
    %c0_39 = arith.constant 0 : index
    %47 = vector.load %arg4[%c5, %c0_39] : memref<9x4xf32, #tpu.memory_space<vmem>>, vector<1x4xf32>
    %48 = vector.shape_cast %47 : vector<1x4xf32> to vector<1x1x4xf32>
    %49 = vector.broadcast %48 : vector<1x1x4xf32> to vector<16x16x4xf32>
    %50 = arith.mulf %46, %49 : vector<16x16x4xf32>
    %51 = arith.addf %45, %50 : vector<16x16x4xf32>
    %c2_40 = arith.constant 2 : index
    %c0_41 = arith.constant 0 : index
    %c0_42 = arith.constant 0 : index
    %52 = vector.load %arg8[%c2_40, %c0_41, %c0_42] : memref<18x18x4xf32, #tpu.memory_space<vmem>>, vector<16x16x4xf32>
    %c6 = arith.constant 6 : index
    %c0_43 = arith.constant 0 : index
    %53 = vector.load %arg4[%c6, %c0_43] : memref<9x4xf32, #tpu.memory_space<vmem>>, vector<1x4xf32>
    %54 = vector.shape_cast %53 : vector<1x4xf32> to vector<1x1x4xf32>
    %55 = vector.broadcast %54 : vector<1x1x4xf32> to vector<16x16x4xf32>
    %56 = arith.mulf %52, %55 : vector<16x16x4xf32>
    %57 = arith.addf %51, %56 : vector<16x16x4xf32>
    %c2_44 = arith.constant 2 : index
    %c1_45 = arith.constant 1 : index
    %c0_46 = arith.constant 0 : index
    %58 = vector.load %arg8[%c2_44, %c1_45, %c0_46] : memref<18x18x4xf32, #tpu.memory_space<vmem>>, vector<16x16x4xf32>
    %c7 = arith.constant 7 : index
    %c0_47 = arith.constant 0 : index
    %59 = vector.load %arg4[%c7, %c0_47] : memref<9x4xf32, #tpu.memory_space<vmem>>, vector<1x4xf32>
    %60 = vector.shape_cast %59 : vector<1x4xf32> to vector<1x1x4xf32>
    %61 = vector.broadcast %60 : vector<1x1x4xf32> to vector<16x16x4xf32>
    %62 = arith.mulf %58, %61 : vector<16x16x4xf32>
    %63 = arith.addf %57, %62 : vector<16x16x4xf32>
    %c2_48 = arith.constant 2 : index
    %c2_49 = arith.constant 2 : index
    %c0_50 = arith.constant 0 : index
    %64 = vector.load %arg8[%c2_48, %c2_49, %c0_50] : memref<18x18x4xf32, #tpu.memory_space<vmem>>, vector<16x16x4xf32>
    %c8 = arith.constant 8 : index
    %c0_51 = arith.constant 0 : index
    %65 = vector.load %arg4[%c8, %c0_51] : memref<9x4xf32, #tpu.memory_space<vmem>>, vector<1x4xf32>
    %66 = vector.shape_cast %65 : vector<1x4xf32> to vector<1x1x4xf32>
    %67 = vector.broadcast %66 : vector<1x1x4xf32> to vector<16x16x4xf32>
    %68 = arith.mulf %64, %67 : vector<16x16x4xf32>
    %69 = arith.addf %63, %68 : vector<16x16x4xf32>
    %70 = vector.shape_cast %69 : vector<16x16x4xf32> to vector<256x4xf32>
    %c0_52 = arith.constant 0 : index
    %c0_53 = arith.constant 0 : index
    %71 = vector.load %arg5[%c0_52, %c0_53] : memref<4x8xf32, #tpu.memory_space<vmem>>, vector<4x8xf32>
    %cst_54 = arith.constant dense<0.000000e+00> : vector<256x8xf32>
    %72 = tpu.matmul %70, %71, %cst_54 {dimension_numbers = #tpu.dot_dimension_numbers<[1], [0], [0], [1], [0, 0, 1, 1], [], []>} : vector<256x4xf32>, vector<4x8xf32>, vector<256x8xf32> -> vector<256x8xf32>
    %cst_55 = arith.constant dense<0.000000e+00> : vector<8xf32>
    %73 = vector.multi_reduction <add>, %72, %cst_55 [0] : vector<256x8xf32> to vector<8xf32>
    %74 = vector.shape_cast %73 : vector<8xf32> to vector<1x8xf32>
    %c0_56 = arith.constant 0 : index
    %c0_57 = arith.constant 0 : index
    %c0_58 = arith.constant 0 : index
    %75 = vector.load %arg7[%c0_56, %c0_57, %c0_58] : memref<1x2x8xf32, #tpu.memory_space<vmem>>, vector<1x1x8xf32>
    %76 = vector.shape_cast %75 : vector<1x1x8xf32> to vector<1x8xf32>
    %77 = vector.shape_cast %74 : vector<1x8xf32> to vector<1x1x8xf32>
    tpu.vector_store %arg7[%c0_56, %c0_57, %c0_58], %77 {strides = array<i32>} : memref<1x2x8xf32, #tpu.memory_space<vmem>>, vector<1x1x8xf32>,
    %78 = arith.mulf %72, %72 : vector<256x8xf32>
    %cst_59 = arith.constant dense<0.000000e+00> : vector<8xf32>
    %79 = vector.multi_reduction <add>, %78, %cst_59 [0] : vector<256x8xf32> to vector<8xf32>
    %80 = vector.shape_cast %79 : vector<8xf32> to vector<1x8xf32>
    %c0_60 = arith.constant 0 : index
    %c1_61 = arith.constant 1 : index
    %c0_62 = arith.constant 0 : index
    %81 = vector.load %arg7[%c0_60, %c1_61, %c0_62] : memref<1x2x8xf32, #tpu.memory_space<vmem>>, vector<1x1x8xf32>
    %82 = vector.shape_cast %81 : vector<1x1x8xf32> to vector<1x8xf32>
    %83 = vector.shape_cast %80 : vector<1x8xf32> to vector<1x1x8xf32>
    tpu.vector_store %arg7[%c0_60, %c1_61, %c0_62], %83 {strides = array<i32>} : memref<1x2x8xf32, #tpu.memory_space<vmem>>, vector<1x1x8xf32>,
    %84 = vector.shape_cast %72 : vector<256x8xf32> to vector<16x16x8xf32>
    %c0_63 = arith.constant 0 : index
    %c0_64 = arith.constant 0 : index
    %c0_65 = arith.constant 0 : index
    %c0_66 = arith.constant 0 : index
    %85 = vector.load %arg6[%c0_63, %c0_64, %c0_65, %c0_66] : memref<1x16x16x8xf32, #tpu.memory_space<vmem>>, vector<1x16x16x8xf32>
    %86 = vector.shape_cast %85 : vector<1x16x16x8xf32> to vector<16x16x8xf32>
    %87 = vector.shape_cast %84 : vector<16x16x8xf32> to vector<1x16x16x8xf32>
    tpu.vector_store %arg6[%c0_63, %c0_64, %c0_65, %c0_66], %87 {strides = array<i32>} : memref<1x16x16x8xf32, #tpu.memory_space<vmem>>, vector<1x16x16x8xf32>,
    return
  }
  func.func @transform_0(%arg0: i32) -> (i32, i32, i32, i32) {
    %c0_i32 = arith.constant 0 : i32
    %c0_i32_0 = arith.constant 0 : i32
    %c0_i32_1 = arith.constant 0 : i32
    %c0_i32_2 = arith.constant 0 : i32
    return %arg0, %c0_i32, %c0_i32_0, %c0_i32_1 : i32, i32, i32, i32
  }
  func.func @transform_1(%arg0: i32) -> (i32, i32) {
    %c0_i32 = arith.constant 0 : i32
    %c0_i32_0 = arith.constant 0 : i32
    %c0_i32_1 = arith.constant 0 : i32
    return %c0_i32, %c0_i32_0 : i32, i32
  }
  func.func @transform_2(%arg0: i32) -> (i32, i32) {
    %c0_i32 = arith.constant 0 : i32
    %c0_i32_0 = arith.constant 0 : i32
    %c0_i32_1 = arith.constant 0 : i32
    return %c0_i32, %c0_i32_0 : i32, i32
  }
  func.func @transform_3(%arg0: i32) -> (i32, i32) {
    %c0_i32 = arith.constant 0 : i32
    %c0_i32_0 = arith.constant 0 : i32
    %c0_i32_1 = arith.constant 0 : i32
    return %c0_i32, %c0_i32_0 : i32, i32
  }
  func.func @transform_4(%arg0: i32) -> (i32, i32) {
    %c0_i32 = arith.constant 0 : i32
    %c0_i32_0 = arith.constant 0 : i32
    %c0_i32_1 = arith.constant 0 : i32
    return %c0_i32, %c0_i32_0 : i32, i32
  }
  func.func @transform_5(%arg0: i32) -> (i32, i32, i32, i32) {
    %c0_i32 = arith.constant 0 : i32
    %c0_i32_0 = arith.constant 0 : i32
    %c0_i32_1 = arith.constant 0 : i32
    %c0_i32_2 = arith.constant 0 : i32
    return %arg0, %c0_i32, %c0_i32_0, %c0_i32_1 : i32, i32, i32, i32
  }
  func.func @transform_6(%arg0: i32) -> (i32, i32, i32) {
    %c0_i32 = arith.constant 0 : i32
    %c0_i32_0 = arith.constant 0 : i32
    %c0_i32_1 = arith.constant 0 : i32
    return %arg0, %c0_i32, %c0_i32_0 : i32, i32, i32
  }
}

module attributes {stable_mosaic.version = 11 : i64} {
  func.func @_affine_kernel(%arg0: i32, %arg1: memref<1x16x16x8xf32, #tpu.memory_space<vmem>>, %arg2: memref<1x8xf32, #tpu.memory_space<vmem>>, %arg3: memref<1x8xf32, #tpu.memory_space<vmem>>, %arg4: memref<1x16x16x8xf32, #tpu.memory_space<vmem>>) attributes {dimension_semantics = [#tpu.dimension_semantics<parallel>], iteration_bounds = array<i64: 2>, scalar_prefetch = 0 : i64, scratch_operands = 0 : i64, tpu.core_type = #tpu.core_type<tc>, window_params = [{transform_indices = @transform_0, window_bounds = array<i64: 1, 16, 16, 8>}, {pipeline_mode = #tpu.pipeline_mode<synchronous>, transform_indices = @transform_1, window_bounds = array<i64: 1, 8>}, {pipeline_mode = #tpu.pipeline_mode<synchronous>, transform_indices = @transform_2, window_bounds = array<i64: 1, 8>}, {transform_indices = @transform_3, window_bounds = array<i64: 1, 16, 16, 8>}]} {
    %c0 = arith.constant 0 : index
    %c0_0 = arith.constant 0 : index
    %c0_1 = arith.constant 0 : index
    %c0_2 = arith.constant 0 : index
    %0 = vector.load %arg1[%c0, %c0_0, %c0_1, %c0_2] : memref<1x16x16x8xf32, #tpu.memory_space<vmem>>, vector<1x16x16x8xf32>
    %c0_3 = arith.constant 0 : index
    %c0_4 = arith.constant 0 : index
    %1 = vector.load %arg2[%c0_3, %c0_4] : memref<1x8xf32, #tpu.memory_space<vmem>>, vector<1x8xf32>
    %2 = vector.shape_cast %1 : vector<1x8xf32> to vector<1x1x1x8xf32>
    %3 = vector.broadcast %2 : vector<1x1x1x8xf32> to vector<1x16x16x8xf32>
    %4 = arith.mulf %0, %3 : vector<1x16x16x8xf32>
    %c0_5 = arith.constant 0 : index
    %c0_6 = arith.constant 0 : index
    %5 = vector.load %arg3[%c0_5, %c0_6] : memref<1x8xf32, #tpu.memory_space<vmem>>, vector<1x8xf32>
    %6 = vector.shape_cast %5 : vector<1x8xf32> to vector<1x1x1x8xf32>
    %7 = vector.broadcast %6 : vector<1x1x1x8xf32> to vector<1x16x16x8xf32>
    %8 = arith.addf %4, %7 : vector<1x16x16x8xf32>
    %c0_7 = arith.constant 0 : index
    %c0_8 = arith.constant 0 : index
    %c0_9 = arith.constant 0 : index
    %c0_10 = arith.constant 0 : index
    %9 = vector.load %arg4[%c0_7, %c0_8, %c0_9, %c0_10] : memref<1x16x16x8xf32, #tpu.memory_space<vmem>>, vector<1x16x16x8xf32>
    tpu.vector_store %arg4[%c0_7, %c0_8, %c0_9, %c0_10], %8 {strides = array<i32>} : memref<1x16x16x8xf32, #tpu.memory_space<vmem>>, vector<1x16x16x8xf32>,
    return
  }
  func.func @transform_0(%arg0: i32) -> (i32, i32, i32, i32) {
    %c0_i32 = arith.constant 0 : i32
    %c0_i32_0 = arith.constant 0 : i32
    %c0_i32_1 = arith.constant 0 : i32
    %c0_i32_2 = arith.constant 0 : i32
    return %arg0, %c0_i32, %c0_i32_0, %c0_i32_1 : i32, i32, i32, i32
  }
  func.func @transform_1(%arg0: i32) -> (i32, i32) {
    %c0_i32 = arith.constant 0 : i32
    %c0_i32_0 = arith.constant 0 : i32
    %c0_i32_1 = arith.constant 0 : i32
    return %c0_i32, %c0_i32_0 : i32, i32
  }
  func.func @transform_2(%arg0: i32) -> (i32, i32) {
    %c0_i32 = arith.constant 0 : i32
    %c0_i32_0 = arith.constant 0 : i32
    %c0_i32_1 = arith.constant 0 : i32
    return %c0_i32, %c0_i32_0 : i32, i32
  }
  func.func @transform_3(%arg0: i32) -> (i32, i32, i32, i32) {
    %c0_i32 = arith.constant 0 : i32
    %c0_i32_0 = arith.constant 0 : i32
    %c0_i32_1 = arith.constant 0 : i32
    %c0_i32_2 = arith.constant 0 : i32
    return %arg0, %c0_i32, %c0_i32_0, %c0_i32_1 : i32, i32, i32, i32
  }
}

</mosaic_0001>

<bundles_post_ra>
// kernel: sep_conv.5
= control target key start
LH: loop header
LB: loop body
LE: loop exit
PB: predicated region body
PF: predicated region fallthrough
CT: control target
= control target key end

     0   :  { %s414_s12 = smov 0   ;;  %s605_s0 = inlined_call_operand.vmem [shape: f32[2,16,16,8], index: 0, kind: input, shape index: {}]   ;;  %s606_s1 = inlined_call_operand.vmem [shape: f32[1,8], index: 1, kind: input, shape index: {}]   ;;  %s607_s2 = inlined_call_operand.vmem [shape: f32[1,8], index: 2, kind: input, shape index: {}]   ;;  %s608_s3 = inlined_call_operand.vmem [shape: f32[2,16,16,8], index: 3, kind: output, shape index: {}]  }
   0x1 LB: > { %s363_s13 = sadd.s32 4294967295, %s392_s12   ;;  %p367_p0 = scmp.ge.s32.totalorder %s392_s12, 1  ;;  %s392_s12 = sphi %s414_s12, %s13_s12  }
   0x2   : > { %p137_p1 = scmp.lt.s32.totalorder %s392_s12, 3 }
   0x4   : > { %p138_p2 = pnand %p367_p0, %p137_p1 }
   0x5   : > { %p161_p3 = scmp.lt.s32.totalorder (!%p138_p2), %s363_s13, 1 }
   0x6   : > { %141 = sbr.rel (%p138_p2) target bundleno = 51 (0x33), region = 32 }
   0xb   : > { %s610_s13 = smov (!%p161_p3, %s363_s13), 1  ;;  %v425_v0 = vld [vmem:[%s606_s1] ss:$0 sm:$0xff]  ;;  %vm275_vm0 = vcmask 64512  }
   0xc   : > { %s374_s16 = sshll.u32 %s610_s13, 8  ;;  %v435_v1 = vld [vmem:[%s607_s2] ss:$0 sm:$0xff] }
   0xd   : > { %s430_s19 = scalar_lea.vmem %s605_s0, %s374_s16  ;;  %s449_s24 = scalar_lea.vmem %s608_s3, %s374_s16 }
   0xe   : > { %v171_v2 = vld [vmem:[%s430_s19] sm:$0xff]  ;;  %v172_v3 = vld [vmem:[%s430_s19 + $0x8] sm:$0xff]  ;;  %v173_v4 = vld [vmem:[%s430_s19 + $0x10] sm:$0xff] }
   0xf   : > { %v207_v5 = vmul.f32 %v425_v0, %v171_v2  ;;  %v208_v6 = vmul.f32 %v425_v0, %v172_v3  ;;  %v209_v7 = vmul.f32 %v425_v0, %v173_v4  ;;  %v174_v8 = vld [vmem:[%s430_s19 + $0x18] sm:$0xff]  ;;  %v175_v9 = vld [vmem:[%s430_s19 + $0x20] sm:$0xff]  ;;  %v176_v10 = vld [vmem:[%s430_s19 + $0x28] sm:$0xff] }
  0x10   : > { %v210_v11 = vmul.f32 %v425_v0, %v174_v8  ;;  %v211_v12 = vmul.f32 %v425_v0, %v175_v9  ;;  %v212_v13 = vmul.f32 %v425_v0, %v176_v10  ;;  %v177_v14 = vld [vmem:[%s430_s19 + $0x30] sm:$0xff]  ;;  %v178_v15 = vld [vmem:[%s430_s19 + $0x38] sm:$0xff]  ;;  %v179_v16 = vld [vmem:[%s430_s19 + $0x40] sm:$0xff] }
  0x11   : > { %v243_v17 = vadd.f32 %v435_v1, %v207_v5  ;;  %v244_v18 = vadd.f32 %v435_v1, %v208_v6  ;;  %v245_v19 = vadd.f32 %v435_v1, %v209_v7  ;;  %v213_v20 = vmul.f32 %v425_v0, %v177_v14  ;;  %v180_v21 = vld [vmem:[%s430_s19 + $0x48] sm:$0xff]  ;;  %v181_v24 = vld [vmem:[%s430_s19 + $0x50] sm:$0xff]  ;;  %v182_v27 = vld [vmem:[%s430_s19 + $0x58] sm:$0xff] }
  0x12   : > { %v246_v22 = vadd.f32 %v435_v1, %v210_v11  ;;  %v214_v23 = vmul.f32 %v425_v0, %v178_v15  ;;  %v247_v25 = vadd.f32 %v435_v1, %v211_v12  ;;  %v215_v26 = vmul.f32 %v425_v0, %v179_v16  ;;  %v183_v30 = vld [vmem:[%s430_s19 + $0x60] sm:$0xff]  ;;  %v184_v33 = vld [vmem:[%s430_s19 + $0x68] sm:$0xff]  ;;  %v185_v36 = vld [vmem:[%s430_s19 + $0x70] sm:$0xff] }
  0x13   : > { %276 = vst.msk [vmem:[%s449_s24] sm:$0xff] %vm275_vm0, %v243_v17  ;;  %v248_v28 = vadd.f32 %v435_v1, %v212_v13  ;;  %v216_v29 = vmul.f32 %v425_v0, %v180_v21  ;;  %v249_v31 = vadd.f32 %v435_v1, %v213_v20  ;;  %v217_v32 = vmul.f32 %v425_v0, %v181_v24  ;;  %v186_v39 = vld [vmem:[%s430_s19 + $0x78] sm:$0xff]  ;;  %v187_v42 = vld [vmem:[%s430_s19 + $0x80] sm:$0xff]  ;;  %v188_v45 = vld [vmem:[%s430_s19 + $0x88] sm:$0xff] }
  0x14   : > { %277 = vst.msk [vmem:[%s449_s24 + $0x8] sm:$0xff] %vm275_vm0, %v244_v18  ;;  %v250_v34 = vadd.f32 %v435_v1, %v214_v23  ;;  %v218_v35 = vmul.f32 %v425_v0, %v182_v27  ;;  %v251_v37 = vadd.f32 %v435_v1, %v215_v26  ;;  %v219_v38 = vmul.f32 %v425_v0, %v183_v30  ;;  %v189_v48 = vld [vmem:[%s430_s19 + $0x90] sm:$0xff]  ;;  %v190_v51 = vld [vmem:[%s430_s19 + $0x98] sm:$0xff]  ;;  %v191_v54 = vld [vmem:[%s430_s19 + $0xa0] sm:$0xff] }
  0x15   : > { %278 = vst.msk [vmem:[%s449_s24 + $0x10] sm:$0xff] %vm275_vm0, %v245_v19  ;;  %v252_v40 = vadd.f32 %v435_v1, %v216_v29  ;;  %v220_v41 = vmul.f32 %v425_v0, %v184_v33  ;;  %v253_v43 = vadd.f32 %v435_v1, %v217_v32  ;;  %v221_v44 = vmul.f32 %v425_v0, %v185_v36  ;;  %v192_v57 = vld [vmem:[%s430_s19 + $0xa8] sm:$0xff]  ;;  %v193_v60 = vld [vmem:[%s430_s19 + $0xb0] sm:$0xff]  ;;  %v194_v63 = vld [vmem:[%s430_s19 + $0xb8] sm:$0xff] }
  0x16   : > { %279 = vst.msk [vmem:[%s449_s24 + $0x18] sm:$0xff] %vm275_vm0, %v246_v22  ;;  %v254_v46 = vadd.f32 %v435_v1, %v218_v35  ;;  %v222_v47 = vmul.f32 %v425_v0, %v186_v39  ;;  %v255_v49 = vadd.f32 %v435_v1, %v219_v38  ;;  %v223_v50 = vmul.f32 %v425_v0, %v187_v42  ;;  %v195_v4 = vld [vmem:[%s430_s19 + $0xc0] sm:$0xff]  ;;  %v196_v7 = vld [vmem:[%s430_s19 + $0xc8] sm:$0xff]  ;;  %v197_v10 = vld [vmem:[%s430_s19 + $0xd0] sm:$0xff] }
  0x17   : > { %280 = vst.msk [vmem:[%s449_s24 + $0x20] sm:$0xff] %vm275_vm0, %v247_v25  ;;  %v256_v52 = vadd.f32 %v435_v1, %v220_v41  ;;  %v224_v53 = vmul.f32 %v425_v0, %v188_v45  ;;  %v257_v55 = vadd.f32 %v435_v1, %v221_v44  ;;  %v225_v56 = vmul.f32 %v425_v0, %v189_v48  ;;  %v198_v13 = vld [vmem:[%s430_s19 + $0xd8] sm:$0xff]  ;;  %v199_v16 = vld [vmem:[%s430_s19 + $0xe0] sm:$0xff]  ;;  %v200_v19 = vld [vmem:[%s430_s19 + $0xe8] sm:$0xff] }
  0x18   : > { %281 = vst.msk [vmem:[%s449_s24 + $0x28] sm:$0xff] %vm275_vm0, %v248_v28  ;;  %v258_v58 = vadd.f32 %v435_v1, %v222_v47  ;;  %v226_v59 = vmul.f32 %v425_v0, %v190_v51  ;;  %v259_v61 = vadd.f32 %v435_v1, %v223_v50  ;;  %v227_v62 = vmul.f32 %v425_v0, %v191_v54  ;;  %v201_v22 = vld [vmem:[%s430_s19 + $0xf0] sm:$0xff]  ;;  %v202_v25 = vld [vmem:[%s430_s19 + $0xf8] sm:$0xff] }
  0x19   : > { %282 = vst.msk [vmem:[%s449_s24 + $0x30] sm:$0xff] %vm275_vm0, %v249_v31  ;;  %v260_v2 = vadd.f32 %v435_v1, %v224_v53  ;;  %v228_v3 = vmul.f32 %v425_v0, %v192_v57  ;;  %v261_v5 = vadd.f32 %v435_v1, %v225_v56  ;;  %v229_v6 = vmul.f32 %v425_v0, %v193_v60 }
  0x1a   : > { %283 = vst.msk [vmem:[%s449_s24 + $0x38] sm:$0xff] %vm275_vm0, %v250_v34  ;;  %v262_v8 = vadd.f32 %v435_v1, %v226_v59  ;;  %v230_v9 = vmul.f32 %v425_v0, %v194_v63  ;;  %v263_v11 = vadd.f32 %v435_v1, %v227_v62  ;;  %v231_v12 = vmul.f32 %v425_v0, %v195_v4 }
  0x1b   : > { %284 = vst.msk [vmem:[%s449_s24 + $0x40] sm:$0xff] %vm275_vm0, %v251_v37  ;;  %v264_v14 = vadd.f32 %v435_v1, %v228_v3  ;;  %v232_v15 = vmul.f32 %v425_v0, %v196_v7  ;;  %v265_v17 = vadd.f32 %v435_v1, %v229_v6  ;;  %v233_v18 = vmul.f32 %v425_v0, %v197_v10 }
  0x1c   : > { %285 = vst.msk [vmem:[%s449_s24 + $0x48] sm:$0xff] %vm275_vm0, %v252_v40  ;;  %v266_v20 = vadd.f32 %v435_v1, %v230_v9  ;;  %v234_v21 = vmul.f32 %v425_v0, %v198_v13  ;;  %v267_v23 = vadd.f32 %v435_v1, %v231_v12  ;;  %v235_v24 = vmul.f32 %v425_v0, %v199_v16 }
  0x1d   : > { %286 = vst.msk [vmem:[%s449_s24 + $0x50] sm:$0xff] %vm275_vm0, %v253_v43  ;;  %v268_v26 = vadd.f32 %v435_v1, %v232_v15  ;;  %v236_v27 = vmul.f32 %v425_v0, %v200_v19  ;;  %v269_v28 = vadd.f32 %v435_v1, %v233_v18  ;;  %v237_v29 = vmul.f32 %v425_v0, %v201_v22 }
  0x1e   : > { %287 = vst.msk [vmem:[%s449_s24 + $0x58] sm:$0xff] %vm275_vm0, %v254_v46  ;;  %v270_v30 = vadd.f32 %v435_v1, %v234_v21  ;;  %v238_v31 = vmul.f32 %v425_v0, %v202_v25  ;;  %v271_v32 = vadd.f32 %v435_v1, %v235_v24 }
  0x1f   : > { %288 = vst.msk [vmem:[%s449_s24 + $0x60] sm:$0xff] %vm275_vm0, %v255_v49  ;;  %v272_v33 = vadd.f32 %v435_v1, %v236_v27  ;;  %v273_v34 = vadd.f32 %v435_v1, %v237_v29 }
  0x20   : > { %289 = vst.msk [vmem:[%s449_s24 + $0x68] sm:$0xff] %vm275_vm0, %v256_v52  ;;  %v274_v35 = vadd.f32 %v435_v1, %v238_v31 }
  0x21   : > { %290 = vst.msk [vmem:[%s449_s24 + $0x70] sm:$0xff] %vm275_vm0, %v257_v55 }
  0x22   : > { %291 = vst.msk [vmem:[%s449_s24 + $0x78] sm:$0xff] %vm275_vm0, %v258_v58 }
  0x23   : > { %292 = vst.msk [vmem:[%s449_s24 + $0x80] sm:$0xff] %vm275_vm0, %v259_v61 }
  0x24   : > { %293 = vst.msk [vmem:[%s449_s24 + $0x88] sm:$0xff] %vm275_vm0, %v260_v2 }
  0x25   : > { %294 = vst.msk [vmem:[%s449_s24 + $0x90] sm:$0xff] %vm275_vm0, %v261_v5 }
  0x26   : > { %295 = vst.msk [vmem:[%s449_s24 + $0x98] sm:$0xff] %vm275_vm0, %v262_v8 }
  0x27   : > { %296 = vst.msk [vmem:[%s449_s24 + $0xa0] sm:$0xff] %vm275_vm0, %v263_v11 }
  0x28   : > { %297 = vst.msk [vmem:[%s449_s24 + $0xa8] sm:$0xff] %vm275_vm0, %v264_v14 }
  0x29   : > { %298 = vst.msk [vmem:[%s449_s24 + $0xb0] sm:$0xff] %vm275_vm0, %v265_v17 }
  0x2a   : > { %299 = vst.msk [vmem:[%s449_s24 + $0xb8] sm:$0xff] %vm275_vm0, %v266_v20 }
  0x2b   : > { %300 = vst.msk [vmem:[%s449_s24 + $0xc0] sm:$0xff] %vm275_vm0, %v267_v23 }
  0x2c   : > { %301 = vst.msk [vmem:[%s449_s24 + $0xc8] sm:$0xff] %vm275_vm0, %v268_v26 }
  0x2d   : > { %302 = vst.msk [vmem:[%s449_s24 + $0xd0] sm:$0xff] %vm275_vm0, %v269_v28 }
  0x2e   : > { %303 = vst.msk [vmem:[%s449_s24 + $0xd8] sm:$0xff] %vm275_vm0, %v270_v30 }
  0x2f   : > { %304 = vst.msk [vmem:[%s449_s24 + $0xe0] sm:$0xff] %vm275_vm0, %v271_v32 }
  0x30   : > { %305 = vst.msk [vmem:[%s449_s24 + $0xe8] sm:$0xff] %vm275_vm0, %v272_v33 }
  0x31   : > { %306 = vst.msk [vmem:[%s449_s24 + $0xf0] sm:$0xff] %vm275_vm0, %v273_v34 }
  0x32   : > { %307 = vst.msk [vmem:[%s449_s24 + $0xf8] sm:$0xff] %vm275_vm0, %v274_v35 }
  0x33 PF: > { %s13_s12 = sadd.s32 1, %s392_s12  }
  0x34   : > { %p10_p4 = scmp.ge.s32.totalorder %s13_s12, 4  }
  0x36   :  { %12 = sbr.rel (!%p10_p4) target bundleno = 1 (0x1), region = 62 }

// kernel: sep_conv.4
= control target key start
LH: loop header
LB: loop body
LE: loop exit
PB: predicated region body
PF: predicated region fallthrough
CT: control target
= control target key end

     0   :  { %s2002_s21 = smov 0   ;;  %s3425_s0 = inlined_call_operand.vmem [shape: f32[2,16,16,4], index: 0, kind: input, shape index: {}]   ;;  %s3426_s1 = inlined_call_operand.vmem [shape: f32[1,4], index: 1, kind: input, shape index: {}]   ;;  %s3427_s2 = inlined_call_operand.vmem [shape: f32[1,4], index: 2, kind: input, shape index: {}]   ;;  %s3428_s3 = inlined_call_operand.vmem [shape: f32[9,4], index: 3, kind: input, shape index: {}]   ;;  %s3429_s4 = inlined_call_operand.vmem [shape: f32[4,8], index: 4, kind: input, shape index: {}]   ;;  %s3430_s5 = inlined_call_operand.vmem [shape: f32[2,16,16,8], index: 5, kind: output, shape index: {0}]   ;;  %s3431_s6 = inlined_call_operand.vmem [shape: f32[2,2,8], index: 6, kind: output, shape index: {1}]  }
   0x1 LB: > { %s1877_s22 = sadd.s32 4294967295, %s1964_s21   ;;  %p1881_p0 = scmp.ge.s32.totalorder %s1964_s21, 1  ;;  %s1964_s21 = sphi %s2002_s21, %s17_s21  }
   0x2   : > { %p215_p1 = scmp.lt.s32.totalorder %s1964_s21, 3 }
   0x4   : > { %p216_p2 = pnand %p1881_p0, %p215_p1 }
   0x6   : > { %219 = sbr.rel (%p216_p2) target bundleno = 389 (0x185), region = 40 }
   0xb   : > { %v1371_v0 = vld [vmem:[%s3429_s4] sm:$0xf]  ;;  %vm1468_vm0 = vcmask 1043456   ;;  %p249_p3 = scmp.lt.s32.totalorder %s1877_s22, 1  ;;  %vm399_vm1 = vcmask 31744   ;;  %v1966_v2 = vmov 0.0  }
   0xc   : > { %1887 = vmatpush.msk.msra.mxu0 %vm1468_vm0, %v1371_v0  ;;  %1924 = vmatpush.msk.msra.mxu1 %vm1468_vm0, %v1371_v0  ;;  %v2018_v1 = vld [vmem:[%s3426_s1] ss:$0 sm:$0xff]  ;;  %400 = vst.msk [vmem:[#allocation2] sm:$0xff] %vm399_vm1, %v1966_v2  ;;  %vm402_vm2 = vcmask 25600   ;;  %v2061_v13 = vld [vmem:[%s3428_s3 + $0x1] ss:$0 sm:$0xff] }
   0xd   : > { %s3615_s22 = smov (!%p249_p3, %s1877_s22), 1  ;;  %1925 = vmatpush.msk.msra.mxu2 %vm1468_vm0, %v1371_v0  ;;  %1926 = vmatpush.msk.msra.mxu3 %vm1468_vm0, %v1371_v0  ;;  %3501 = vst [vmem:[#allocation3_spill] sm:$0xff] %v2018_v1  ;;  %v2035_v3 = vld [vmem:[%s3427_s2] ss:$0 sm:$0xff]  ;;  %v2071_v17 = vld [vmem:[%s3428_s3 + $0x2] ss:$0 sm:$0xff] }
   0xe   : > { %s1922_s27 = sshll.u32 %s3615_s22, 8  ;;  %401 = vst.msk [vmem:[#allocation2 + $0x8] sm:$0xff] %vm399_vm1, %v1966_v2  ;;  %v2053_v11 = vld [vmem:[%s3428_s3] ss:$0 sm:$0xff]  ;;  %v2090_v30 = vld [vmem:[%s3428_s3 + $0x3] ss:$0 sm:$0xff] }
   0xf   : > { %s2030_s30 = scalar_lea.vmem %s3425_s0, %s1922_s27  ;;  %3502 = vst [vmem:[#allocation4_spill] sm:$0xff] %v2035_v3  ;;  %v2095_v31 = vld [vmem:[%s3428_s3 + $0x4] ss:$0 sm:$0xff]  ;;  %v2104_v33 = vld [vmem:[%s3428_s3 + $0x5] ss:$0 sm:$0xff]  ;;  %s3226_s10 = scalar_lea.vmem %s3430_s5, %s1922_s27  ;;  %vm1585_vm3 = vcmask 64512  }
  0x10   : > { %404 = vst.msk [vmem:[#allocation2 + $0x18] sm:$0xff] %vm399_vm1, %v1966_v2  ;;  %v263_v4 = vld [vmem:[%s2030_s30] sm:$0xff]  ;;  %v264_v5 = vld [vmem:[%s2030_s30 + $0x8] sm:$0xff]  ;;  %v265_v6 = vld [vmem:[%s2030_s30 + $0x10] sm:$0xff]  ;;  %s1886_s27 = sshll.u32 %s3615_s22, 1  ;;  %vm1655_vm4 = vcmask 57344  }
  0x11   : > { %405 = vst.msk [vmem:[#allocation2 + $0x20] sm:$0xff] %vm399_vm1, %v1966_v2  ;;  %v266_v7 = vld [vmem:[%s2030_s30 + $0x18] sm:$0xff]  ;;  %v299_v8 = vmul.f32 %v2018_v1, %v263_v4  ;;  %v300_v9 = vmul.f32 %v2018_v1, %v264_v5  ;;  %v301_v10 = vmul.f32 %v2018_v1, %v265_v6  ;;  %v2123_v40 = vld [vmem:[%s3428_s3 + $0x6] ss:$0 sm:$0xff]  ;;  %v2136_v44 = vld [vmem:[%s3428_s3 + $0x7] ss:$0 sm:$0xff]  ;;  %s262_s13 = scalar_lea.vmem %s3431_s6, %s1886_s27 }
  0x12   : > { %406 = vst.msk [vmem:[#allocation2 + $0x28] sm:$0x3] %vm402_vm2, %v1966_v2  ;;  %v302_v12 = vmul.f32 %v2018_v1, %v266_v7  ;;  %v2152_v52 = vld [vmem:[%s3428_s3 + $0x8] ss:$0 sm:$0xff] }
  0x13   : > { %407 = vst.msk [vmem:[#allocation2 + $0x30] sm:$0xff] %vm399_vm1, %v1966_v2  ;;  %v335_v14 = vadd.f32 %v2035_v3, %v299_v8  ;;  %v336_v15 = vadd.f32 %v2035_v3, %v300_v9  ;;  %v337_v16 = vadd.f32 %v2035_v3, %v301_v10  ;;  %v488_v19 = vld [vmem:[#allocation2] sm:$0xff] }
  0x14   : > { %408 = vst.msk [vmem:[#allocation2 + $0x38] sm:$0xff] %vm399_vm1, %v1966_v2  ;;  %v338_v18 = vadd.f32 %v2035_v3, %v302_v12  ;;  %v522_v23 = vmul.f32 %v2053_v11, %v488_v19 }
  0x15   : > { %409 = vst.msk [vmem:[#allocation2 + $0x40] sm:$0x3] %vm402_vm2, %v1966_v2  ;;  %v367_v20 = vmax.f32 %v335_v14, 0.0  ;;  %v368_v21 = vmax.f32 %v336_v15, 0.0  ;;  %v369_v22 = vmax.f32 %v337_v16, 0.0  ;;  %v586_v24 = vld [vmem:[#allocation2 + $0x1] sm:$0xff] }
  0x16   : > { %410 = vst.msk [vmem:[#allocation2 + $0x48] sm:$0xff] %vm399_vm1, %v1966_v2  ;;  %v370_v25 = vmax.f32 %v338_v18, 0.0  ;;  %v620_v26 = vmul.f32 %v2061_v13, %v586_v24  ;;  %v684_v27 = vld [vmem:[#allocation2 + $0x2] sm:$0xff] }
  0x17   : > { %411 = vst.msk [vmem:[#allocation2 + $0x50] sm:$0xff] %vm399_vm1, %v1966_v2  ;;  %v718_v29 = vmul.f32 %v2071_v17, %v684_v27  ;;  %v489_v36 = vld [vmem:[#allocation2 + $0x8] sm:$0xff] }
  0x18   : > { %456 = vst.msk [vmem:[#allocation2 + $0x19] sm:$0xff] %vm399_vm1, %v367_v20  ;;  %v652_v28 = vadd.f32 %v620_v26, %v522_v23  ;;  %v523_v45 = vmul.f32 %v2053_v11, %v489_v36  ;;  %v268_v26 = vld [vmem:[%s2030_s30 + $0x28] sm:$0xff] }
  0x19   : > { %457 = vst.msk [vmem:[#allocation2 + $0x21] sm:$0xff] %vm399_vm1, %v368_v21  ;;  %v272_v36 = vld [vmem:[%s2030_s30 + $0x48] sm:$0xff] }
  0x1a   : > { %458 = vst.msk [vmem:[#allocation2 + $0x31] sm:$0xff] %vm399_vm1, %v369_v22  ;;  %v750_v32 = vadd.f32 %v718_v29, %v652_v28  ;;  %v269_v29 = vld [vmem:[%s2030_s30 + $0x30] sm:$0xff] }
  0x1b   : > { %459 = vst.msk [vmem:[#allocation2 + $0x39] sm:$0xff] %vm399_vm1, %v370_v25  ;;  %v267_v25 = vld [vmem:[%s2030_s30 + $0x20] sm:$0xff] }
  0x1c   : > { %403 = vst.msk [vmem:[#allocation2 + $0x10] sm:$0x3] %vm402_vm2, %v1966_v2 }
  0x1d   : > { %412 = vst.msk [vmem:[#allocation2 + $0x58] sm:$0x3] %vm402_vm2, %v1966_v2 }
  0x1e   : > { %413 = vst.msk [vmem:[#allocation2 + $0x60] sm:$0xff] %vm399_vm1, %v1966_v2 }
  0x1f   : > { %v2108_v34 = vld [vmem:[#allocation2 + $0x18] sm:$0xff]  ;;  %414 = vst.msk [vmem:[#allocation2 + $0x68] sm:$0xff] %vm399_vm1, %v1966_v2 }
  0x20   : > { %v2110_v35 = vld [vmem:[#allocation2 + $0x19] sm:$0xff]  ;;  %v816_v37 = vmul.f32 %v2090_v30, %v2108_v34  ;;  %415 = vst.msk [vmem:[#allocation2 + $0x70] sm:$0x3] %vm402_vm2, %v1966_v2  ;;  %v2162_v56 = vld [vmem:[#allocation2 + $0x21] sm:$0xff]  ;;  %v524_v21 = vmul.f32 %v2053_v11, %v2108_v34  ;;  %v303_v34 = vmul.f32 %v2018_v1, %v267_v25 }
  0x21   : > { %v914_v38 = vmul.f32 %v2095_v31, %v2110_v35  ;;  %v2118_v39 = vld [vmem:[#allocation2 + $0x1a] sm:$0xff]  ;;  %v2127_v41 = vld [vmem:[#allocation2 + $0x30] sm:$0xff]  ;;  %416 = vst.msk [vmem:[#allocation2 + $0x78] sm:$0xff] %vm399_vm1, %v1966_v2  ;;  %v2172_v61 = vld [vmem:[#allocation2 + $0x22] sm:$0xff]  ;;  %v915_v4 = vmul.f32 %v2095_v31, %v2162_v56  ;;  %v622_v22 = vmul.f32 %v2061_v13, %v2110_v35 }
  0x22   : > { %v848_v42 = vadd.f32 %v816_v37, %v750_v32  ;;  %v1012_v43 = vmul.f32 %v2104_v33, %v2118_v39  ;;  %417 = vst.msk [vmem:[#allocation2 + $0x80] sm:$0xff] %vm399_vm1, %v1966_v2  ;;  %v2141_v46 = vld [vmem:[#allocation2 + $0x20] sm:$0xff]  ;;  %v2143_v47 = vld [vmem:[#allocation2 + $0x31] sm:$0xff]  ;;  %v1111_v51 = vmul.f32 %v2123_v40, %v2127_v41  ;;  %v1013_v8 = vmul.f32 %v2104_v33, %v2172_v61 }
  0x23   : > { %418 = vst.msk [vmem:[#allocation2 + $0x88] sm:$0x3] %vm402_vm2, %v1966_v2  ;;  %v587_v48 = vld [vmem:[#allocation2 + $0x9] sm:$0xff]  ;;  %v2158_v55 = vld [vmem:[#allocation2 + $0x32] sm:$0xff]  ;;  %v1209_v58 = vmul.f32 %v2136_v44, %v2143_v47  ;;  %v817_v60 = vmul.f32 %v2090_v30, %v2141_v46  ;;  %v2198_v15 = vld [vmem:[#allocation2 + $0x3a] sm:$0xff]  ;;  %v654_v27 = vadd.f32 %v622_v22, %v524_v21  ;;  %v720_v28 = vmul.f32 %v2071_v17, %v2118_v39 }
  0x24   : > { %v685_v49 = vld [vmem:[#allocation2 + $0xa] sm:$0xff]  ;;  %v946_v50 = vadd.f32 %v914_v38, %v848_v42  ;;  %419 = vst.msk [vmem:[#allocation2 + $0x90] sm:$0xff] %vm399_vm1, %v1966_v2  ;;  %v621_v53 = vmul.f32 %v2061_v13, %v587_v48  ;;  %v1307_v63 = vmul.f32 %v2152_v52, %v2158_v55  ;;  %v2182_v5 = vld [vmem:[#allocation2 + $0x38] sm:$0xff]  ;;  %v1308_v20 = vmul.f32 %v2152_v52, %v2198_v15  ;;  %v271_v35 = vld [vmem:[%s2030_s30 + $0x40] sm:$0xff] }
  0x25   : > { %v719_v54 = vmul.f32 %v2071_v17, %v685_v49  ;;  %420 = vst.msk [vmem:[#allocation2 + $0x98] sm:$0xff] %vm399_vm1, %v1966_v2  ;;  %v2190_v9 = vld [vmem:[#allocation2 + $0x39] sm:$0xff]  ;;  %v1112_v14 = vmul.f32 %v2123_v40, %v2182_v5  ;;  %v304_v37 = vmul.f32 %v2018_v1, %v268_v26  ;;  %v273_v38 = vld [vmem:[%s2030_s30 + $0x50] sm:$0xff]  ;;  %v305_v39 = vmul.f32 %v2018_v1, %v269_v29 }
  0x26   : > { %v1044_v57 = vadd.f32 %v1012_v43, %v946_v50  ;;  %421 = vst.msk [vmem:[#allocation2 + $0xa0] sm:$0x3] %vm402_vm2, %v1966_v2  ;;  %v653_v59 = vadd.f32 %v621_v53, %v523_v45  ;;  %v1210_v18 = vmul.f32 %v2136_v44, %v2190_v9  ;;  %v270_v32 = vld [vmem:[%s2030_s30 + $0x38] sm:$0xff]  ;;  %v752_v42 = vadd.f32 %v720_v28, %v654_v27 }
  0x27   : > { %422 = vst.msk [vmem:[#allocation2 + $0xa8] sm:$0xff] %vm399_vm1, %v1966_v2  ;;  %v818_v43 = vmul.f32 %v2090_v30, %v2127_v41  ;;  %v306_v45 = vmul.f32 %v2018_v1, %v270_v32  ;;  %v274_v48 = vld [vmem:[%s2030_s30 + $0x58] sm:$0xff]  ;;  %v307_v49 = vmul.f32 %v2018_v1, %v271_v35  ;;  %v308_v50 = vmul.f32 %v2018_v1, %v272_v36  ;;  %v275_v32 = vld [vmem:[%s2030_s30 + $0x60] sm:$0xff] }
  0x28   : > { %v1143_v62 = vadd.f32 %v1111_v51, %v1044_v57  ;;  %423 = vst.msk [vmem:[#allocation2 + $0xb0] sm:$0xff] %vm399_vm1, %v1966_v2  ;;  %v751_v0 = vadd.f32 %v719_v54, %v653_v59  ;;  %v525_v51 = vmul.f32 %v2053_v11, %v2141_v46  ;;  %v623_v53 = vmul.f32 %v2061_v13, %v2162_v56  ;;  %v278_v59 = vld [vmem:[%s2030_s30 + $0x78] sm:$0xff] }
  0x29   : > { %424 = vst.msk [vmem:[#allocation2 + $0xb8] sm:$0x3] %vm402_vm2, %v1966_v2  ;;  %v2261_v54 = vadd.f32 %v2035_v3, %v303_v34  ;;  %v309_v57 = vmul.f32 %v2018_v1, %v273_v38  ;;  %v2272_v46 = vadd.f32 %v2035_v3, %v305_v39  ;;  %v819_v22 = vmul.f32 %v2090_v30, %v2182_v5  ;;  %v282_v29 = vld [vmem:[%s2030_s30 + $0x98] sm:$0xff] }
  0x2a   : > { %v1241_v6 = vadd.f32 %v1209_v58, %v1143_v62  ;;  %425 = vst.msk [vmem:[#allocation2 + $0xc0] sm:$0xff] %vm399_vm1, %v1966_v2  ;;  %v849_v7 = vadd.f32 %v817_v60, %v751_v0  ;;  %v277_v58 = vld [vmem:[%s2030_s30 + $0x70] sm:$0xff]  ;;  %v2269_v60 = vadd.f32 %v2035_v3, %v304_v37  ;;  %v655_v56 = vadd.f32 %v623_v53, %v525_v51 }
  0x2b   : > { %426 = vst.msk [vmem:[#allocation2 + $0xc8] sm:$0xff] %vm399_vm1, %v1966_v2  ;;  %v721_v62 = vmul.f32 %v2071_v17, %v2172_v61  ;;  %v850_v0 = vadd.f32 %v818_v43, %v752_v42  ;;  %v2288_v61 = vadd.f32 %v2035_v3, %v307_v49  ;;  %v1014_v26 = vmul.f32 %v2104_v33, %v2158_v55 }
  0x2c   : > { %v1339_v10 = vadd.f32 %v1307_v63, %v1241_v6  ;;  %427 = vst.msk [vmem:[#allocation2 + $0xd0] sm:$0x3] %vm402_vm2, %v1966_v2  ;;  %v947_v12 = vadd.f32 %v915_v4, %v849_v7  ;;  %v279_v63 = vld [vmem:[%s2030_s30 + $0x80] sm:$0xff]  ;;  %v916_v4 = vmul.f32 %v2095_v31, %v2143_v47  ;;  %v310_v6 = vmul.f32 %v2018_v1, %v274_v48  ;;  %v285_v48 = vld [vmem:[%s2030_s30 + $0xb0] sm:$0xff] }
  0x2d   : > { %428 = vst.msk [vmem:[#allocation2 + $0xd8] sm:$0xff] %vm399_vm1, %v1966_v2  ;;  %v2283_v7 = vadd.f32 %v2035_v3, %v306_v45  ;;  %v753_v21 = vadd.f32 %v721_v62, %v655_v56  ;;  %v375_v34 = vmax.f32 %v2288_v61, 0.0  ;;  %v276_v45 = vld [vmem:[%s2030_s30 + $0x68] sm:$0xff]  ;;  %v318_v51 = vmul.f32 %v2018_v1, %v282_v29 }
  0x2e   : > { %1888 = vmatmul.msk.f32.vlgmr.msra.gmra.mxu0 %vm399_vm1, %v1339_v10  ;;  %429 = vst.msk [vmem:[#allocation2 + $0xe0] sm:$0xff] %vm399_vm1, %v1966_v2  ;;  %v1045_v16 = vadd.f32 %v1013_v8, %v947_v12  ;;  %v2291_v8 = vadd.f32 %v2035_v3, %v308_v50  ;;  %v313_v10 = vmul.f32 %v2018_v1, %v277_v58  ;;  %v284_v29 = vld [vmem:[%s2030_s30 + $0xa8] sm:$0xff] }
  0x2f   : > { %430 = vst.msk [vmem:[#allocation2 + $0xe8] sm:$0x3] %vm402_vm2, %v1966_v2  ;;  %v314_v12 = vmul.f32 %v2018_v1, %v278_v59  ;;  %v948_v25 = vadd.f32 %v916_v4, %v850_v0  ;;  %v2315_v27 = vadd.f32 %v2035_v3, %v310_v6  ;;  %v374_v28 = vmax.f32 %v2283_v7, 0.0 }
  0x30   : > { %431 = vst.msk [vmem:[#allocation2 + $0xf0] sm:$0xff] %vm399_vm1, %v1966_v2  ;;  %v1144_v19 = vadd.f32 %v1112_v14, %v1045_v16  ;;  %v371_v14 = vmax.f32 %v2261_v54, 0.0  ;;  %v2299_v16 = vadd.f32 %v2035_v3, %v309_v57  ;;  %v376_v35 = vmax.f32 %v2291_v8, 0.0  ;;  %v286_v54 = vld [vmem:[%s2030_s30 + $0xb8] sm:$0xff] }
  0x31   : > { %432 = vst.msk [vmem:[#allocation2 + $0xf8] sm:$0xff] %vm399_vm1, %v1966_v2  ;;  %v2325_v36 = vadd.f32 %v2035_v3, %v313_v10  ;;  %v2328_v37 = vadd.f32 %v2035_v3, %v314_v12  ;;  %v851_v49 = vadd.f32 %v819_v22, %v753_v21  ;;  %v917_v50 = vmul.f32 %v2095_v31, %v2190_v9  ;;  %v288_v21 = vld [vmem:[%s2030_s30 + $0xc8] sm:$0xff] }
  0x32   : > { %433 = vst.msk [vmem:[#allocation2 + $0x100] sm:$0x3] %vm402_vm2, %v1966_v2  ;;  %v1242_v23 = vadd.f32 %v1210_v18, %v1144_v19  ;;  %v315_v18 = vmul.f32 %v2018_v1, %v279_v63  ;;  %v372_v19 = vmax.f32 %v2269_v60, 0.0  ;;  %v377_v38 = vmax.f32 %v2299_v16, 0.0 }
  0x33   : > { %434 = vst.msk [vmem:[#allocation2 + $0x108] sm:$0xff] %vm399_vm1, %v1966_v2  ;;  %v311_v53 = vmul.f32 %v2018_v1, %v275_v32  ;;  %v2349_v57 = vadd.f32 %v1014_v26, %v948_v25  ;;  %v378_v58 = vmax.f32 %v2315_v27, 0.0  ;;  %v526_v59 = vmul.f32 %v2053_v11, %v2127_v41  ;;  %v289_v26 = vld [vmem:[%s2030_s30 + $0xd0] sm:$0xff] }
  0x34   : > { %435 = vst.msk [vmem:[#allocation2 + $0x110] sm:$0xff] %vm399_vm1, %v1966_v2  ;;  %v1340_v24 = vadd.f32 %v1308_v20, %v1242_v23  ;;  %v373_v20 = vmax.f32 %v2272_v46, 0.0  ;;  %v280_v23 = vld [vmem:[%s2030_s30 + $0x88] sm:$0xff]  ;;  %v2336_v43 = vadd.f32 %v2035_v3, %v315_v18  ;;  %v624_v60 = vmul.f32 %v2061_v13, %v2143_v47  ;;  %v287_v46 = vld [vmem:[%s2030_s30 + $0xc0] sm:$0xff] }
  0x35   : > { %436 = vst.msk [vmem:[#allocation2 + $0x118] sm:$0x3] %vm402_vm2, %v1966_v2  ;;  %v316_v39 = vmul.f32 %v2018_v1, %v280_v23  ;;  %v381_v56 = vmax.f32 %v2325_v36, 0.0  ;;  %v382_v62 = vmax.f32 %v2328_v37, 0.0  ;;  %v312_v63 = vmul.f32 %v2018_v1, %v276_v45 }
  0x36   : > { %437 = vst.msk [vmem:[#allocation2 + $0x120] sm:$0xff] %vm399_vm1, %v1966_v2  ;;  %1889 = vmatmul.msk.f32.gmra.mxu0 %vm399_vm1, %v1340_v24  ;;  %v281_v24 = vld [vmem:[%s2030_s30 + $0x90] sm:$0xff]  ;;  %v321_v0 = vmul.f32 %v2018_v1, %v285_v48  ;;  %v383_v4 = vmax.f32 %v2336_v43, 0.0  ;;  %v322_v6 = vmul.f32 %v2018_v1, %v286_v54  ;;  %v949_v7 = vadd.f32 %v917_v50, %v851_v49 }
  0x37   : > { %438 = vst.msk [vmem:[#allocation2 + $0x128] sm:$0xff] %vm399_vm1, %v1966_v2  ;;  %v317_v42 = vmul.f32 %v2018_v1, %v281_v24  ;;  %v2366_v41 = vadd.f32 %v2035_v3, %v316_v39  ;;  %v2375_v61 = vadd.f32 %v2035_v3, %v318_v51  ;;  %v2378_v8 = vadd.f32 %v2035_v3, %v311_v53 }
  0x38   : > { %439 = vst.msk [vmem:[#allocation2 + $0x130] sm:$0x3] %vm402_vm2, %v1966_v2  ;;  %v323_v10 = vmul.f32 %v2018_v1, %v287_v46  ;;  %v1015_v12 = vmul.f32 %v2104_v33, %v2198_v15  ;;  %v656_v16 = vadd.f32 %v624_v60, %v526_v59  ;;  %v2391_v22 = vadd.f32 %v2035_v3, %v312_v63 }
  0x39   : > { %440 = vst.msk [vmem:[#allocation2 + $0x138] sm:$0xff] %vm399_vm1, %v1966_v2  ;;  %v2369_v47 = vadd.f32 %v2035_v3, %v317_v42  ;;  %v527_v23 = vmul.f32 %v2053_v11, %v2182_v5  ;;  %v2398_v24 = vadd.f32 %v2035_v3, %v321_v0  ;;  %v2408_v27 = vadd.f32 %v2035_v3, %v322_v6 }
  0x3a   : > { %441 = vst.msk [vmem:[#allocation2 + $0x140] sm:$0xff] %vm399_vm1, %v1966_v2  ;;  %v2416_v32 = vadd.f32 %v2035_v3, %v323_v10  ;;  %v1047_v36 = vadd.f32 %v1015_v12, %v949_v7  ;;  %v386_v39 = vmax.f32 %v2375_v61, 0.0  ;;  %v379_v42 = vmax.f32 %v2378_v8, 0.0 }
  0x3b   : > { %442 = vst.msk [vmem:[#allocation2 + $0x148] sm:$0x3] %vm402_vm2, %v1966_v2  ;;  %v385_v25 = vmax.f32 %v2369_v47, 0.0  ;;  %v320_v45 = vmul.f32 %v2018_v1, %v284_v29  ;;  %v2427_v48 = vmul.f32 %v2018_v1, %v289_v26  ;;  %v3517_v8 = vmax.f32 %v2391_v22, 0.0 }
  0x3c   : > { %443 = vst.msk [vmem:[#allocation2 + $0x150] sm:$0xff] %vm399_vm1, %v1966_v2 }
  0x3d   : > { %444 = vst.msk [vmem:[#allocation2 + $0x158] sm:$0xff] %vm399_vm1, %v1966_v2  ;;  %v2438_v53 = vadd.f32 %v2035_v3, %v320_v45 }
  0x3e   : > { %445 = vst.msk [vmem:[#allocation2 + $0x160] sm:$0x3] %vm402_vm2, %v1966_v2 }
  0x3f   : > { %446 = vst.msk [vmem:[#allocation2 + $0x168] sm:$0xff] %vm399_vm1, %v1966_v2 }
  0x40   : > { %447 = vst.msk [vmem:[#allocation2 + $0x170] sm:$0xff] %vm399_vm1, %v1966_v2 }
  0x41   : > { %448 = vst.msk [vmem:[#allocation2 + $0x178] sm:$0x3] %vm402_vm2, %v1966_v2 }
  0x42   : > { %449 = vst.msk [vmem:[#allocation2 + $0x180] sm:$0xff] %vm399_vm1, %v1966_v2 }
  0x43   : > { %450 = vst.msk [vmem:[#allocation2 + $0x188] sm:$0xff] %vm399_vm1, %v1966_v2 }
  0x44   : > { %451 = vst.msk [vmem:[#allocation2 + $0x190] sm:$0x3] %vm402_vm2, %v1966_v2 }
  0x45   : > { %452 = vst.msk [vmem:[#allocation2 + $0x198] sm:$0xff] %vm399_vm1, %v1966_v2 }
  0x46   : > { %453 = vst.msk [vmem:[#allocation2 + $0x1a0] sm:$0xff] %vm399_vm1, %v1966_v2 }
  0x47   : > { %454 = vst.msk [vmem:[#allocation2 + $0x1a8] sm:$0x3] %vm402_vm2, %v1966_v2  ;;  %v283_v2 = vld [vmem:[%s2030_s30 + $0xa0] sm:$0xff] }
  0x48   : > { %460 = vst.msk [vmem:[#allocation2 + $0x49] sm:$0xff] %vm399_vm1, %v371_v14  ;;  %v722_v14 = vmul.f32 %v2071_v17, %v2158_v55  ;;  %v319_v18 = vmul.f32 %v2018_v1, %v283_v2  ;;  %v384_v55 = vmax.f32 %v2366_v41, 0.0 }
  0x49   : > { %461 = vst.msk [vmem:[#allocation2 + $0x51] sm:$0xff] %vm399_vm1, %v372_v19  ;;  %v625_v19 = vmul.f32 %v2061_v13, %v2190_v9  ;;  %v723_v9 = vmul.f32 %v2071_v17, %v2198_v15 }
  0x4a   : > { %462 = vst.msk [vmem:[#allocation2 + $0x61] sm:$0xff] %vm399_vm1, %v373_v20  ;;  %v2404_v20 = vadd.f32 %v2035_v3, %v319_v18 }
  0x4b   : > { %463 = vst.msk [vmem:[#allocation2 + $0x69] sm:$0xff] %vm399_vm1, %v374_v28  ;;  %v657_v5 = vadd.f32 %v625_v19, %v527_v23  ;;  %v324_v28 = vmul.f32 %v2018_v1, %v288_v21 }
  0x4c   : > { %464 = vst.msk [vmem:[#allocation2 + $0x79] sm:$0xff] %vm399_vm1, %v375_v34  ;;  %v2423_v34 = vadd.f32 %v722_v14, %v656_v16 }
  0x4d   : > { %465 = vst.msk [vmem:[#allocation2 + $0x81] sm:$0xff] %vm399_vm1, %v376_v35  ;;  %v2435_v51 = vadd.f32 %v723_v9, %v657_v5  ;;  %v2454_v0 = vadd.f32 %v2035_v3, %v324_v28 }
  0x4e   : > { %466 = vst.msk [vmem:[#allocation2 + $0x91] sm:$0xff] %vm399_vm1, %v377_v38 }
  0x4f   : > { %3503 = vst [vmem:[#allocation5_spill] sm:$0xff] %v2427_v48  ;;  %v2430_v50 = vld [vmem:[#allocation2 + $0x48] sm:$0xff] }
  0x50   : > { %3504 = vst [vmem:[#allocation6_spill] sm:$0xff] %v2430_v50  ;;  %v2432_v35 = vld [vmem:[#allocation2 + $0x49] sm:$0xff]  ;;  %v1113_v59 = vmul.f32 %v2123_v40, %v2430_v50  ;;  %v2465_v10 = vld [vmem:[#allocation2 + $0x52] sm:$0xff] }
  0x51   : > { %3505 = vst [vmem:[#allocation7_spill] sm:$0xff] %v2432_v35  ;;  %v1211_v60 = vmul.f32 %v2136_v44, %v2432_v35  ;;  %v2446_v46 = vld [vmem:[#allocation2 + $0x4a] sm:$0xff]  ;;  %v2457_v6 = vld [vmem:[#allocation2 + $0x60] sm:$0xff]  ;;  %v2476_v12 = vmul.f32 %v2095_v31, %v2432_v35 }
  0x52   : > { %467 = vst.msk [vmem:[#allocation2 + $0x99] sm:$0xff] %vm399_vm1, %v378_v58  ;;  %v2448_v63 = vld [vmem:[#allocation2 + $0x50] sm:$0xff]  ;;  %v2459_v7 = vld [vmem:[#allocation2 + $0x61] sm:$0xff]  ;;  %v1145_v16 = vadd.f32 %v1113_v59, %v2349_v57  ;;  %v1309_v14 = vmul.f32 %v2152_v52, %v2446_v46  ;;  %v530_v18 = vmul.f32 %v2053_v11, %v2457_v6 }
  0x53   : > { %3506 = vst [vmem:[#allocation8_spill] sm:$0xff] %v2446_v46  ;;  %v2450_v58 = vld [vmem:[#allocation2 + $0x51] sm:$0xff]  ;;  %v1114_v61 = vmul.f32 %v2123_v40, %v2448_v63  ;;  %v628_v37 = vmul.f32 %v2061_v13, %v2459_v7  ;;  %v2487_v21 = vld [vmem:[#allocation2 + $0x68] sm:$0xff]  ;;  %v2498_v26 = vld [vmem:[#allocation2 + $0x79] sm:$0xff] }
  0x54   : > { %3507 = vst [vmem:[#allocation9_spill] sm:$0xff] %v2450_v58  ;;  %v1212_v2 = vmul.f32 %v2136_v44, %v2450_v58  ;;  %v2489_v23 = vld [vmem:[#allocation2 + $0x69] sm:$0xff]  ;;  %v2496_v19 = vld [vmem:[#allocation2 + $0x78] sm:$0xff]  ;;  %v531_v9 = vmul.f32 %v2053_v11, %v2487_v21  ;;  %v1243_v43 = vadd.f32 %v1211_v60, %v1145_v16 }
  0x55   : > { %470 = vst.msk [vmem:[#allocation2 + $0xc1] sm:$0xff] %vm399_vm1, %v381_v56  ;;  %v2472_v56 = vmul.f32 %v2090_v30, %v2430_v50  ;;  %v1146_v5 = vadd.f32 %v1114_v61, %v1047_v36  ;;  %v629_v29 = vmul.f32 %v2061_v13, %v2489_v23  ;;  %v2504_v28 = vld [vmem:[#allocation2 + $0x6a] sm:$0xff]  ;;  %v824_v45 = vmul.f32 %v2090_v30, %v2496_v19  ;;  %v2509_v59 = vld [vmem:[#allocation2 + $0x7a] sm:$0xff] }
  0x56   : > { %3508 = vst [vmem:[#allocation10_spill] sm:$0xff] %v2454_v0  ;;  %v1310_v36 = vmul.f32 %v2152_v52, %v2465_v10  ;;  %v2513_v61 = vld [vmem:[#allocation2 + $0x80] sm:$0xff]  ;;  %v2518_v41 = vld [vmem:[#allocation2 + $0x90] sm:$0xff]  ;;  %v727_v16 = vmul.f32 %v2071_v17, %v2504_v28  ;;  %v1341_v49 = vadd.f32 %v1309_v14, %v1243_v43  ;;  %v1020_v38 = vmul.f32 %v2104_v33, %v2509_v59 }
  0x57   : > { %471 = vst.msk [vmem:[#allocation2 + $0xc9] sm:$0xff] %vm399_vm1, %v382_v62  ;;  %v2485_v62 = vld [vmem:[#allocation2 + $0x62] sm:$0xff]  ;;  %v2520_v54 = vld [vmem:[#allocation2 + $0x91] sm:$0xff]  ;;  %v661_v60 = vadd.f32 %v629_v29, %v531_v9  ;;  %v825_v29 = vmul.f32 %v2090_v30, %v2513_v61 }
  0x58   : > { %472 = vst.msk [vmem:[#allocation2 + $0xd9] sm:$0xff] %vm399_vm1, %v383_v4  ;;  %v726_v57 = vmul.f32 %v2071_v17, %v2485_v62  ;;  %v660_v4 = vadd.f32 %v628_v37, %v530_v18  ;;  %v2524_v18 = vld [vmem:[#allocation2 + $0x81] sm:$0xff]  ;;  %v1016_v37 = vmul.f32 %v2104_v33, %v2446_v46  ;;  %v1217_v14 = vmul.f32 %v2136_v44, %v2520_v54 }
  0x59   : > { %473 = vst.msk [vmem:[#allocation2 + $0xe1] sm:$0xff] %vm399_vm1, %v384_v55  ;;  %v1244_v55 = vadd.f32 %v1212_v2, %v1146_v5  ;;  %v2533_v2 = vld [vmem:[#allocation2 + $0x92] sm:$0xff]  ;;  %v2535_v5 = vld [vmem:[#allocation2 + $0x82] sm:$0xff]  ;;  %1890 = vmatmul.msk.f32.gmra.mxu0 %vm399_vm1, %v1341_v49  ;;  %v2562_v35 = vld [vmem:[#allocation2 + $0x9a] sm:$0xff] }
  0x5a   : > { %3509 = vst [vmem:[#allocation11_spill] sm:$0xff] %v2509_v59  ;;  %v758_v47 = vadd.f32 %v726_v57, %v660_v4  ;;  %v2537_v9 = vld [vmem:[#allocation2 + $0x98] sm:$0xff]  ;;  %v759_v57 = vadd.f32 %v727_v16, %v661_v60  ;;  %v1315_v46 = vmul.f32 %v2152_v52, %v2533_v2  ;;  %v923_v16 = vmul.f32 %v2095_v31, %v2524_v18 }
  0x5b   : > { %474 = vst.msk [vmem:[#allocation2 + $0xf1] sm:$0xff] %vm399_vm1, %v385_v25  ;;  %v922_v25 = vmul.f32 %v2095_v31, %v2498_v26  ;;  %v2548_v43 = vld [vmem:[#allocation2 + $0x99] sm:$0xff]  ;;  %v1342_v60 = vadd.f32 %v1310_v36, %v1244_v55  ;;  %v1021_v22 = vmul.f32 %v2104_v33, %v2535_v5  ;;  %v3522_v55 = vmax.f32 %v2404_v20, 0.0 }
  0x5c   : > { %3510 = vst [vmem:[#allocation12_spill] sm:$0xff] %v2520_v54  ;;  %v2550_v4 = vld [vmem:[#allocation2 + $0xc0] sm:$0xff]  ;;  %v857_v0 = vadd.f32 %v825_v29, %v759_v57  ;;  %v1218_v57 = vmul.f32 %v2136_v44, %v2548_v43  ;;  %v1316_v20 = vmul.f32 %v2152_v52, %v2562_v35 }
  0x5d   : > { %3511 = vst [vmem:[#allocation13_spill] sm:$0xff] %v2524_v18  ;;  %v2552_v15 = vld [vmem:[#allocation2 + $0xc1] sm:$0xff]  ;;  %v538_v49 = vmul.f32 %v2053_v11, %v2550_v4 }
  0x5e   : > { %475 = vst.msk [vmem:[#allocation2 + $0xf9] sm:$0xff] %vm399_vm1, %v386_v39  ;;  %v1119_v39 = vmul.f32 %v2123_v40, %v2518_v41  ;;  %v2564_v50 = vld [vmem:[#allocation2 + $0xc2] sm:$0xff]  ;;  %v636_v29 = vmul.f32 %v2061_v13, %v2552_v15  ;;  %v955_v1 = vadd.f32 %v923_v16, %v857_v0 }
  0x5f   : > { %3512 = vst [vmem:[#allocation14_spill] sm:$0xff] %v2533_v2  ;;  %v2574_v36 = vld [vmem:[#allocation2 + $0xd9] sm:$0xff]  ;;  %v734_v3 = vmul.f32 %v2071_v17, %v2564_v50 }
  0x60   : > { %3513 = vst [vmem:[#allocation15_spill] sm:$0xff] %v2535_v5  ;;  %v2585_v48 = vld [vmem:[#allocation2 + $0xda] sm:$0xff]  ;;  %v930_v0 = vmul.f32 %v2095_v31, %v2574_v36 }
  0x61   : > { %468 = vst.msk [vmem:[#allocation2 + $0xa9] sm:$0xff] %vm399_vm1, %v379_v42  ;;  %v856_v42 = vadd.f32 %v824_v45, %v758_v47  ;;  %v2572_v45 = vld [vmem:[#allocation2 + $0xd8] sm:$0xff]  ;;  %v1028_v16 = vmul.f32 %v2104_v33, %v2585_v48  ;;  %1891 = vmatmul.msk.f32.gmra.mxu0 %vm399_vm1, %v1342_v60 }
  0x62   : > { %3514 = vst [vmem:[#allocation16_spill] sm:$0xff] %v2548_v43 }
  0x63   : > { %3515 = vst [vmem:[#allocation17_spill] sm:$0xff] %v2550_v4  ;;  %v954_v47 = vadd.f32 %v922_v25, %v856_v42  ;;  %v3524_v4 = vmax.f32 %v2398_v24, 0.0  ;;  %v832_v25 = vmul.f32 %v2090_v30, %v2572_v45  ;;  %v2594_v42 = vld [vmem:[#allocation2 + $0xf0] sm:$0xff] }
  0x64   : > { %3516 = vst [vmem:[#allocation18_spill] sm:$0xff] %v2552_v15  ;;  %v3526_v15 = vmax.f32 %v2408_v27, 0.0 }
  0x65   : > { %469 = vst.msk [vmem:[#allocation2 + $0xb1] sm:$0xff] %vm399_vm1, %v3517_v8  ;;  %v1120_v8 = vmul.f32 %v2123_v40, %v2537_v9  ;;  %v1052_v24 = vadd.f32 %v1020_v38, %v954_v47  ;;  %v1213_v47 = vmul.f32 %v2136_v44, %v2459_v7 }
  0x66   : > { %3518 = vst [vmem:[#allocation19_spill] sm:$0xff] %v2562_v35  ;;  %v1053_v35 = vadd.f32 %v1021_v22, %v955_v1  ;;  %v532_v22 = vmul.f32 %v2053_v11, %v2496_v19 }
  0x67   : > { %3519 = vst [vmem:[#allocation20_spill] sm:$0xff] %v2564_v50  ;;  %v852_v50 = vadd.f32 %v2472_v56, %v2423_v34  ;;  %v1127_v34 = vmul.f32 %v2123_v40, %v2594_v42  ;;  %v1151_v38 = vadd.f32 %v1119_v39, %v1052_v24  ;;  %v1311_v39 = vmul.f32 %v2152_v52, %v2485_v62 }
  0x68   : > { %3520 = vst [vmem:[#allocation21_spill] sm:$0xff] %v2572_v45  ;;  %v3527_v45 = vmax.f32 %v2416_v32, 0.0  ;;  %v1152_v32 = vadd.f32 %v1120_v8, %v1053_v35  ;;  %v2630_v35 = vld [vmem:[#allocation2 + $0xa8] sm:$0xff] }
  0x69   : > { %3521 = vst [vmem:[#allocation22_spill] sm:$0xff] %v2574_v36  ;;  %v950_v27 = vadd.f32 %v2476_v12, %v852_v50  ;;  %v630_v50 = vmul.f32 %v2061_v13, %v2498_v26  ;;  %v1249_v12 = vadd.f32 %v1217_v14, %v1151_v38  ;;  %v2636_v14 = vld [vmem:[#allocation2 + $0xc9] sm:$0xff] }
  0x6a   : > { %476 = vst.msk [vmem:[#allocation2 + $0x109] sm:$0xff] %vm399_vm1, %v3522_v55  ;;  %v2596_v55 = vld [vmem:[#allocation2 + $0xf1] sm:$0xff]  ;;  %v1250_v8 = vadd.f32 %v1218_v57, %v1152_v32 }
  0x6b   : > { %3523 = vst [vmem:[#allocation23_spill] sm:$0xff] %v2585_v48  ;;  %v1048_v1 = vadd.f32 %v1016_v37, %v950_v27  ;;  %v662_v24 = vadd.f32 %v630_v50, %v532_v22  ;;  %v2634_v27 = vld [vmem:[#allocation2 + $0xc8] sm:$0xff]  ;;  %v1347_v60 = vadd.f32 %v1315_v46, %v1249_v12  ;;  %v1121_v22 = vmul.f32 %v2123_v40, %v2630_v35 }
  0x6c   : > { %478 = vst.msk [vmem:[#allocation2 + $0x121] sm:$0xff] %vm399_vm1, %v3524_v4  ;;  %v668_v4 = vadd.f32 %v636_v29, %v538_v49  ;;  %v1225_v49 = vmul.f32 %v2136_v44, %v2596_v55  ;;  %v2619_v29 = vld [vmem:[#allocation2 + $0xf2] sm:$0xff]  ;;  %v2644_v57 = vld [vmem:[#allocation2 + $0xca] sm:$0xff]  ;;  %v1348_v50 = vadd.f32 %v1316_v20, %v1250_v8 }
  0x6d   : > { %3525 = vst [vmem:[#allocation24_spill] sm:$0xff] %v2594_v42  ;;  %v1323_v38 = vmul.f32 %v2152_v52, %v2619_v29  ;;  %v2650_v46 = vld [vmem:[#allocation2 + $0xaa] sm:$0xff]  ;;  %1896 = vmatmul.msk.f32.vlgmr.msra.gmra.mxu1 %vm399_vm1, %v1347_v60  ;;  %v735_v20 = vmul.f32 %v2071_v17, %v2644_v57 }
  0x6e   : > { %479 = vst.msk [vmem:[#allocation2 + $0x129] sm:$0xff] %vm399_vm1, %v3526_v15  ;;  %v1115_v15 = vmul.f32 %v2123_v40, %v2457_v6  ;;  %v766_v56 = vadd.f32 %v734_v3, %v668_v4  ;;  %v826_v4 = vmul.f32 %v2090_v30, %v2518_v41  ;;  %v1317_v8 = vmul.f32 %v2152_v52, %v2650_v46 }
  0x6f   : > { %480 = vst.msk [vmem:[#allocation2 + $0x139] sm:$0xff] %vm399_vm1, %v3527_v45  ;;  %v728_v45 = vmul.f32 %v2071_v17, %v2509_v59  ;;  %v2642_v59 = vld [vmem:[#allocation2 + $0xa9] sm:$0xff] }
  0x70   : > { %3528 = vst [vmem:[#allocation25_spill] sm:$0xff] %v2619_v29  ;;  %v864_v3 = vadd.f32 %v832_v25, %v766_v56  ;;  %v1147_v37 = vadd.f32 %v1115_v15, %v1048_v1  ;;  %v924_v56 = vmul.f32 %v2095_v31, %v2520_v54  ;;  %v1022_v1 = vmul.f32 %v2104_v33, %v2533_v2 }
  0x71   : > { %3529 = vst [vmem:[#allocation26_spill] sm:$0xff] %v2630_v35  ;;  %v760_v32 = vadd.f32 %v728_v45, %v662_v24  ;;  %v2659_v45 = vld [vmem:[#allocation2 + $0xe1] sm:$0xff]  ;;  %v2663_v24 = vld [vmem:[#allocation2 + $0xf8] sm:$0xff]  ;;  %v1219_v54 = vmul.f32 %v2136_v44, %v2642_v59 }
  0x72   : > { %3530 = vst [vmem:[#allocation27_spill] sm:$0xff] %v2634_v27  ;;  %v962_v25 = vadd.f32 %v930_v0, %v864_v3  ;;  %v1245_v15 = vadd.f32 %v1213_v47, %v1147_v37  ;;  %v2652_v0 = vld [vmem:[#allocation2 + $0xe0] sm:$0xff]  ;;  %v539_v3 = vmul.f32 %v2053_v11, %v2634_v27  ;;  %v637_v47 = vmul.f32 %v2061_v13, %v2636_v14 }
  0x73   : > { %3531 = vst [vmem:[#allocation28_spill] sm:$0xff] %v2636_v14  ;;  %v2661_v37 = vld [vmem:[#allocation2 + $0xe2] sm:$0xff]  ;;  %v858_v2 = vadd.f32 %v826_v4, %v760_v32  ;;  %v2673_v14 = vld [vmem:[#allocation2 + $0xf9] sm:$0xff]  ;;  %v931_v4 = vmul.f32 %v2095_v31, %v2659_v45 }
  0x74   : > { %3532 = vst [vmem:[#allocation29_spill] sm:$0xff] %v2644_v57  ;;  %v1060_v12 = vadd.f32 %v1028_v16, %v962_v25  ;;  %v1343_v35 = vadd.f32 %v1311_v39, %v1245_v15  ;;  %v669_v60 = vadd.f32 %v637_v47, %v539_v3  ;;  %v833_v25 = vmul.f32 %v2090_v30, %v2652_v0  ;;  %v2675_v27 = vld [vmem:[#allocation2 + $0xfa] sm:$0xff] }
  0x75   : > { %3533 = vst [vmem:[#allocation30_spill] sm:$0xff] %v2652_v0  ;;  %v956_v39 = vadd.f32 %v924_v56, %v858_v2  ;;  %v1029_v15 = vmul.f32 %v2104_v33, %v2661_v37  ;;  %v821_v3 = vmul.f32 %v2090_v30, %v2448_v63  ;;  %v919_v47 = vmul.f32 %v2095_v31, %v2450_v58 }
  0x76   : > { %3534 = vst [vmem:[#allocation31_spill] sm:$0xff] %v2659_v45  ;;  %v1159_v16 = vadd.f32 %v1127_v34, %v1060_v12  ;;  %v1128_v34 = vmul.f32 %v2123_v40, %v2663_v24  ;;  %1892 = vmatmul.msk.f32.gmra.mxu0 %vm399_vm1, %v1343_v35  ;;  %v767_v12 = vadd.f32 %v735_v20, %v669_v60 }
  0x77   : > { %3535 = vst [vmem:[#allocation32_spill] sm:$0xff] %v2661_v37  ;;  %v1054_v2 = vadd.f32 %v1022_v1, %v956_v39  ;;  %v1226_v56 = vmul.f32 %v2136_v44, %v2673_v14  ;;  %v1324_v57 = vmul.f32 %v2152_v52, %v2675_v27  ;;  %v853_v35 = vadd.f32 %v821_v3, %v2435_v51 }
  0x78   : > { %3536 = vst [vmem:[#allocation33_spill] sm:$0xff] %v2663_v24  ;;  %v1257_v32 = vadd.f32 %v1225_v49, %v1159_v16  ;;  %v1017_v24 = vmul.f32 %v2104_v33, %v2465_v10  ;;  %v865_v16 = vadd.f32 %v833_v25, %v767_v12  ;;  %v1116_v20 = vmul.f32 %v2123_v40, %v2487_v21 }
  0x79   : > { %3537 = vst [vmem:[#allocation34_spill] sm:$0xff] %v2673_v14  ;;  %v1153_v60 = vadd.f32 %v1121_v22, %v1054_v2  ;;  %v533_v1 = vmul.f32 %v2053_v11, %v2513_v61  ;;  %v631_v39 = vmul.f32 %v2061_v13, %v2524_v18  ;;  %v729_v58 = vmul.f32 %v2071_v17, %v2535_v5 }
  0x7a   : > { %3538 = vst [vmem:[#allocation35_spill] sm:$0xff] %v2675_v27  ;;  %v1355_v49 = vadd.f32 %v1323_v38, %v1257_v32  ;;  %1897 = vmatmul.msk.f32.gmra.mxu1 %vm399_vm1, %v1348_v50  ;;  %v963_v38 = vadd.f32 %v931_v4, %v865_v16  ;;  %v951_v25 = vadd.f32 %v919_v47, %v853_v35  ;;  %v2707_v32 = vld [vmem:[#allocation2 + $0xb0] sm:$0xff]  ;;  %v388_v22 = vmax.f32 %v2438_v53, 0.0 }
  0x7b   : > { %v1214_v51 = vmul.f32 %v2136_v44, %v2489_v23  ;;  %3539 = vst [vmem:[#allocation36_spill] sm:$0xff] %v2707_v32  ;;  %v1251_v12 = vadd.f32 %v1219_v54, %v1153_v60  ;;  %v1312_v3 = vmul.f32 %v2152_v52, %v2504_v28  ;;  %v663_v2 = vadd.f32 %v631_v39, %v533_v1  ;;  %v3540_v47 = vld [vmem:[#allocation19_spill] sm:$0xff]  ;;  %v3543_v39 = vld [vmem:[#allocation21_spill] sm:$0xff] }
  0x7c   : > { %1904 = vmatmul.msk.f32.vlgmr.msra.gmra.mxu2 %vm399_vm1, %v1355_v49  ;;  %v827_v5 = vmul.f32 %v2090_v30, %v2537_v9  ;;  %v1061_v50 = vadd.f32 %v1029_v15, %v963_v38  ;;  %v1049_v49 = vadd.f32 %v1017_v24, %v951_v25  ;;  %v925_v4 = vmul.f32 %v2095_v31, %v2548_v43  ;;  %v2718_v35 = vld [vmem:[#allocation2 + $0xb1] sm:$0xff] }
  0x7d   : > { %v1023_v16 = vmul.f32 %v2104_v33, %v3540_v47  ;;  %3541 = vst [vmem:[#allocation37_spill] sm:$0xff] %v2718_v35  ;;  %v2720_v53 = vld [vmem:[#allocation2 + $0xb2] sm:$0xff]  ;;  %v1349_v54 = vadd.f32 %v1317_v8, %v1251_v12  ;;  %v761_v60 = vadd.f32 %v729_v58, %v663_v2  ;;  %v1122_v1 = vmul.f32 %v2123_v40, %v2707_v32 }
  0x7e   : > { %3542 = vst [vmem:[#allocation38_spill] sm:$0xff] %v2720_v53  ;;  %v540_v24 = vmul.f32 %v2053_v11, %v3543_v39  ;;  %v1160_v15 = vadd.f32 %v1128_v34, %v1061_v50  ;;  %v1148_v38 = vadd.f32 %v1116_v20, %v1049_v49  ;;  %v638_v25 = vmul.f32 %v2061_v13, %v2574_v36  ;;  %v290_v47 = vld [vmem:[%s2030_s30 + $0xd8] sm:$0xff]  ;;  %v2740_v50 = vld [vmem:[#allocation2 + $0x120] sm:$0xff] }
  0x7f   : > { %477 = vst.msk [vmem:[#allocation2 + $0x111] sm:$0xff] %vm399_vm1, %v388_v22  ;;  %v736_v18 = vmul.f32 %v2071_v17, %v2585_v48  ;;  %v859_v43 = vadd.f32 %v827_v5, %v761_v60  ;;  %v1220_v8 = vmul.f32 %v2136_v44, %v2718_v35  ;;  %v1318_v58 = vmul.f32 %v2152_v52, %v2720_v53  ;;  %v2744_v60 = vld [vmem:[#allocation2 + $0x108] sm:$0xff]  ;;  %v3545_v48 = vld [vmem:[#allocation3_spill] sm:$0xff]  ;;  %v3546_v39 = vld [vmem:[#allocation5_spill] sm:$0xff] }
  0x80   : > { %v834_v22 = vmul.f32 %v2090_v30, %v2594_v42  ;;  %v1258_v12 = vadd.f32 %v1226_v56, %v1160_v15  ;;  %v1246_v34 = vadd.f32 %v1214_v51, %v1148_v38  ;;  %v670_v20 = vadd.f32 %v638_v25, %v540_v24  ;;  %3544 = vst [vmem:[#allocation39_spill] sm:$0xff] %v2740_v50  ;;  %v3547_v53 = vld [vmem:[#allocation4_spill] sm:$0xff]  ;;  %v2749_v42 = vld [vmem:[#allocation2 + $0x121] sm:$0xff]  ;;  %v2752_v15 = vld [vmem:[#allocation2 + $0x109] sm:$0xff] }
  0x81   : > { %v932_v2 = vmul.f32 %v2095_v31, %v2596_v55  ;;  %v957_v49 = vadd.f32 %v925_v4, %v859_v43  ;;  %v1030_v5 = vmul.f32 %v2104_v33, %v2619_v29  ;;  %v326_v36 = vmul.f32 %v3545_v48, %v290_v47  ;;  %v3548_v43 = vld [vmem:[#allocation10_spill] sm:$0xff] }
  0x82   : > { %v361_v35 = vadd.f32 %v3547_v53, %v3546_v39  ;;  %1898 = vmatmul.msk.f32.gmra.mxu1 %vm399_vm1, %v1349_v54  ;;  %v1356_v56 = vadd.f32 %v1324_v57, %v1258_v12  ;;  %v1344_v51 = vadd.f32 %v1312_v3, %v1246_v34  ;;  %v768_v24 = vadd.f32 %v736_v18, %v670_v20  ;;  %v2755_v38 = vld [vmem:[#allocation2 + $0x122] sm:$0xff]  ;;  %v2760_v39 = vld [vmem:[#allocation2 + $0x138] sm:$0xff] }
  0x83   : > { %v392_v4 = vmax.f32 %v3548_v43, 0.0  ;;  %v1055_v25 = vadd.f32 %v1023_v16, %v957_v49  ;;  %v362_v29 = vadd.f32 %v3547_v53, %v326_v36  ;;  %v546_v47 = vmul.f32 %v2053_v11, %v2740_v50  ;;  %v3551_v49 = vld [vmem:[#allocation6_spill] sm:$0xff]  ;;  %v3553_v43 = vld [vmem:[#allocation8_spill] sm:$0xff] }
  0x84   : > { %v393_v48 = vmax.f32 %v361_v35, 0.0  ;;  %1905 = vmatmul.msk.f32.gmra.mxu2 %vm399_vm1, %v1356_v56  ;;  %1893 = vmatmul.msk.f32.gmra.mxu0 %vm399_vm1, %v1344_v51  ;;  %v866_v18 = vadd.f32 %v834_v22, %v768_v24  ;;  %v1129_v57 = vmul.f32 %v2123_v40, %v2744_v60  ;;  %v644_v36 = vmul.f32 %v2061_v13, %v2749_v42  ;;  %v2776_v22 = vld [vmem:[#allocation2 + $0x139] sm:$0xff] }
  0x85   : > { %481 = vst.msk [vmem:[#allocation2 + $0x141] sm:$0xff] %vm399_vm1, %v392_v4  ;;  %v1154_v16 = vadd.f32 %v1122_v1, %v1055_v25  ;;  %v1227_v35 = vmul.f32 %v2136_v44, %v2752_v15  ;;  %v394_v53 = vmax.f32 %v362_v29, 0.0  ;;  %v742_v54 = vmul.f32 %v2071_v17, %v2755_v38  ;;  %v3552_v29 = vld [vmem:[#allocation7_spill] sm:$0xff] }
  0x86   : > { %v2766_v3 = vld [vmem:[#allocation2 + $0x10a] sm:$0xff]  ;;  %482 = vst.msk [vmem:[#allocation2 + $0x151] sm:$0xff] %vm399_vm1, %v393_v48  ;;  %v964_v12 = vadd.f32 %v932_v2, %v866_v18  ;;  %v676_v34 = vadd.f32 %v644_v36, %v546_v47  ;;  %v840_v20 = vmul.f32 %v2090_v30, %v2760_v39  ;;  %v528_v56 = vmul.f32 %v2053_v11, %v3551_v49 }
  0x87   : > { %3549 = vst [vmem:[#allocation3_spill] sm:$0xff] %v2766_v3  ;;  %v1252_v1 = vadd.f32 %v1220_v8, %v1154_v16  ;;  %v1325_v51 = vmul.f32 %v2152_v52, %v2766_v3  ;;  %v626_v24 = vmul.f32 %v2061_v13, %v3552_v29  ;;  %v724_v4 = vmul.f32 %v2071_v17, %v3553_v43 }
  0x88   : > { %3550 = vst [vmem:[#allocation5_spill] sm:$0xff] %v2776_v22  ;;  %v1062_v2 = vadd.f32 %v1030_v5, %v964_v12  ;;  %v774_v25 = vadd.f32 %v742_v54, %v676_v34  ;;  %v938_v48 = vmul.f32 %v2095_v31, %v2776_v22  ;;  %v822_v11 = vmul.f32 %v2090_v30, %v2457_v6  ;;  %v2802_v5 = vld [vmem:[%s3428_s3] ss:$0 sm:$0xff]  ;;  %v3555_v54 = vld [vmem:[#allocation14_spill] sm:$0xff] }
  0x89   : > { %483 = vst.msk [vmem:[#allocation2 + $0x159] sm:$0xff] %vm399_vm1, %v394_v53  ;;  %v1350_v8 = vadd.f32 %v1318_v58, %v1252_v1  ;;  %v658_v47 = vadd.f32 %v626_v24, %v528_v56  ;;  %v920_v18 = vmul.f32 %v2095_v31, %v2459_v7  ;;  %v1018_v36 = vmul.f32 %v2104_v33, %v2485_v62  ;;  %v3556_v1 = vld [vmem:[#allocation11_spill] sm:$0xff] }
  0x8a   : > { %v1161_v13 = vadd.f32 %v1129_v57, %v1062_v2  ;;  %v872_v16 = vadd.f32 %v840_v20, %v774_v25  ;;  %v1117_v17 = vmul.f32 %v2123_v40, %v2496_v19  ;;  %v534_v6 = vmul.f32 %v2802_v5, %v2518_v41  ;;  %v2814_v19 = vld [vmem:[%s3428_s3 + $0x1] ss:$0 sm:$0xff]  ;;  %v3554_v57 = vld [vmem:[#allocation12_spill] sm:$0xff]  ;;  %v2821_v41 = vld [vmem:[%s3428_s3 + $0x2] ss:$0 sm:$0xff] }
  0x8b   : > { %1899 = vmatmul.msk.f32.gmra.mxu1 %vm399_vm1, %v1350_v8  ;;  %v756_v7 = vadd.f32 %v724_v4, %v658_v47  ;;  %v1215_v62 = vmul.f32 %v2136_v44, %v2498_v26  ;;  %v632_v53 = vmul.f32 %v2814_v19, %v3554_v57  ;;  %v730_v12 = vmul.f32 %v2821_v41, %v3555_v54  ;;  %v3557_v2 = vld [vmem:[#allocation26_spill] sm:$0xff] }
  0x8c   : > { %v2807_v58 = vld [vmem:[#allocation2 + $0x13a] sm:$0xff]  ;;  %v1259_v34 = vadd.f32 %v1227_v35, %v1161_v13  ;;  %v970_v20 = vadd.f32 %v938_v48, %v872_v16  ;;  %v1313_v29 = vmul.f32 %v2152_v52, %v3556_v1  ;;  %v828_v25 = vmul.f32 %v2090_v30, %v3557_v2 }
  0x8d   : > { %v1036_v26 = vmul.f32 %v2104_v33, %v2807_v58  ;;  %v2827_v49 = vld [vmem:[#allocation2 + $0x150] sm:$0xff]  ;;  %v854_v43 = vadd.f32 %v822_v11, %v756_v7  ;;  %v664_v4 = vadd.f32 %v632_v53, %v534_v6  ;;  %v926_v13 = vmul.f32 %v2095_v31, %v2642_v59  ;;  %v3558_v11 = vld [vmem:[#allocation17_spill] sm:$0xff]  ;;  %v3562_v1 = vld [vmem:[#allocation20_spill] sm:$0xff] }
  0x8e   : > { %v2829_v56 = vld [vmem:[#allocation2 + $0x151] sm:$0xff]  ;;  %v1135_v24 = vmul.f32 %v2123_v40, %v2827_v49  ;;  %v1357_v35 = vadd.f32 %v1325_v51, %v1259_v34  ;;  %v1024_v54 = vmul.f32 %v2104_v33, %v2650_v46  ;;  %v1123_v6 = vmul.f32 %v2123_v40, %v3558_v11 }
  0x8f   : > { %v1068_v48 = vadd.f32 %v1036_v26, %v970_v20  ;;  %v1233_v8 = vmul.f32 %v2136_v44, %v2829_v56  ;;  %v952_v16 = vadd.f32 %v920_v18, %v854_v43  ;;  %v762_v57 = vadd.f32 %v730_v12, %v664_v4  ;;  %v3559_v12 = vld [vmem:[#allocation18_spill] sm:$0xff]  ;;  %v2858_v34 = vld [vmem:[#allocation2 + $0x110] sm:$0xff]  ;;  %v3563_v4 = vld [vmem:[#allocation33_spill] sm:$0xff] }
  0x90   : > { %v2839_v47 = vld [vmem:[#allocation2 + $0x152] sm:$0xff]  ;;  %1906 = vmatmul.msk.f32.gmra.mxu2 %vm399_vm1, %v1357_v35  ;;  %v541_v7 = vmul.f32 %v2802_v5, %v2652_v0  ;;  %v639_v31 = vmul.f32 %v2814_v19, %v2659_v45  ;;  %v1221_v33 = vmul.f32 %v2136_v44, %v3559_v12  ;;  %v737_v40 = vmul.f32 %v2821_v41, %v2661_v37  ;;  %v2860_v20 = vld [vmem:[#allocation2 + $0x128] sm:$0xff] }
  0x91   : > { %v1167_v30 = vadd.f32 %v1135_v24, %v1068_v48  ;;  %v1331_v51 = vmul.f32 %v2152_v52, %v2839_v47  ;;  %v1050_v18 = vadd.f32 %v1018_v36, %v952_v16  ;;  %v860_v53 = vadd.f32 %v828_v25, %v762_v57  ;;  %3560 = vst [vmem:[#allocation4_spill] sm:$0xff] %v2858_v34  ;;  %v2867_v36 = vld [vmem:[%s3428_s3 + $0x3] ss:$0 sm:$0xff]  ;;  %v2871_v25 = vld [vmem:[#allocation2 + $0x129] sm:$0xff]  ;;  %v2885_v57 = vld [vmem:[%s3428_s3 + $0x5] ss:$0 sm:$0xff] }
  0x92   : > { %3561 = vst [vmem:[#allocation10_spill] sm:$0xff] %v2860_v20  ;;  %v1319_v24 = vmul.f32 %v2152_v52, %v3562_v1  ;;  %v671_v43 = vadd.f32 %v639_v31, %v541_v7  ;;  %v835_v44 = vmul.f32 %v2867_v36, %v3563_v4  ;;  %v2873_v35 = vld [vmem:[#allocation2 + $0x12a] sm:$0xff]  ;;  %v547_v45 = vmul.f32 %v2802_v5, %v2860_v20  ;;  %v2904_v0 = vld [vmem:[#allocation2 + $0x141] sm:$0xff] }
  0x93   : > { %v1265_v26 = vadd.f32 %v1233_v8, %v1167_v30  ;;  %3564 = vst [vmem:[#allocation6_spill] sm:$0xff] %v2871_v25  ;;  %v1149_v48 = vadd.f32 %v1117_v17, %v1050_v18  ;;  %v958_v16 = vadd.f32 %v926_v13, %v860_v53  ;;  %v2878_v8 = vld [vmem:[%s3428_s3 + $0x4] ss:$0 sm:$0xff]  ;;  %v1031_v30 = vmul.f32 %v2885_v57, %v2675_v27  ;;  %v2889_v7 = vld [vmem:[#allocation2 + $0x111] sm:$0xff]  ;;  %v2898_v53 = vld [vmem:[%s3428_s3 + $0x6] ss:$0 sm:$0xff] }
  0x94   : > { %3565 = vst [vmem:[#allocation7_spill] sm:$0xff] %v2873_v35  ;;  %v933_v52 = vmul.f32 %v2878_v8, %v2673_v14  ;;  %v2891_v17 = vld [vmem:[#allocation2 + $0x112] sm:$0xff]  ;;  %v2893_v13 = vld [vmem:[#allocation2 + $0x140] sm:$0xff]  ;;  %v769_v18 = vadd.f32 %v737_v40, %v671_v43  ;;  %v1130_v37 = vmul.f32 %v2898_v53, %v2858_v34  ;;  %v645_v4 = vmul.f32 %v2814_v19, %v2871_v25 }
  0x95   : > { %3566 = vst [vmem:[#allocation8_spill] sm:$0xff] %v2889_v7  ;;  %v1363_v31 = vadd.f32 %v1331_v51, %v1265_v26  ;;  %v1247_v27 = vadd.f32 %v1215_v62, %v1149_v48  ;;  %v1056_v14 = vadd.f32 %v1024_v54, %v958_v16  ;;  %v743_v51 = vmul.f32 %v2821_v41, %v2873_v35  ;;  %v2910_v40 = vld [vmem:[#allocation2 + $0x142] sm:$0xff]  ;;  %v2912_v26 = vld [vmem:[#allocation2 + $0x158] sm:$0xff] }
  0x96   : > { %3567 = vst [vmem:[#allocation12_spill] sm:$0xff] %v2891_v17  ;;  %v867_v43 = vadd.f32 %v835_v44, %v769_v18  ;;  %v2918_v20 = vld [vmem:[%s3428_s3 + $0x7] ss:$0 sm:$0xff]  ;;  %v2925_v54 = vld [vmem:[%s3428_s3 + $0x8] ss:$0 sm:$0xff]  ;;  %v841_v16 = vmul.f32 %v2867_v36, %v2893_v13  ;;  %v677_v18 = vadd.f32 %v645_v4, %v547_v45  ;;  %v939_v35 = vmul.f32 %v2878_v8, %v2904_v0  ;;  %v2933_v25 = vld [vmem:[#allocation2 + $0x159] sm:$0xff] }
  0x97   : > { %3568 = vst [vmem:[#allocation14_spill] sm:$0xff] %v2893_v13  ;;  %1912 = vmatmul.msk.f32.vlgmr.msra.gmra.mxu3 %vm399_vm1, %v1363_v31  ;;  %v1228_v62 = vmul.f32 %v2918_v20, %v2889_v7  ;;  %v1326_v48 = vmul.f32 %v2925_v54, %v2891_v17  ;;  %v1345_v44 = vadd.f32 %v1313_v29, %v1247_v27  ;;  %v2935_v7 = vld [vmem:[#allocation2 + $0x15a] sm:$0xff] }
  0x98   : > { %3569 = vst [vmem:[#allocation11_spill] sm:$0xff] %v2904_v0  ;;  %v1155_v31 = vadd.f32 %v1123_v6, %v1056_v14  ;;  %v965_v34 = vadd.f32 %v933_v52, %v867_v43  ;;  %v1037_v1 = vmul.f32 %v2885_v57, %v2910_v40  ;;  %v1136_v17 = vmul.f32 %v2898_v53, %v2912_v26  ;;  %v3573_v45 = vld [vmem:[#allocation9_spill] sm:$0xff] }
  0x99   : > { %3570 = vst [vmem:[#allocation26_spill] sm:$0xff] %v2910_v40  ;;  %v529_v13 = vmul.f32 %v2802_v5, %v2448_v63  ;;  %1894 = vmatmul.msk.f32.gmra.mxu0 %vm399_vm1, %v1345_v44  ;;  %v775_v14 = vadd.f32 %v743_v51, %v677_v18  ;;  %v627_v29 = vmul.f32 %v2814_v19, %v3573_v45 }
  0x9a   : > { %3571 = vst [vmem:[#allocation17_spill] sm:$0xff] %v2912_v26  ;;  %v1253_v27 = vadd.f32 %v1221_v33, %v1155_v31  ;;  %v725_v6 = vmul.f32 %v2821_v41, %v2465_v10  ;;  %v1063_v4 = vadd.f32 %v1031_v30, %v965_v34  ;;  %v1234_v52 = vmul.f32 %v2918_v20, %v2933_v25 }
  0x9b   : > { %3572 = vst [vmem:[#allocation18_spill] sm:$0xff] %v2935_v7  ;;  %v1332_v43 = vmul.f32 %v2925_v54, %v2935_v7  ;;  %v823_v63 = vmul.f32 %v2867_v36, %v2487_v21  ;;  %v873_v44 = vadd.f32 %v841_v16, %v775_v14  ;;  %v659_v33 = vadd.f32 %v627_v29, %v529_v13  ;;  %v3575_v16 = vld [vmem:[#allocation19_spill] sm:$0xff]  ;;  %v3578_v29 = vld [vmem:[#allocation37_spill] sm:$0xff] }
  0x9c   : > { %v1351_v26 = vadd.f32 %v1319_v24, %v1253_v27  ;;  %v921_v51 = vmul.f32 %v2878_v8, %v2489_v23  ;;  %v1162_v31 = vadd.f32 %v1130_v37, %v1063_v4  ;;  %v1019_v10 = vmul.f32 %v2885_v57, %v2504_v28  ;;  %v3574_v24 = vld [vmem:[#allocation16_spill] sm:$0xff]  ;;  %v3576_v27 = vld [vmem:[#allocation13_spill] sm:$0xff]  ;;  %v3577_v14 = vld [vmem:[#allocation15_spill] sm:$0xff] }
  0x9d   : > { %v1118_v34 = vmul.f32 %v2898_v53, %v2513_v61  ;;  %v535_v30 = vmul.f32 %v2802_v5, %v2537_v9  ;;  %v971_v18 = vadd.f32 %v939_v35, %v873_v44  ;;  %v757_v21 = vadd.f32 %v725_v6, %v659_v33  ;;  %v3579_v44 = vld [vmem:[#allocation38_spill] sm:$0xff]  ;;  %v3580_v33 = vld [vmem:[#allocation27_spill] sm:$0xff] }
  0x9e   : > { %1900 = vmatmul.msk.f32.gmra.mxu1 %vm399_vm1, %v1351_v26  ;;  %v633_v13 = vmul.f32 %v2814_v19, %v3574_v24  ;;  %v731_v23 = vmul.f32 %v2821_v41, %v3575_v16  ;;  %v1260_v37 = vadd.f32 %v1228_v62, %v1162_v31  ;;  %v1216_v28 = vmul.f32 %v2918_v20, %v3576_v27  ;;  %v3581_v24 = vld [vmem:[#allocation24_spill] sm:$0xff] }
  0x9f   : > { %v1314_v61 = vmul.f32 %v2925_v54, %v3577_v14  ;;  %v829_v9 = vmul.f32 %v2867_v36, %v2707_v32  ;;  %v1069_v26 = vadd.f32 %v1037_v1, %v971_v18  ;;  %v855_v35 = vadd.f32 %v823_v63, %v757_v21  ;;  %v291_v63 = vld [vmem:[%s2030_s30 + $0xe0] sm:$0xff] }
  0xa0   : > { %v665_v45 = vadd.f32 %v633_v13, %v535_v30  ;;  %v927_v6 = vmul.f32 %v2878_v8, %v3578_v29  ;;  %v1358_v4 = vadd.f32 %v1326_v48, %v1260_v37  ;;  %v1025_v62 = vmul.f32 %v2885_v57, %v3579_v44  ;;  %v3582_v48 = vld [vmem:[#allocation28_spill] sm:$0xff]  ;;  %v3583_v18 = vld [vmem:[#allocation29_spill] sm:$0xff] }
  0xa1   : > { %v1124_v31 = vmul.f32 %v2898_v53, %v3580_v33  ;;  %v542_v16 = vmul.f32 %v2802_v5, %v3581_v24  ;;  %v1168_v27 = vadd.f32 %v1136_v17, %v1069_v26  ;;  %v953_v14 = vadd.f32 %v921_v51, %v855_v35  ;;  %v3584_v13 = vld [vmem:[#allocation25_spill] sm:$0xff] }
  0xa2   : > { %v763_v32 = vadd.f32 %v731_v23, %v665_v45  ;;  %v640_v1 = vmul.f32 %v2814_v19, %v2596_v55  ;;  %1907 = vmatmul.msk.f32.gmra.mxu2 %vm399_vm1, %v1358_v4  ;;  %v1222_v30 = vmul.f32 %v2918_v20, %v3582_v48  ;;  %v1320_v21 = vmul.f32 %v2925_v54, %v3583_v18  ;;  %v292_v55 = vld [vmem:[%s2030_s30 + $0xe8] sm:$0xff] }
  0xa3   : > { %v738_v37 = vmul.f32 %v2821_v41, %v3584_v13  ;;  %v836_v17 = vmul.f32 %v2867_v36, %v2744_v60  ;;  %v1266_v51 = vadd.f32 %v1234_v52, %v1168_v27  ;;  %v1051_v23 = vadd.f32 %v1019_v10, %v953_v14  ;;  %v3003_v13 = vld [vmem:[%s3426_s1] ss:$0 sm:$0xff] }
  0xa4   : > { %v861_v26 = vadd.f32 %v829_v9, %v763_v32  ;;  %v672_v35 = vadd.f32 %v640_v1, %v542_v16  ;;  %v934_v45 = vmul.f32 %v2878_v8, %v2752_v15  ;;  %v1032_v4 = vmul.f32 %v2885_v57, %v2766_v3  ;;  %v3010_v14 = vld [vmem:[%s3427_s2] ss:$0 sm:$0xff] }
  0xa5   : > { %v1131_v24 = vmul.f32 %v2898_v53, %v2740_v50  ;;  %v327_v52 = vmul.f32 %v3003_v13, %v291_v63  ;;  %v1364_v10 = vadd.f32 %v1332_v43, %v1266_v51  ;;  %v1150_v32 = vadd.f32 %v1118_v34, %v1051_v23 }
  0xa6   : > { %v959_v9 = vadd.f32 %v927_v6, %v861_v26  ;;  %v770_v16 = vadd.f32 %v738_v37, %v672_v35  ;;  %v328_v27 = vmul.f32 %v3003_v13, %v292_v55  ;;  %v548_v50 = vmul.f32 %v2802_v5, %v2760_v39 }
  0xa7   : > { %v363_v1 = vadd.f32 %v3010_v14, %v327_v52  ;;  %v646_v3 = vmul.f32 %v2814_v19, %v2776_v22  ;;  %1913 = vmatmul.msk.f32.gmra.mxu3 %vm399_vm1, %v1364_v10  ;;  %v1248_v43 = vadd.f32 %v1216_v28, %v1150_v32  ;;  %v744_v63 = vmul.f32 %v2821_v41, %v2807_v58 }
  0xa8   : > { %v1057_v34 = vadd.f32 %v1025_v62, %v959_v9  ;;  %v868_v6 = vadd.f32 %v836_v17, %v770_v16  ;;  %v364_v37 = vadd.f32 %v3010_v14, %v328_v27  ;;  %v842_v26 = vmul.f32 %v2867_v36, %v2827_v49 }
  0xa9   : > { %v395_v51 = vmax.f32 %v363_v1, 0.0  ;;  %v678_v23 = vadd.f32 %v646_v3, %v548_v50  ;;  %v1346_v35 = vadd.f32 %v1314_v61, %v1248_v43  ;;  %v1229_v22 = vmul.f32 %v2918_v20, %v2749_v42  ;;  %v3586_v43 = vld [vmem:[#allocation21_spill] sm:$0xff] }
  0xaa   : > { %v1156_v55 = vadd.f32 %v1124_v31, %v1057_v34  ;;  %v966_v52 = vadd.f32 %v934_v45, %v868_v6  ;;  %v396_v10 = vmax.f32 %v364_v37, 0.0  ;;  %v940_v62 = vmul.f32 %v2878_v8, %v2829_v56  ;;  %v3587_v6 = vld [vmem:[#allocation33_spill] sm:$0xff] }
  0xab   : > { %484 = vst.msk [vmem:[#allocation2 + $0x169] sm:$0xff] %vm399_vm1, %v395_v51  ;;  %v776_v28 = vadd.f32 %v744_v63, %v678_v23  ;;  %v536_v17 = vmul.f32 %v2802_v5, %v3557_v2  ;;  %1895 = vmatmul.msk.f32.gmra.mxu0 %vm399_vm1, %v1346_v35  ;;  %v634_v61 = vmul.f32 %v2814_v19, %v2642_v59  ;;  %v3589_v51 = vld [vmem:[#allocation35_spill] sm:$0xff] }
  0xac   : > { %v1254_v50 = vadd.f32 %v1222_v30, %v1156_v55  ;;  %v1064_v3 = vadd.f32 %v1032_v4, %v966_v52  ;;  %v732_v31 = vmul.f32 %v2821_v41, %v2650_v46  ;;  %v1327_v45 = vmul.f32 %v2925_v54, %v2755_v38  ;;  %485 = vst.msk [vmem:[#allocation2 + $0x171] sm:$0xff] %vm399_vm1, %v396_v10  ;;  %v3585_v46 = vld [vmem:[#allocation20_spill] sm:$0xff]  ;;  %v3591_v55 = vld [vmem:[#allocation23_spill] sm:$0xff] }
  0xad   : > { %v874_v32 = vadd.f32 %v842_v26, %v776_v28  ;;  %v1038_v9 = vmul.f32 %v2885_v57, %v2839_v47  ;;  %v830_v2 = vmul.f32 %v2867_v36, %v3558_v11  ;;  %v666_v16 = vadd.f32 %v634_v61, %v536_v17  ;;  %v3590_v26 = vld [vmem:[#allocation22_spill] sm:$0xff]  ;;  %v3592_v10 = vld [vmem:[#allocation4_spill] sm:$0xff] }
  0xae   : > { %v1352_v30 = vadd.f32 %v1320_v21, %v1254_v50  ;;  %v1163_v4 = vadd.f32 %v1131_v24, %v1064_v3  ;;  %v928_v59 = vmul.f32 %v2878_v8, %v3559_v12  ;;  %v1026_v1 = vmul.f32 %v2885_v57, %v3585_v46  ;;  %v3588_v21 = vld [vmem:[#allocation34_spill] sm:$0xff]  ;;  %v3593_v61 = vld [vmem:[#allocation8_spill] sm:$0xff] }
  0xaf   : > { %v972_v27 = vadd.f32 %v940_v62, %v874_v32  ;;  %v1125_v34 = vmul.f32 %v2898_v53, %v3586_v43  ;;  %v543_v63 = vmul.f32 %v2802_v5, %v3587_v6  ;;  %v764_v11 = vadd.f32 %v732_v31, %v666_v16  ;;  %v3595_v16 = vld [vmem:[#allocation10_spill] sm:$0xff] }
  0xb0   : > { %1901 = vmatmul.msk.f32.gmra.mxu1 %vm399_vm1, %v1352_v30  ;;  %v1261_v37 = vadd.f32 %v1229_v22, %v1163_v4  ;;  %v641_v24 = vmul.f32 %v2814_v19, %v3588_v21  ;;  %v739_v12 = vmul.f32 %v2821_v41, %v3589_v51  ;;  %v1223_v35 = vmul.f32 %v2918_v20, %v3590_v26  ;;  %v3594_v30 = vld [vmem:[#allocation12_spill] sm:$0xff]  ;;  %v3596_v43 = vld [vmem:[#allocation14_spill] sm:$0xff] }
  0xb1   : > { %v1070_v23 = vadd.f32 %v1038_v9, %v972_v27  ;;  %v1321_v52 = vmul.f32 %v2925_v54, %v3591_v55  ;;  %v837_v28 = vmul.f32 %v2867_v36, %v3592_v10  ;;  %v862_v50 = vadd.f32 %v830_v2, %v764_v11  ;;  %v3597_v21 = vld [vmem:[#allocation6_spill] sm:$0xff] }
  0xb2   : > { %v1359_v62 = vadd.f32 %v1327_v45, %v1261_v37  ;;  %v3061_v17 = vld [vmem:[#allocation2 + $0x168] sm:$0xff]  ;;  %v673_v3 = vadd.f32 %v641_v24, %v543_v63  ;;  %v935_v31 = vmul.f32 %v2878_v8, %v3593_v61  ;;  %v1033_v4 = vmul.f32 %v2885_v57, %v3594_v30 }
  0xb3   : > { %v3063_v22 = vld [vmem:[#allocation2 + $0x169] sm:$0xff]  ;;  %v1137_v32 = vmul.f32 %v2898_v53, %v3061_v17  ;;  %v1132_v45 = vmul.f32 %v2898_v53, %v3595_v16  ;;  %v960_v2 = vadd.f32 %v928_v59, %v862_v50  ;;  %v549_v6 = vmul.f32 %v2802_v5, %v3596_v43 }
  0xb4   : > { %v1235_v9 = vmul.f32 %v2918_v20, %v3063_v22  ;;  %1908 = vmatmul.msk.f32.gmra.mxu2 %vm399_vm1, %v1359_v62  ;;  %v3076_v27 = vld [vmem:[#allocation2 + $0x16a] sm:$0xff]  ;;  %v771_v46 = vadd.f32 %v739_v12, %v673_v3  ;;  %v647_v63 = vmul.f32 %v2814_v19, %v2904_v0  ;;  %v1230_v24 = vmul.f32 %v2918_v20, %v3597_v21  ;;  %v3598_v62 = vld [vmem:[#allocation17_spill] sm:$0xff] }
  0xb5   : > { %v1169_v37 = vadd.f32 %v1137_v32, %v1070_v23  ;;  %v1333_v11 = vmul.f32 %v2925_v54, %v3076_v27  ;;  %v745_v51 = vmul.f32 %v2821_v41, %v2910_v40  ;;  %v3088_v26 = vld [vmem:[#allocation2 + $0x170] sm:$0xff]  ;;  %v1058_v59 = vadd.f32 %v1026_v1, %v960_v2 }
  0xb6   : > { %v869_v12 = vadd.f32 %v837_v28, %v771_v46  ;;  %v679_v55 = vadd.f32 %v647_v63, %v549_v6  ;;  %v843_v50 = vmul.f32 %v2867_v36, %v3598_v62  ;;  %v3599_v0 = vld [vmem:[#allocation7_spill] sm:$0xff]  ;;  %v941_v32 = vmul.f32 %v2878_v8, %v2933_v25  ;;  %v3600_v46 = vld [vmem:[#allocation36_spill] sm:$0xff] }
  0xb7   : > { %v1267_v3 = vadd.f32 %v1235_v9, %v1169_v37  ;;  %v1328_v23 = vmul.f32 %v2925_v54, %v3599_v0  ;;  %v1039_v43 = vmul.f32 %v2885_v57, %v2935_v7  ;;  %v3098_v21 = vld [vmem:[#allocation2 + $0x171] sm:$0xff]  ;;  %v1157_v40 = vadd.f32 %v1125_v34, %v1058_v59 }
  0xb8   : > { %v967_v16 = vadd.f32 %v935_v31, %v869_v12  ;;  %v777_v1 = vadd.f32 %v745_v51, %v679_v55  ;;  %v1138_v28 = vmul.f32 %v2898_v53, %v3088_v26  ;;  %v3102_v2 = vld [vmem:[#allocation2 + $0x172] sm:$0xff]  ;;  %v537_v6 = vmul.f32 %v2802_v5, %v3600_v46  ;;  %v3601_v12 = vld [vmem:[#allocation30_spill] sm:$0xff] }
  0xb9   : > { %v1365_v9 = vadd.f32 %v1333_v11, %v1267_v3  ;;  %v635_v63 = vmul.f32 %v2814_v19, %v3578_v29  ;;  %v733_v37 = vmul.f32 %v2821_v41, %v3579_v44  ;;  %v1255_v0 = vadd.f32 %v1223_v35, %v1157_v40  ;;  %v293_v3 = vld [vmem:[%s2030_s30 + $0xf0] sm:$0xff] }
  0xba   : > { %v1065_v7 = vadd.f32 %v1033_v4, %v967_v16  ;;  %v875_v34 = vadd.f32 %v843_v50, %v777_v1  ;;  %v1236_v31 = vmul.f32 %v2918_v20, %v3098_v21  ;;  %v1334_v11 = vmul.f32 %v2925_v54, %v3102_v2  ;;  %v3604_v1 = vld [vmem:[#allocation32_spill] sm:$0xff] }
  0xbb   : > { %1914 = vmatmul.msk.f32.gmra.mxu3 %vm399_vm1, %v1365_v9  ;;  %v667_v51 = vadd.f32 %v635_v63, %v537_v6  ;;  %v831_v59 = vmul.f32 %v2867_v36, %v3580_v33  ;;  %v929_v29 = vmul.f32 %v2878_v8, %v3582_v48  ;;  %v1353_v44 = vadd.f32 %v1321_v52, %v1255_v0 }
  0xbc   : > { %v1164_v40 = vadd.f32 %v1132_v45, %v1065_v7  ;;  %v973_v35 = vadd.f32 %v941_v32, %v875_v34  ;;  %v1027_v4 = vmul.f32 %v2885_v57, %v3583_v18  ;;  %v1126_v55 = vmul.f32 %v2898_v53, %v3601_v12  ;;  %v3602_v7 = vld [vmem:[#allocation31_spill] sm:$0xff] }
  0xbd   : > { %v765_v16 = vadd.f32 %v733_v37, %v667_v51  ;;  %v544_v50 = vmul.f32 %v2802_v5, %v2744_v60  ;;  %v642_v33 = vmul.f32 %v2814_v19, %v2752_v15  ;;  %1902 = vmatmul.msk.f32.gmra.mxu1 %vm399_vm1, %v1353_v44  ;;  %v1224_v52 = vmul.f32 %v2918_v20, %v3602_v7  ;;  %v3603_v45 = vld [vmem:[#allocation3_spill] sm:$0xff]  ;;  %v294_v15 = vld [vmem:[%s2030_s30 + $0xf8] sm:$0xff] }
  0xbe   : > { %v1262_v48 = vadd.f32 %v1230_v24, %v1164_v40  ;;  %v1071_v0 = vadd.f32 %v1039_v43, %v973_v35  ;;  %v740_v18 = vmul.f32 %v2821_v41, %v3603_v45  ;;  %v1322_v9 = vmul.f32 %v2925_v54, %v3604_v1  ;;  %v3605_v60 = vld [vmem:[#allocation39_spill] sm:$0xff] }
  0xbf   : > { %v863_v32 = vadd.f32 %v831_v59, %v765_v16  ;;  %v674_v46 = vadd.f32 %v642_v33, %v544_v50  ;;  %v838_v6 = vmul.f32 %v2867_v36, %v3605_v60  ;;  %v936_v43 = vmul.f32 %v2878_v8, %v2749_v42 }
  0xc0   : > { %v1360_v63 = vadd.f32 %v1328_v23, %v1262_v48  ;;  %v1170_v37 = vadd.f32 %v1138_v28, %v1071_v0  ;;  %v1034_v24 = vmul.f32 %v2885_v57, %v2755_v38  ;;  %v1133_v59 = vmul.f32 %v2898_v53, %v2760_v39 }
  0xc1   : > { %v961_v34 = vadd.f32 %v929_v29, %v863_v32  ;;  %v772_v51 = vadd.f32 %v740_v18, %v674_v46  ;;  %v329_v44 = vmul.f32 %v3003_v13, %v293_v3  ;;  %v330_v35 = vmul.f32 %v3003_v13, %v294_v15  ;;  %v3607_v46 = vld [vmem:[#allocation10_spill] sm:$0xff] }
  0xc2   : > { %1909 = vmatmul.msk.f32.gmra.mxu2 %vm399_vm1, %v1360_v63  ;;  %v1268_v40 = vadd.f32 %v1236_v31, %v1170_v37  ;;  %v550_v23 = vmul.f32 %v2802_v5, %v2827_v49  ;;  %v648_v42 = vmul.f32 %v2814_v19, %v2829_v56  ;;  %v746_v39 = vmul.f32 %v2821_v41, %v2839_v47  ;;  %v3606_v49 = vld [vmem:[#allocation5_spill] sm:$0xff] }
  0xc3   : > { %v1059_v28 = vadd.f32 %v1027_v4, %v961_v34  ;;  %v870_v38 = vadd.f32 %v838_v6, %v772_v51  ;;  %v365_v29 = vadd.f32 %v3010_v14, %v329_v44  ;;  %v366_v12 = vadd.f32 %v3010_v14, %v330_v35  ;;  %v3610_v34 = vld [vmem:[#allocation7_spill] sm:$0xff] }
  0xc4   : > { %v1366_v16 = vadd.f32 %v1334_v11, %v1268_v40  ;;  %v680_v50 = vadd.f32 %v648_v42, %v550_v23  ;;  %v844_v13 = vmul.f32 %v2867_v36, %v3061_v17  ;;  %v1231_v48 = vmul.f32 %v2918_v20, %v3606_v49  ;;  %v3612_v49 = vld [vmem:[#allocation11_spill] sm:$0xff] }
  0xc5   : > { %v1158_v31 = vadd.f32 %v1126_v55, %v1059_v28  ;;  %v968_v33 = vadd.f32 %v936_v43, %v870_v38  ;;  %v397_v56 = vmax.f32 %v365_v29, 0.0  ;;  %v398_v4 = vmax.f32 %v366_v12, 0.0  ;;  %v3611_v28 = vld [vmem:[#allocation14_spill] sm:$0xff] }
  0xc6   : > { %1915 = vmatmul.msk.f32.gmra.mxu3 %vm399_vm1, %v1366_v16  ;;  %v778_v0 = vadd.f32 %v746_v39, %v680_v50  ;;  %v942_v47 = vmul.f32 %v2878_v8, %v3063_v22  ;;  %v545_v14 = vmul.f32 %v2802_v5, %v3592_v10  ;;  %v643_v55 = vmul.f32 %v2814_v19, %v3593_v61  ;;  %v3608_v61 = vld [vmem:[#allocation6_spill] sm:$0xff] }
  0xc7   : > { %v1256_v11 = vadd.f32 %v1224_v52, %v1158_v31  ;;  %v1066_v7 = vadd.f32 %v1034_v24, %v968_v33  ;;  %486 = vst.msk [vmem:[#allocation2 + $0x181] sm:$0xff] %vm399_vm1, %v397_v56  ;;  %v741_v45 = vmul.f32 %v2821_v41, %v3594_v30  ;;  %v1329_v18 = vmul.f32 %v2925_v54, %v2807_v58  ;;  %v1489_v33 = vpop.f32.mrf.mxu0  ;;  %v3613_v56 = vld [vmem:[#allocation26_spill] sm:$0xff] }
  0xc8   : > { %487 = vst.msk [vmem:[#allocation2 + $0x189] sm:$0xff] %vm399_vm1, %v398_v4  ;;  %v876_v3 = vadd.f32 %v844_v13, %v778_v0  ;;  %v1040_v32 = vmul.f32 %v2885_v57, %v3076_v27  ;;  %v675_v1 = vadd.f32 %v643_v55, %v545_v14  ;;  %v839_v60 = vmul.f32 %v2867_v36, %v3607_v46 }
  0xc9   : > { %v1354_v10 = vadd.f32 %v1322_v9, %v1256_v11  ;;  %v1165_v52 = vadd.f32 %v1133_v59, %v1066_v7  ;;  %v937_v15 = vmul.f32 %v2878_v8, %v3608_v61  ;;  %v551_v30 = vmul.f32 %v2802_v5, %v3598_v62  ;;  %v3609_v9 = vld [vmem:[#allocation18_spill] sm:$0xff]  ;;  %1759 = vst.msk [vmem:[%s3226_s10] sm:$0xff] %vm1585_vm3, %v1489_v33 }
  0xca   : > { %v974_v6 = vadd.f32 %v942_v47, %v876_v3  ;;  %v773_v63 = vadd.f32 %v741_v45, %v675_v1  ;;  %v649_v37 = vmul.f32 %v2814_v19, %v2933_v25  ;;  %v747_v43 = vmul.f32 %v2821_v41, %v3609_v9 }
  0xcb   : > { %1903 = vmatmul.msk.f32.gmra.mxu1 %vm399_vm1, %v1354_v10  ;;  %v1263_v58 = vadd.f32 %v1231_v48, %v1165_v52  ;;  %v1035_v51 = vmul.f32 %v2885_v57, %v3610_v34  ;;  %v845_v59 = vmul.f32 %v2867_v36, %v3088_v26  ;;  %v552_v35 = vmul.f32 %v2802_v5, %v3061_v17 }
  0xcc   : > { %v1072_v24 = vadd.f32 %v1040_v32, %v974_v6  ;;  %v871_v40 = vadd.f32 %v839_v60, %v773_v63  ;;  %v681_v62 = vadd.f32 %v649_v37, %v551_v30  ;;  %v1134_v25 = vmul.f32 %v2898_v53, %v3611_v28  ;;  %v1107_v6 = vld [vmem:[#allocation2 + $0x198] sm:$0xff] }
  0xcd   : > { %v1361_v44 = vadd.f32 %v1329_v18, %v1263_v58  ;;  %v943_v38 = vmul.f32 %v2878_v8, %v3098_v21  ;;  %v650_v29 = vmul.f32 %v2814_v19, %v3063_v22  ;;  %v748_v39 = vmul.f32 %v2821_v41, %v3076_v27 }
  0xce   : > { %v1105_v23 = vld [vmem:[#allocation2 + $0x180] sm:$0xff]  ;;  %v969_v50 = vadd.f32 %v937_v15, %v871_v40  ;;  %v779_v13 = vadd.f32 %v747_v43, %v681_v62  ;;  %v1232_v48 = vmul.f32 %v2918_v20, %v3612_v49  ;;  %v1330_v22 = vmul.f32 %v2925_v54, %v3613_v56 }
  0xcf   : > { %v1203_v42 = vld [vmem:[#allocation2 + $0x181] sm:$0xff]  ;;  %1910 = vmatmul.msk.f32.gmra.mxu2 %vm399_vm1, %v1361_v44  ;;  %v1139_v16 = vmul.f32 %v2898_v53, %v1105_v23  ;;  %v1041_v27 = vmul.f32 %v2885_v57, %v3102_v2  ;;  %v682_v4 = vadd.f32 %v650_v29, %v552_v35  ;;  %v1204_v55 = vld [vmem:[#allocation2 + $0x189] sm:$0xff]  ;;  %v846_v18 = vmul.f32 %v2867_v36, %v1105_v23 }
  0xd0   : > { %v1237_v17 = vmul.f32 %v2918_v20, %v1203_v42  ;;  %v1301_v12 = vld [vmem:[#allocation2 + $0x182] sm:$0xff]  ;;  %v1067_v14 = vadd.f32 %v1035_v51, %v969_v50  ;;  %v877_v11 = vadd.f32 %v845_v59, %v779_v13  ;;  %v944_v3 = vmul.f32 %v2878_v8, %v1203_v42  ;;  %v1302_v46 = vld [vmem:[#allocation2 + $0x18a] sm:$0xff]  ;;  %v1205_v51 = vld [vmem:[#allocation2 + $0x199] sm:$0xff] }
  0xd1   : > { %v1106_v31 = vld [vmem:[#allocation2 + $0x188] sm:$0xff]  ;;  %v1171_v0 = vadd.f32 %v1139_v16, %v1072_v24  ;;  %v1335_v47 = vmul.f32 %v2925_v54, %v1301_v12  ;;  %v780_v45 = vadd.f32 %v748_v39, %v682_v4  ;;  %v1042_v1 = vmul.f32 %v2885_v57, %v1301_v12  ;;  %v1303_v39 = vld [vmem:[#allocation2 + $0x19a] sm:$0xff] }
  0xd2   : > { %v1140_v7 = vmul.f32 %v2898_v53, %v1106_v31  ;;  %v1166_v10 = vadd.f32 %v1134_v25, %v1067_v14  ;;  %v975_v52 = vadd.f32 %v943_v38, %v877_v11  ;;  %v553_v61 = vmul.f32 %v2802_v5, %v3088_v26  ;;  %v1492_v26 = vpop.f32.mrf.mxu0  ;;  %v1206_v56 = vld [vmem:[#allocation2 + $0x1a1] sm:$0xff] }
  0xd3   : > { %v1269_v32 = vadd.f32 %v1237_v17, %v1171_v0  ;;  %v878_v60 = vadd.f32 %v846_v18, %v780_v45  ;;  %v651_v15 = vmul.f32 %v2814_v19, %v3098_v21  ;;  %v749_v30 = vmul.f32 %v2821_v41, %v3102_v2  ;;  %1760 = vst.msk [vmem:[%s3226_s10 + $0x8] sm:$0xff] %vm1585_vm3, %v1492_v26  ;;  %v1108_v17 = vld [vmem:[#allocation2 + $0x1a0] sm:$0xff] }
  0xd4   : > { %v1264_v63 = vadd.f32 %v1232_v48, %v1166_v10  ;;  %v1073_v37 = vadd.f32 %v1041_v27, %v975_v52  ;;  %v1238_v9 = vmul.f32 %v2918_v20, %v1204_v55  ;;  %v847_v34 = vmul.f32 %v2867_v36, %v1106_v31  ;;  %v1304_v4 = vld [vmem:[#allocation2 + $0x1a2] sm:$0xff] }
  0xd5   : > { %v1367_v58 = vadd.f32 %v1335_v47, %v1269_v32  ;;  %v976_v43 = vadd.f32 %v944_v3, %v878_v60  ;;  %v683_v24 = vadd.f32 %v651_v15, %v553_v61  ;;  %v1336_v41 = vmul.f32 %v2925_v54, %v1302_v46 }
  0xd6   : > { %v1362_v5 = vadd.f32 %v1330_v22, %v1264_v63  ;;  %v1172_v19 = vadd.f32 %v1140_v7, %v1073_v37  ;;  %v1141_v21 = vmul.f32 %v2898_v53, %v1107_v6  ;;  %v945_v59 = vmul.f32 %v2878_v8, %v1204_v55 }
  0xd7   : > { %1916 = vmatmul.msk.f32.gmra.mxu3 %vm399_vm1, %v1367_v58  ;;  %v1074_v2 = vadd.f32 %v1042_v1, %v976_v43  ;;  %v781_v36 = vadd.f32 %v749_v30, %v683_v24  ;;  %v1586_v40 = vsel %vm1585_vm3, %v1489_v33, 0.0  ;;  %v1657_v62 = vmul.f32 %v1489_v33, %v1489_v33 }
  0xd8   : > { %1911 = vmatmul.msk.f32.gmra.mxu2 %vm399_vm1, %v1362_v5  ;;  %v1270_v44 = vadd.f32 %v1238_v9, %v1172_v19  ;;  %v1587_v35 = vsel %vm1585_vm3, %v1492_v26, 0.0  ;;  %v1658_v28 = vmul.f32 %v1492_v26, %v1492_v26  ;;  %v1239_v8 = vmul.f32 %v2918_v20, %v1205_v51 }
  0xd9   : > { %v879_v23 = vadd.f32 %v847_v34, %v781_v36  ;;  %v1588_v42 = vadd.f32 %v1587_v35, %v1586_v40  ;;  %v1173_v38 = vadd.f32 %v1141_v21, %v1074_v2  ;;  %v1043_v29 = vmul.f32 %v2885_v57, %v1302_v46 }
  0xda   : > { %v1368_v25 = vadd.f32 %v1336_v41, %v1270_v44  ;;  %v1689_v12 = vsel %vm1585_vm3, %v1657_v62, 0.0  ;;  %v1690_v50 = vsel %vm1585_vm3, %v1658_v28, 0.0  ;;  %v1337_v33 = vmul.f32 %v2925_v54, %v1303_v39  ;;  %v1495_v0 = vpop.f32.mrf.mxu0 }
  0xdb   : > { %v977_v16 = vadd.f32 %v945_v59, %v879_v23  ;;  %v1691_v13 = vadd.f32 %v1690_v50, %v1689_v12  ;;  %v1271_v31 = vadd.f32 %v1239_v8, %v1173_v38  ;;  %v1142_v48 = vmul.f32 %v2898_v53, %v1108_v17  ;;  %1761 = vst.msk [vmem:[%s3226_s10 + $0x10] sm:$0xff] %vm1585_vm3, %v1495_v0 }
  0xdc   : > { %v1240_v27 = vmul.f32 %v2918_v20, %v1206_v56  ;;  %v1589_v47 = vsel %vm1585_vm3, %v1495_v0, 0.0  ;;  %v1659_v14 = vmul.f32 %v1495_v0, %v1495_v0  ;;  %v1338_v53 = vmul.f32 %v2925_v54, %v1304_v4 }
  0xdd   : > { %v1075_v49 = vadd.f32 %v1043_v29, %v977_v16  ;;  %v1369_v22 = vadd.f32 %v1337_v33, %v1271_v31  ;;  %v1590_v11 = vadd.f32 %v1589_v47, %v1588_v42 }
  0xde   : > { %v1692_v55 = vsel %vm1585_vm3, %v1659_v14, 0.0 }
  0xdf   : > { %1917 = vmatmul.msk.f32.gmra.mxu3 %vm399_vm1, %v1368_v25  ;;  %v1174_v57 = vadd.f32 %v1142_v48, %v1075_v49  ;;  %v1693_v45 = vadd.f32 %v1692_v55, %v1691_v13 }
  0xe1   : > { %v1272_v7 = vadd.f32 %v1240_v27, %v1174_v57 }
  0xe2   : > { %v1498_v18 = vpop.f32.mrf.mxu0 }
  0xe3   : > { %v1370_v20 = vadd.f32 %v1338_v53, %v1272_v7  ;;  %v1591_v3 = vsel %vm1585_vm3, %v1498_v18, 0.0  ;;  %v1660_v32 = vmul.f32 %v1498_v18, %v1498_v18  ;;  %1762 = vst.msk [vmem:[%s3226_s10 + $0x18] sm:$0xff] %vm1585_vm3, %v1498_v18 }
  0xe4   : > { %v1592_v10 = vadd.f32 %v1591_v3, %v1590_v11 }
  0xe5   : > { %v1694_v52 = vsel %vm1585_vm3, %v1660_v32, 0.0 }
  0xe6   : > { %v1695_v1 = vadd.f32 %v1694_v52, %v1693_v45 }
  0xe7   : > { %1918 = vmatmul.msk.f32.gmra.mxu3 %vm399_vm1, %v1369_v22 }
  0xea   : > { %v1513_v54 = vpop.f32.mrf.mxu1 }
  0xeb   : > { %1767 = vst.msk [vmem:[%s3226_s10 + $0x40] sm:$0xff] %vm1585_vm3, %v1513_v54  ;;  %v1665_v42 = vmul.f32 %v1513_v54, %v1513_v54  ;;  %v1601_v39 = vsel %vm1585_vm3, %v1513_v54, 0.0 }
  0xed   : > { %v1704_v31 = vsel %vm1585_vm3, %v1665_v42, 0.0 }
  0xef   : > { %1919 = vmatmul.msk.f32.gmra.mxu3 %vm399_vm1, %v1370_v20 }
  0xf3   : > { %v1501_v46 = vpop.f32.mrf.mxu0 }
  0xf4   : > { %v1593_v60 = vsel %vm1585_vm3, %v1501_v46, 0.0  ;;  %v1661_v6 = vmul.f32 %v1501_v46, %v1501_v46  ;;  %1763 = vst.msk [vmem:[%s3226_s10 + $0x20] sm:$0xff] %vm1585_vm3, %v1501_v46 }
  0xf5   : > { %v1594_v61 = vadd.f32 %v1593_v60, %v1592_v10 }
  0xf6   : > { %v1696_v15 = vsel %vm1585_vm3, %v1661_v6, 0.0 }
  0xf7   : > { %v1516_v30 = vpop.f32.mrf.mxu1  ;;  %v1697_v58 = vadd.f32 %v1696_v15, %v1695_v1 }
  0xf8   : > { %1768 = vst.msk [vmem:[%s3226_s10 + $0x48] sm:$0xff] %vm1585_vm3, %v1516_v30  ;;  %v1666_v16 = vmul.f32 %v1516_v30, %v1516_v30  ;;  %v1603_v33 = vsel %vm1585_vm3, %v1516_v30, 0.0 }
  0xfa   : > { %v1706_v22 = vsel %vm1585_vm3, %v1666_v16, 0.0 }
  0xff   : > { %v3266_v63 = vpop.f32.mrf.mxu2  ;;  %v1519_v37 = vpop.f32.mrf.mxu1 }
 0x100   : > { %1775 = vst.msk [vmem:[%s3226_s10 + $0x80] sm:$0xff] %vm1585_vm3, %v3266_v63  ;;  %v1667_v49 = vmul.f32 %v1519_v37, %v1519_v37  ;;  %v1605_v57 = vsel %vm1585_vm3, %v1519_v37, 0.0 }
 0x101   : > { %1769 = vst.msk [vmem:[%s3226_s10 + $0x50] sm:$0xff] %vm1585_vm3, %v1519_v37  ;;  %v1504_v9 = vpop.f32.mrf.mxu0 }
 0x102   : > { %1764 = vst.msk [vmem:[%s3226_s10 + $0x28] sm:$0xff] %vm1585_vm3, %v1504_v9  ;;  %v1662_v21 = vmul.f32 %v1504_v9, %v1504_v9  ;;  %v1595_v26 = vsel %vm1585_vm3, %v1504_v9, 0.0  ;;  %v1708_v47 = vsel %vm1585_vm3, %v1667_v49, 0.0 }
 0x103   : > { %v1596_v44 = vadd.f32 %v1595_v26, %v1594_v61 }
 0x104   : > { %v1698_v51 = vsel %vm1585_vm3, %v1662_v21, 0.0 }
 0x105   : > { %v1699_v62 = vadd.f32 %v1698_v51, %v1697_v58 }
 0x107   : > { %v3275_v43 = vpop.f32.mrf.mxu2 }
 0x108   : > { %v1522_v24 = vpop.f32.mrf.mxu1  ;;  %1776 = vst.msk [vmem:[%s3226_s10 + $0x88] sm:$0xff] %vm1585_vm3, %v3275_v43  ;;  %v1619_v42 = vsel %vm1585_vm3, %v3275_v43, 0.0 }
 0x109   : > { %1770 = vst.msk [vmem:[%s3226_s10 + $0x58] sm:$0xff] %vm1585_vm3, %v1522_v24  ;;  %v1668_v27 = vmul.f32 %v1522_v24, %v1522_v24  ;;  %v1607_v14 = vsel %vm1585_vm3, %v1522_v24, 0.0 }
 0x10b   : > { %v1710_v53 = vsel %vm1585_vm3, %v1668_v27, 0.0 }
 0x113   : > { %v3282_v34 = vpop.f32.mrf.mxu2 }
 0x114   : > { %1777 = vst.msk [vmem:[%s3226_s10 + $0x90] sm:$0xff] %vm1585_vm3, %v3282_v34 }
 0x116   : > { %v1507_v5 = vpop.f32.mrf.mxu0 }
 0x117   : > { %1765 = vst.msk [vmem:[%s3226_s10 + $0x30] sm:$0xff] %vm1585_vm3, %v1507_v5  ;;  %v1663_v2 = vmul.f32 %v1507_v5, %v1507_v5  ;;  %v1597_v36 = vsel %vm1585_vm3, %v1507_v5, 0.0 }
 0x118   : > { %v1598_v35 = vadd.f32 %v1597_v36, %v1596_v44  ;;  %v1617_v36 = vsel %vm1585_vm3, %v3266_v63, 0.0  ;;  %v1674_v44 = vmul.f32 %v3275_v43, %v3275_v43 }
 0x119   : > { %v1700_v40 = vsel %vm1585_vm3, %v1663_v2, 0.0 }
 0x11a   : > { %v3289_v19 = vpop.f32.mrf.mxu3  ;;  %v1701_v38 = vadd.f32 %v1700_v40, %v1699_v62 }
 0x11b   : > { %v1525_v41 = vpop.f32.mrf.mxu1  ;;  %1783 = vst.msk [vmem:[%s3226_s10 + $0xc0] sm:$0xff] %vm1585_vm3, %v3289_v19 }
 0x11c   : > { %1771 = vst.msk [vmem:[%s3226_s10 + $0x60] sm:$0xff] %vm1585_vm3, %v1525_v41  ;;  %v1669_v20 = vmul.f32 %v1525_v41, %v1525_v41  ;;  %v1609_v3 = vsel %vm1585_vm3, %v1525_v41, 0.0  ;;  %v1673_v41 = vmul.f32 %v3266_v63, %v3266_v63  ;;  %v1722_v63 = vsel %vm1585_vm3, %v1674_v44, 0.0 }
 0x11e   : > { %v1712_v52 = vsel %vm1585_vm3, %v1669_v20, 0.0 }
 0x125   : > { %v3299_v59 = vpop.f32.mrf.mxu2 }
 0x126   : > { %1778 = vst.msk [vmem:[%s3226_s10 + $0x98] sm:$0xff] %vm1585_vm3, %v3299_v59  ;;  %v1623_v43 = vsel %vm1585_vm3, %v3299_v59, 0.0 }
 0x128   : > { %v1510_v23 = vpop.f32.mrf.mxu0 }
 0x129   : > { %v1599_v28 = vsel %vm1585_vm3, %v1510_v23, 0.0  ;;  %v1664_v25 = vmul.f32 %v1510_v23, %v1510_v23  ;;  %1766 = vst.msk [vmem:[%s3226_s10 + $0x38] sm:$0xff] %vm1585_vm3, %v1510_v23  ;;  %v1720_v23 = vsel %vm1585_vm3, %v1673_v41, 0.0 }
 0x12a   : > { %v1600_v8 = vadd.f32 %v1599_v28, %v1598_v35  ;;  %v3308_v29 = vpop.f32.mrf.mxu3  ;;  %v1675_v28 = vmul.f32 %v3282_v34, %v3282_v34 }
 0x12b   : > { %v1702_v17 = vsel %vm1585_vm3, %v1664_v25, 0.0  ;;  %1784 = vst.msk [vmem:[%s3226_s10 + $0xc8] sm:$0xff] %vm1585_vm3, %v3308_v29 }
 0x12c   : > { %v1602_v12 = vadd.f32 %v1601_v39, %v1600_v8  ;;  %v1703_v50 = vadd.f32 %v1702_v17, %v1701_v38  ;;  %v1621_v8 = vsel %vm1585_vm3, %v3282_v34, 0.0  ;;  %v1676_v39 = vmul.f32 %v3299_v59, %v3299_v59 }
 0x12d   : > { %v1528_v13 = vpop.f32.mrf.mxu1 }
 0x12e   : > { %1772 = vst.msk [vmem:[%s3226_s10 + $0x68] sm:$0xff] %vm1585_vm3, %v1528_v13  ;;  %v1604_v48 = vadd.f32 %v1603_v33, %v1602_v12  ;;  %v1705_v56 = vadd.f32 %v1704_v31, %v1703_v50  ;;  %v1670_v54 = vmul.f32 %v1528_v13, %v1528_v13  ;;  %v1611_v46 = vsel %vm1585_vm3, %v1528_v13, 0.0 }
 0x12f   : > { %v1724_v12 = vsel %vm1585_vm3, %v1675_v28, 0.0  ;;  %v1726_v49 = vsel %vm1585_vm3, %v1676_v39, 0.0 }
 0x130   : > { %v1606_v4 = vadd.f32 %v1605_v57, %v1604_v48  ;;  %v1707_v0 = vadd.f32 %v1706_v22, %v1705_v56  ;;  %v1714_v6 = vsel %vm1585_vm3, %v1670_v54, 0.0  ;;  %v1633_v54 = vsel %vm1585_vm3, %v3289_v19, 0.0 }
 0x132   : > { %v1709_v11 = vadd.f32 %v1708_v47, %v1707_v0  ;;  %v1608_v7 = vadd.f32 %v1607_v14, %v1606_v4 }
 0x134   : > { %v1711_v55 = vadd.f32 %v1710_v53, %v1709_v11  ;;  %v1610_v32 = vadd.f32 %v1609_v3, %v1608_v7 }
 0x136   : > { %v1713_v1 = vadd.f32 %v1712_v52, %v1711_v55  ;;  %v1612_v60 = vadd.f32 %v1611_v46, %v1610_v32 }
 0x137   : > { %v1549_v45 = vpop.f32.mrf.mxu2 }
 0x138   : > { %1779 = vst.msk [vmem:[%s3226_s10 + $0xa0] sm:$0xff] %vm1585_vm3, %v1549_v45  ;;  %v1715_v15 = vadd.f32 %v1714_v6, %v1713_v1  ;;  %v1677_v50 = vmul.f32 %v1549_v45, %v1549_v45  ;;  %v1625_v48 = vsel %vm1585_vm3, %v1549_v45, 0.0  ;;  %v1682_v1 = vmul.f32 %v3308_v29, %v3308_v29 }
 0x13a   : > { %v1531_v18 = vpop.f32.mrf.mxu1  ;;  %v1728_v57 = vsel %vm1585_vm3, %v1677_v50, 0.0 }
 0x13b   : > { %1773 = vst.msk [vmem:[%s3226_s10 + $0x70] sm:$0xff] %vm1585_vm3, %v1531_v18  ;;  %v1671_v61 = vmul.f32 %v1531_v18, %v1531_v18  ;;  %v1613_v30 = vsel %vm1585_vm3, %v1531_v18, 0.0  ;;  %v1681_v18 = vmul.f32 %v3289_v19, %v3289_v19  ;;  %v1738_v19 = vsel %vm1585_vm3, %v1682_v1, 0.0 }
 0x13c   : > { %v1614_v37 = vadd.f32 %v1613_v30, %v1612_v60 }
 0x13d   : > { %v1716_v9 = vsel %vm1585_vm3, %v1671_v61, 0.0  ;;  %v1736_v61 = vsel %vm1585_vm3, %v1681_v18, 0.0 }
 0x13e   : > { %v3329_v10 = vpop.f32.mrf.mxu3  ;;  %v1717_v24 = vadd.f32 %v1716_v9, %v1715_v15  ;;  %v1635_v15 = vsel %vm1585_vm3, %v3308_v29, 0.0 }
 0x13f   : > { %1785 = vst.msk [vmem:[%s3226_s10 + $0xd0] sm:$0xff] %vm1585_vm3, %v3329_v10  ;;  %v1683_v30 = vmul.f32 %v3329_v10, %v3329_v10 }
 0x141   : > { %v1740_v29 = vsel %vm1585_vm3, %v1683_v30, 0.0 }
 0x145   : > { %v1552_v58 = vpop.f32.mrf.mxu2 }
 0x146   : > { %1780 = vst.msk [vmem:[%s3226_s10 + $0xa8] sm:$0xff] %vm1585_vm3, %v1552_v58  ;;  %v1678_v34 = vmul.f32 %v1552_v58, %v1552_v58  ;;  %v1627_v27 = vsel %vm1585_vm3, %v1552_v58, 0.0 }
 0x148   : > { %v1534_v5 = vpop.f32.mrf.mxu1  ;;  %v1730_v0 = vsel %vm1585_vm3, %v1678_v34, 0.0 }
 0x149   : > { %v1615_v21 = vsel %vm1585_vm3, %v1534_v5, 0.0  ;;  %v1672_v26 = vmul.f32 %v1534_v5, %v1534_v5  ;;  %1774 = vst.msk [vmem:[%s3226_s10 + $0x78] sm:$0xff] %vm1585_vm3, %v1534_v5  ;;  %v3346_v2 = vpop.f32.mrf.mxu3 }
 0x14a   : > { %v1616_v51 = vadd.f32 %v1615_v21, %v1614_v37  ;;  %1786 = vst.msk [vmem:[%s3226_s10 + $0xd8] sm:$0xff] %vm1585_vm3, %v3346_v2  ;;  %v1684_v5 = vmul.f32 %v3346_v2, %v3346_v2 }
 0x14b   : > { %v1718_v40 = vsel %vm1585_vm3, %v1672_v26, 0.0  ;;  %v1639_v26 = vsel %vm1585_vm3, %v3346_v2, 0.0 }
 0x14c   : > { %v1618_v62 = vadd.f32 %v1617_v36, %v1616_v51  ;;  %v1719_v35 = vadd.f32 %v1718_v40, %v1717_v24  ;;  %v1637_v24 = vsel %vm1585_vm3, %v3329_v10, 0.0  ;;  %v1742_v40 = vsel %vm1585_vm3, %v1684_v5, 0.0 }
 0x14e   : > { %v1620_v25 = vadd.f32 %v1619_v42, %v1618_v62  ;;  %v1721_v38 = vadd.f32 %v1720_v23, %v1719_v35 }
 0x150   : > { %v1622_v16 = vadd.f32 %v1621_v8, %v1620_v25  ;;  %v1723_v17 = vadd.f32 %v1722_v63, %v1721_v38 }
 0x152   : > { %v1725_v13 = vadd.f32 %v1724_v12, %v1723_v17  ;;  %v1624_v31 = vadd.f32 %v1623_v43, %v1622_v16  ;;  %v1555_v33 = vpop.f32.mrf.mxu2 }
 0x153   : > { %1781 = vst.msk [vmem:[%s3226_s10 + $0xb0] sm:$0xff] %vm1585_vm3, %v1555_v33  ;;  %v1679_v47 = vmul.f32 %v1555_v33, %v1555_v33  ;;  %v1629_v11 = vsel %vm1585_vm3, %v1555_v33, 0.0 }
 0x154   : > { %v1626_v56 = vadd.f32 %v1625_v48, %v1624_v31  ;;  %v1727_v22 = vadd.f32 %v1726_v49, %v1725_v13 }
 0x155   : > { %v1732_v55 = vsel %vm1585_vm3, %v1679_v47, 0.0 }
 0x156   : > { %v1628_v59 = vadd.f32 %v1627_v27, %v1626_v56  ;;  %v1729_v4 = vadd.f32 %v1728_v57, %v1727_v22 }
 0x158   : > { %v1731_v14 = vadd.f32 %v1730_v0, %v1729_v4  ;;  %v1630_v7 = vadd.f32 %v1629_v11, %v1628_v59 }
 0x15a   : > { %v1573_v53 = vpop.f32.mrf.mxu3  ;;  %v1733_v45 = vadd.f32 %v1732_v55, %v1731_v14 }
 0x15b   : > { %1787 = vst.msk [vmem:[%s3226_s10 + $0xe0] sm:$0xff] %vm1585_vm3, %v1573_v53  ;;  %v1558_v20 = vpop.f32.mrf.mxu2  ;;  %v1685_v51 = vmul.f32 %v1573_v53, %v1573_v53  ;;  %v1641_v10 = vsel %vm1585_vm3, %v1573_v53, 0.0 }
 0x15c   : > { %v1631_v3 = vsel %vm1585_vm3, %v1558_v20, 0.0  ;;  %v1680_v32 = vmul.f32 %v1558_v20, %v1558_v20  ;;  %1782 = vst.msk [vmem:[%s3226_s10 + $0xb8] sm:$0xff] %vm1585_vm3, %v1558_v20 }
 0x15d   : > { %v1632_v52 = vadd.f32 %v1631_v3, %v1630_v7  ;;  %v1744_v23 = vsel %vm1585_vm3, %v1685_v51, 0.0 }
 0x15e   : > { %v1734_v46 = vsel %vm1585_vm3, %v1680_v32, 0.0 }
 0x15f   : > { %v1634_v60 = vadd.f32 %v1633_v54, %v1632_v52  ;;  %v1735_v6 = vadd.f32 %v1734_v46, %v1733_v45 }
 0x161   : > { %v1636_v58 = vadd.f32 %v1635_v15, %v1634_v60  ;;  %v1737_v37 = vadd.f32 %v1736_v61, %v1735_v6 }
 0x162   : > { %v1576_v9 = vpop.f32.mrf.mxu3 }
 0x163   : > { %1788 = vst.msk [vmem:[%s3226_s10 + $0xe8] sm:$0xff] %vm1585_vm3, %v1576_v9  ;;  %v1638_v41 = vadd.f32 %v1637_v24, %v1636_v58  ;;  %v1739_v21 = vadd.f32 %v1738_v19, %v1737_v37  ;;  %v1686_v42 = vmul.f32 %v1576_v9, %v1576_v9  ;;  %v1643_v38 = vsel %vm1585_vm3, %v1576_v9, 0.0 }
 0x165   : > { %v1741_v36 = vadd.f32 %v1740_v29, %v1739_v21  ;;  %v1640_v44 = vadd.f32 %v1639_v26, %v1638_v41  ;;  %v1746_v63 = vsel %vm1585_vm3, %v1686_v42, 0.0 }
 0x167   : > { %v1642_v62 = vadd.f32 %v1641_v10, %v1640_v44  ;;  %v1743_v35 = vadd.f32 %v1742_v40, %v1741_v36 }
 0x169   : > { %v1745_v28 = vadd.f32 %v1744_v23, %v1743_v35  ;;  %v1644_v2 = vadd.f32 %v1643_v38, %v1642_v62 }
 0x16a   : > { %v1579_v25 = vpop.f32.mrf.mxu3 }
 0x16b   : > { %1789 = vst.msk [vmem:[%s3226_s10 + $0xf0] sm:$0xff] %vm1585_vm3, %v1579_v25  ;;  %v1687_v8 = vmul.f32 %v1579_v25, %v1579_v25  ;;  %v1747_v39 = vadd.f32 %v1746_v63, %v1745_v28  ;;  %v1645_v16 = vsel %vm1585_vm3, %v1579_v25, 0.0 }
 0x16c   : > { %v1646_v17 = vadd.f32 %v1645_v16, %v1644_v2 }
 0x16d   : > { %v1748_v12 = vsel %vm1585_vm3, %v1687_v8, 0.0 }
 0x16e   : > { %v1749_v43 = vadd.f32 %v1748_v12, %v1747_v39 }
 0x172   : > { %v1582_v50 = vpop.f32.mrf.mxu3 }
 0x173   : > { %v1647_v13 = vsel %vm1585_vm3, %v1582_v50, 0.0  ;;  %v1688_v31 = vmul.f32 %v1582_v50, %v1582_v50  ;;  %1790 = vst.msk [vmem:[%s3226_s10 + $0xf8] sm:$0xff] %vm1585_vm3, %v1582_v50 }
 0x174   : > { %v1648_v33 = vadd.f32 %v1647_v13, %v1646_v17 }
 0x175   : > { %v1750_v49 = vsel %vm1585_vm3, %v1688_v31, 0.0 }
 0x176   : > { %v1649_v48 = vrot.slane %v1648_v33, 4  ;;  %v1751_v34 = vadd.f32 %v1750_v49, %v1749_v43 }
 0x178   : > { %v1650_v56 = vadd.f32 %v1649_v48, %v1648_v33  ;;  %v1752_v22 = vrot.slane %v1751_v34, 4 }
 0x17a   : > { %v1651_v57 = vrot.slane %v1650_v56, 2  ;;  %v1753_v27 = vadd.f32 %v1752_v22, %v1751_v34 }
 0x17c   : > { %v1652_v59 = vadd.f32 %v1651_v57, %v1650_v56  ;;  %v1754_v4 = vrot.slane %v1753_v27, 2 }
 0x17e   : > { %v1653_v0 = vrot.slane %v1652_v59, 1  ;;  %v1755_v47 = vadd.f32 %v1754_v4, %v1753_v27 }
 0x180   : > { %v1654_v14 = vadd.f32 %v1653_v0, %v1652_v59  ;;  %v1756_v11 = vrot.slane %v1755_v47, 1 }
 0x182   : > { %1656 = vst.msk [vmem:[%s262_s13] sm:$0x1] %vm1655_vm4, %v1654_v14  ;;  %v1757_v7 = vadd.f32 %v1756_v11, %v1755_v47 }
 0x184   : > { %1758 = vst.msk [vmem:[%s262_s13 + $0x1] sm:$0x1] %vm1655_vm4, %v1757_v7 }
 0x185 PF: > { %s17_s21 = sadd.s32 1, %s1964_s21  }
 0x186   : > { %p14_p4 = scmp.ge.s32.totalorder %s17_s21, 4  }
 0x188   :  { %16 = sbr.rel (!%p14_p4) target bundleno = 1 (0x1), region = 84 }

// kernel: sep_conv.3
= control target key start
LH: loop header
LB: loop body
LE: loop exit
PB: predicated region body
PF: predicated region fallthrough
CT: control target
= control target key end

     0   :  { %s1861_s15 = smov 0   ;;  %s3138_s0 = inlined_call_operand.vmem [shape: f32[2,16,16,4], index: 0, kind: input, shape index: {}]   ;;  %s3139_s1 = inlined_call_operand.vmem [shape: f32[9,4], index: 1, kind: input, shape index: {}]   ;;  %s3140_s2 = inlined_call_operand.vmem [shape: f32[4,4], index: 2, kind: input, shape index: {}]   ;;  %s3141_s3 = inlined_call_operand.vmem [shape: f32[2,16,16,4], index: 3, kind: output, shape index: {0}]   ;;  %s3142_s4 = inlined_call_operand.vmem [shape: f32[2,2,4], index: 4, kind: output, shape index: {1}]  }
   0x1 LB: > { %s1750_s16 = sadd.s32 4294967295, %s1833_s15   ;;  %p1754_p0 = scmp.ge.s32.totalorder %s1833_s15, 1  ;;  %s1833_s15 = sphi %s1861_s15, %s15_s15  }
   0x2   : > { %p165_p1 = scmp.lt.s32.totalorder %s1833_s15, 3 }
   0x4   : > { %p166_p2 = pnand %p1754_p0, %p165_p1 }
   0x6   : > { %169 = sbr.rel (%p166_p2) target bundleno = 380 (0x17c), region = 32 }
   0xb   : > { %v1245_v0 = vld [vmem:[%s3140_s2] sm:$0xf]  ;;  %vm1342_vm0 = vcmask 1043456   ;;  %p195_p3 = scmp.lt.s32.totalorder %s1750_s16, 1  ;;  %vm273_vm1 = vcmask 31744   ;;  %v1835_v1 = vmov 0.0  }
   0xc   : > { %1760 = vmatpush.msk.msra.mxu0 %vm1342_vm0, %v1245_v0  ;;  %274 = vst.msk [vmem:[#allocation2] sm:$0xff] %vm273_vm1, %v1835_v1  ;;  %1797 = vmatpush.msk.msra.mxu1 %vm1342_vm0, %v1245_v0  ;;  %vm276_vm2 = vcmask 25600   ;;  %v1883_v2 = vld [vmem:[%s3139_s1] ss:$0 sm:$0xff]  ;;  %v1891_v3 = vld [vmem:[%s3139_s1 + $0x1] ss:$0 sm:$0xff] }
   0xd   : > { %s3287_s16 = smov (!%p195_p3, %s1750_s16), 1  ;;  %275 = vst.msk [vmem:[#allocation2 + $0x8] sm:$0xff] %vm273_vm1, %v1835_v1  ;;  %1798 = vmatpush.msk.msra.mxu2 %vm1342_vm0, %v1245_v0  ;;  %1799 = vmatpush.msk.msra.mxu3 %vm1342_vm0, %v1245_v0  ;;  %v1905_v4 = vld [vmem:[%s3139_s1 + $0x2] ss:$0 sm:$0xff]  ;;  %v1927_v20 = vld [vmem:[%s3139_s1 + $0x3] ss:$0 sm:$0xff] }
   0xe   : > { %278 = vst.msk [vmem:[#allocation2 + $0x18] sm:$0xff] %vm273_vm1, %v1835_v1  ;;  %s1795_s21 = sshll.u32 %s3287_s16, 8  ;;  %v1932_v21 = vld [vmem:[%s3139_s1 + $0x4] ss:$0 sm:$0xff]  ;;  %v1941_v23 = vld [vmem:[%s3139_s1 + $0x5] ss:$0 sm:$0xff] }
   0xf   : > { %279 = vst.msk [vmem:[#allocation2 + $0x20] sm:$0xff] %vm273_vm1, %v1835_v1  ;;  %s1898_s26 = scalar_lea.vmem %s3138_s0, %s1795_s21  ;;  %v1960_v30 = vld [vmem:[%s3139_s1 + $0x6] ss:$0 sm:$0xff]  ;;  %v1973_v34 = vld [vmem:[%s3139_s1 + $0x7] ss:$0 sm:$0xff]  ;;  %s2902_s12 = scalar_lea.vmem %s3141_s3, %s1795_s21  ;;  %vm1528_vm3 = vcmask 24576  }
  0x10   : > { %280 = vst.msk [vmem:[#allocation2 + $0x28] sm:$0x3] %vm276_vm2, %v1835_v1  ;;  %v209_v5 = vld [vmem:[%s1898_s26] sm:$0xff]  ;;  %v210_v6 = vld [vmem:[%s1898_s26 + $0x8] sm:$0xff]  ;;  %v211_v7 = vld [vmem:[%s1898_s26 + $0x10] sm:$0xff]  ;;  %s1759_s21 = sshll.u32 %s3287_s16, 1 }
  0x11   : > { %281 = vst.msk [vmem:[#allocation2 + $0x30] sm:$0xff] %vm273_vm1, %v1835_v1  ;;  %v212_v8 = vld [vmem:[%s1898_s26 + $0x18] sm:$0xff]  ;;  %v241_v9 = vmax.f32 %v209_v5, 0.0  ;;  %v242_v10 = vmax.f32 %v210_v6, 0.0  ;;  %v243_v11 = vmax.f32 %v211_v7, 0.0  ;;  %s208_s17 = scalar_lea.vmem %s3142_s4, %s1759_s21 }
  0x12   : > { %282 = vst.msk [vmem:[#allocation2 + $0x38] sm:$0xff] %vm273_vm1, %v1835_v1  ;;  %v244_v12 = vmax.f32 %v212_v8, 0.0  ;;  %v1989_v42 = vld [vmem:[%s3139_s1 + $0x8] ss:$0 sm:$0xff] }
  0x13   : > { %283 = vst.msk [vmem:[#allocation2 + $0x40] sm:$0x3] %vm276_vm2, %v1835_v1  ;;  %v362_v13 = vld [vmem:[#allocation2] sm:$0xff] }
  0x14   : > { %330 = vst.msk [vmem:[#allocation2 + $0x19] sm:$0xff] %vm273_vm1, %v241_v9  ;;  %v396_v14 = vmul.f32 %v1883_v2, %v362_v13  ;;  %v460_v15 = vld [vmem:[#allocation2 + $0x1] sm:$0xff] }
  0x15   : > { %v558_v16 = vld [vmem:[#allocation2 + $0x2] sm:$0xff]  ;;  %331 = vst.msk [vmem:[#allocation2 + $0x21] sm:$0xff] %vm273_vm1, %v242_v10  ;;  %v494_v17 = vmul.f32 %v1891_v3, %v460_v15 }
  0x16   : > { %332 = vst.msk [vmem:[#allocation2 + $0x31] sm:$0xff] %vm273_vm1, %v243_v11  ;;  %v592_v18 = vmul.f32 %v1905_v4, %v558_v16  ;;  %v363_v26 = vld [vmem:[#allocation2 + $0x8] sm:$0xff] }
  0x17   : > { %333 = vst.msk [vmem:[#allocation2 + $0x39] sm:$0xff] %vm273_vm1, %v244_v12  ;;  %v526_v19 = vadd.f32 %v494_v17, %v396_v14  ;;  %v397_v35 = vmul.f32 %v1883_v2, %v363_v26 }
  0x18   : > { %277 = vst.msk [vmem:[#allocation2 + $0x10] sm:$0x3] %vm276_vm2, %v1835_v1 }
  0x19   : > { %284 = vst.msk [vmem:[#allocation2 + $0x48] sm:$0xff] %vm273_vm1, %v1835_v1  ;;  %v624_v22 = vadd.f32 %v592_v18, %v526_v19 }
  0x1a   : > { %285 = vst.msk [vmem:[#allocation2 + $0x50] sm:$0xff] %vm273_vm1, %v1835_v1 }
  0x1b   : > { %v1945_v24 = vld [vmem:[#allocation2 + $0x18] sm:$0xff]  ;;  %286 = vst.msk [vmem:[#allocation2 + $0x58] sm:$0x3] %vm276_vm2, %v1835_v1 }
  0x1c   : > { %v1947_v25 = vld [vmem:[#allocation2 + $0x19] sm:$0xff]  ;;  %v690_v27 = vmul.f32 %v1927_v20, %v1945_v24  ;;  %287 = vst.msk [vmem:[#allocation2 + $0x60] sm:$0xff] %vm273_vm1, %v1835_v1  ;;  %v755_v46 = vld [vmem:[#allocation2 + $0x21] sm:$0xff]  ;;  %v398_v11 = vmul.f32 %v1883_v2, %v1945_v24 }
  0x1d   : > { %v788_v28 = vmul.f32 %v1932_v21, %v1947_v25  ;;  %v1955_v29 = vld [vmem:[#allocation2 + $0x1a] sm:$0xff]  ;;  %v1964_v31 = vld [vmem:[#allocation2 + $0x30] sm:$0xff]  ;;  %288 = vst.msk [vmem:[#allocation2 + $0x68] sm:$0xff] %vm273_vm1, %v1835_v1  ;;  %v853_v51 = vld [vmem:[#allocation2 + $0x22] sm:$0xff]  ;;  %v789_v55 = vmul.f32 %v1932_v21, %v755_v46  ;;  %v496_v12 = vmul.f32 %v1891_v3, %v1947_v25  ;;  %v497_v14 = vmul.f32 %v1891_v3, %v755_v46 }
  0x1e   : > { %v722_v32 = vadd.f32 %v690_v27, %v624_v22  ;;  %v886_v33 = vmul.f32 %v1941_v23, %v1955_v29  ;;  %289 = vst.msk [vmem:[#allocation2 + $0x70] sm:$0x3] %vm276_vm2, %v1835_v1  ;;  %v1978_v36 = vld [vmem:[#allocation2 + $0x20] sm:$0xff]  ;;  %v1980_v37 = vld [vmem:[#allocation2 + $0x31] sm:$0xff]  ;;  %v985_v41 = vmul.f32 %v1960_v30, %v1964_v31  ;;  %v887_v59 = vmul.f32 %v1941_v23, %v853_v51  ;;  %v214_v25 = vld [vmem:[%s1898_s26 + $0x28] sm:$0xff] }
  0x1f   : > { %290 = vst.msk [vmem:[#allocation2 + $0x78] sm:$0xff] %vm273_vm1, %v1835_v1  ;;  %v461_v38 = vld [vmem:[#allocation2 + $0x9] sm:$0xff]  ;;  %v1995_v45 = vld [vmem:[#allocation2 + $0x32] sm:$0xff]  ;;  %v1083_v48 = vmul.f32 %v1973_v34, %v1980_v37  ;;  %v691_v50 = vmul.f32 %v1927_v20, %v1978_v36  ;;  %v2029_v0 = vld [vmem:[#allocation2 + $0x3a] sm:$0xff]  ;;  %v399_v13 = vmul.f32 %v1883_v2, %v1978_v36  ;;  %v528_v15 = vadd.f32 %v496_v12, %v398_v11 }
  0x20   : > { %v559_v39 = vld [vmem:[#allocation2 + $0xa] sm:$0xff]  ;;  %v820_v40 = vadd.f32 %v788_v28, %v722_v32  ;;  %291 = vst.msk [vmem:[#allocation2 + $0x80] sm:$0xff] %vm273_vm1, %v1835_v1  ;;  %v495_v43 = vmul.f32 %v1891_v3, %v461_v38  ;;  %v1181_v53 = vmul.f32 %v1989_v42, %v1995_v45  ;;  %v2014_v56 = vld [vmem:[#allocation2 + $0x38] sm:$0xff]  ;;  %v1182_v8 = vmul.f32 %v1989_v42, %v2029_v0  ;;  %v213_v24 = vld [vmem:[%s1898_s26 + $0x20] sm:$0xff] }
  0x21   : > { %v593_v44 = vmul.f32 %v1905_v4, %v559_v39  ;;  %292 = vst.msk [vmem:[#allocation2 + $0x88] sm:$0x3] %vm276_vm2, %v1835_v1  ;;  %v2021_v60 = vld [vmem:[#allocation2 + $0x39] sm:$0xff]  ;;  %v986_v63 = vmul.f32 %v1960_v30, %v2014_v56  ;;  %v594_v16 = vmul.f32 %v1905_v4, %v1955_v29  ;;  %v529_v17 = vadd.f32 %v497_v14, %v399_v13  ;;  %v215_v28 = vld [vmem:[%s1898_s26 + $0x30] sm:$0xff]  ;;  %v218_v39 = vld [vmem:[%s1898_s26 + $0x48] sm:$0xff] }
  0x22   : > { %v918_v47 = vadd.f32 %v886_v33, %v820_v40  ;;  %293 = vst.msk [vmem:[#allocation2 + $0x90] sm:$0xff] %vm273_vm1, %v1835_v1  ;;  %v527_v49 = vadd.f32 %v495_v43, %v397_v35  ;;  %v1084_v6 = vmul.f32 %v1973_v34, %v2021_v60  ;;  %v595_v18 = vmul.f32 %v1905_v4, %v853_v51  ;;  %v216_v35 = vld [vmem:[%s1898_s26 + $0x38] sm:$0xff]  ;;  %v217_v38 = vld [vmem:[%s1898_s26 + $0x40] sm:$0xff]  ;;  %v219_v40 = vld [vmem:[%s1898_s26 + $0x50] sm:$0xff] }
  0x23   : > { %294 = vst.msk [vmem:[#allocation2 + $0x98] sm:$0xff] %vm273_vm1, %v1835_v1  ;;  %v626_v19 = vadd.f32 %v594_v16, %v528_v15  ;;  %v692_v22 = vmul.f32 %v1927_v20, %v1964_v31  ;;  %v693_v27 = vmul.f32 %v1927_v20, %v2014_v56  ;;  %v245_v29 = vmax.f32 %v213_v24, 0.0  ;;  %v220_v51 = vld [vmem:[%s1898_s26 + $0x58] sm:$0xff]  ;;  %v2157_v11 = vld [vmem:[%s1898_s26 + $0xb0] sm:$0xff]  ;;  %v2167_v16 = vld [vmem:[%s1898_s26 + $0xa0] sm:$0xff] }
  0x24   : > { %v1017_v52 = vadd.f32 %v985_v41, %v918_v47  ;;  %295 = vst.msk [vmem:[#allocation2 + $0xa0] sm:$0x3] %vm276_vm2, %v1835_v1  ;;  %v625_v54 = vadd.f32 %v593_v44, %v527_v49  ;;  %v627_v26 = vadd.f32 %v595_v18, %v529_v17  ;;  %v790_v33 = vmul.f32 %v1932_v21, %v1980_v37  ;;  %v2160_v12 = vld [vmem:[%s1898_s26 + $0xb8] sm:$0xff]  ;;  %v2170_v17 = vld [vmem:[%s1898_s26 + $0xc0] sm:$0xff] }
  0x25   : > { %296 = vst.msk [vmem:[#allocation2 + $0xa8] sm:$0xff] %vm273_vm1, %v1835_v1  ;;  %v724_v32 = vadd.f32 %v692_v22, %v626_v19  ;;  %v246_v36 = vmax.f32 %v214_v25, 0.0  ;;  %v247_v41 = vmax.f32 %v215_v28, 0.0  ;;  %v791_v44 = vmul.f32 %v1932_v21, %v2021_v60  ;;  %v2177_v25 = vld [vmem:[%s1898_s26 + $0xc8] sm:$0xff] }
  0x26   : > { %v1115_v57 = vadd.f32 %v1083_v48, %v1017_v52  ;;  %297 = vst.msk [vmem:[#allocation2 + $0xb0] sm:$0xff] %vm273_vm1, %v1835_v1  ;;  %v723_v58 = vadd.f32 %v691_v50, %v625_v54  ;;  %v725_v43 = vadd.f32 %v693_v27, %v627_v26  ;;  %v248_v46 = vmax.f32 %v216_v35, 0.0  ;;  %v224_v54 = vld [vmem:[%s1898_s26 + $0x78] sm:$0xff] }
  0x27   : > { %298 = vst.msk [vmem:[#allocation2 + $0xb8] sm:$0x3] %vm276_vm2, %v1835_v1  ;;  %v400_v47 = vmul.f32 %v1883_v2, %v1964_v31  ;;  %v498_v48 = vmul.f32 %v1891_v3, %v1980_v37  ;;  %v822_v49 = vadd.f32 %v790_v33, %v724_v32  ;;  %v888_v50 = vmul.f32 %v1941_v23, %v1995_v45  ;;  %v223_v31 = vld [vmem:[%s1898_s26 + $0x70] sm:$0xff] }
  0x28   : > { %v1213_v61 = vadd.f32 %v1181_v53, %v1115_v57  ;;  %299 = vst.msk [vmem:[#allocation2 + $0xc0] sm:$0xff] %vm273_vm1, %v1835_v1  ;;  %v821_v62 = vadd.f32 %v789_v55, %v723_v58  ;;  %v249_v52 = vmax.f32 %v217_v38, 0.0  ;;  %v251_v53 = vmax.f32 %v219_v40, 0.0  ;;  %v225_v57 = vld [vmem:[%s1898_s26 + $0x80] sm:$0xff]  ;;  %v2134_v58 = vld [vmem:[%s1898_s26 + $0x88] sm:$0xff] }
  0x29   : > { %300 = vst.msk [vmem:[#allocation2 + $0xc8] sm:$0xff] %vm273_vm1, %v1835_v1  ;;  %v823_v37 = vadd.f32 %v791_v44, %v725_v43  ;;  %v889_v55 = vmul.f32 %v1941_v23, %v2029_v0  ;;  %v257_v13 = vmax.f32 %v225_v57, 0.0  ;;  %v258_v14 = vmax.f32 %v2134_v58, 0.0 }
  0x2a   : > { %1761 = vmatmul.msk.f32.vlgmr.msra.gmra.mxu0 %vm273_vm1, %v1213_v61  ;;  %301 = vst.msk [vmem:[#allocation2 + $0xd0] sm:$0x3] %vm276_vm2, %v1835_v1  ;;  %v919_v5 = vadd.f32 %v887_v59, %v821_v62  ;;  %v401_v59 = vmul.f32 %v1883_v2, %v2014_v56  ;;  %v499_v61 = vmul.f32 %v1891_v3, %v2021_v60  ;;  %v252_v62 = vmax.f32 %v220_v51, 0.0 }
  0x2b   : > { %302 = vst.msk [vmem:[#allocation2 + $0xd8] sm:$0xff] %vm273_vm1, %v1835_v1  ;;  %v255_v56 = vmax.f32 %v223_v31, 0.0  ;;  %v256_v60 = vmax.f32 %v224_v54, 0.0  ;;  %v597_v15 = vmul.f32 %v1905_v4, %v2029_v0  ;;  %v921_v18 = vadd.f32 %v889_v55, %v823_v37 }
  0x2c   : > { %303 = vst.msk [vmem:[#allocation2 + $0xe0] sm:$0xff] %vm273_vm1, %v1835_v1  ;;  %v1018_v7 = vadd.f32 %v986_v63, %v919_v5  ;;  %v2142_v63 = vld [vmem:[%s1898_s26 + $0x90] sm:$0xff]  ;;  %v2145_v5 = vld [vmem:[%s1898_s26 + $0x98] sm:$0xff]  ;;  %v261_v40 = vmax.f32 %v2167_v16, 0.0 }
  0x2d   : > { %304 = vst.msk [vmem:[#allocation2 + $0xe8] sm:$0x3] %vm276_vm2, %v1835_v1  ;;  %v259_v19 = vmax.f32 %v2142_v63, 0.0  ;;  %v260_v22 = vmax.f32 %v2145_v5, 0.0 }
  0x2e   : > { %305 = vst.msk [vmem:[#allocation2 + $0xf0] sm:$0xff] %vm273_vm1, %v1835_v1  ;;  %v1116_v9 = vadd.f32 %v1084_v6, %v1018_v7  ;;  %v530_v6 = vadd.f32 %v498_v48, %v400_v47  ;;  %v596_v7 = vmul.f32 %v1905_v4, %v1995_v45  ;;  %v531_v45 = vadd.f32 %v499_v61, %v401_v59 }
  0x2f   : > { %306 = vst.msk [vmem:[#allocation2 + $0xf8] sm:$0xff] %vm273_vm1, %v1835_v1 }
  0x30   : > { %307 = vst.msk [vmem:[#allocation2 + $0x100] sm:$0x3] %vm276_vm2, %v1835_v1  ;;  %v1214_v10 = vadd.f32 %v1182_v8, %v1116_v9  ;;  %v2150_v8 = vld [vmem:[%s1898_s26 + $0x60] sm:$0xff]  ;;  %v920_v9 = vadd.f32 %v888_v50, %v822_v49  ;;  %v2184_v0 = vadd.f32 %v596_v7, %v530_v6  ;;  %v2213_v49 = vadd.f32 %v597_v15, %v531_v45 }
  0x31   : > { %308 = vst.msk [vmem:[#allocation2 + $0x108] sm:$0xff] %vm273_vm1, %v1835_v1  ;;  %v253_v24 = vmax.f32 %v2150_v8, 0.0 }
  0x32   : > { %309 = vst.msk [vmem:[#allocation2 + $0x110] sm:$0xff] %vm273_vm1, %v1835_v1  ;;  %1762 = vmatmul.msk.f32.gmra.mxu0 %vm273_vm1, %v1214_v10  ;;  %v2154_v10 = vld [vmem:[%s1898_s26 + $0x68] sm:$0xff] }
  0x33   : > { %310 = vst.msk [vmem:[#allocation2 + $0x118] sm:$0x3] %vm276_vm2, %v1835_v1  ;;  %v254_v28 = vmax.f32 %v2154_v10, 0.0 }
  0x34   : > { %311 = vst.msk [vmem:[#allocation2 + $0x120] sm:$0xff] %vm273_vm1, %v1835_v1 }
  0x35   : > { %312 = vst.msk [vmem:[#allocation2 + $0x128] sm:$0xff] %vm273_vm1, %v1835_v1 }
  0x36   : > { %313 = vst.msk [vmem:[#allocation2 + $0x130] sm:$0x3] %vm276_vm2, %v1835_v1 }
  0x37   : > { %314 = vst.msk [vmem:[#allocation2 + $0x138] sm:$0xff] %vm273_vm1, %v1835_v1 }
  0x38   : > { %315 = vst.msk [vmem:[#allocation2 + $0x140] sm:$0xff] %vm273_vm1, %v1835_v1 }
  0x39   : > { %316 = vst.msk [vmem:[#allocation2 + $0x148] sm:$0x3] %vm276_vm2, %v1835_v1 }
  0x3a   : > { %317 = vst.msk [vmem:[#allocation2 + $0x150] sm:$0xff] %vm273_vm1, %v1835_v1 }
  0x3b   : > { %318 = vst.msk [vmem:[#allocation2 + $0x158] sm:$0xff] %vm273_vm1, %v1835_v1 }
  0x3c   : > { %319 = vst.msk [vmem:[#allocation2 + $0x160] sm:$0x3] %vm276_vm2, %v1835_v1 }
  0x3d   : > { %320 = vst.msk [vmem:[#allocation2 + $0x168] sm:$0xff] %vm273_vm1, %v1835_v1 }
  0x3e   : > { %321 = vst.msk [vmem:[#allocation2 + $0x170] sm:$0xff] %vm273_vm1, %v1835_v1 }
  0x3f   : > { %322 = vst.msk [vmem:[#allocation2 + $0x178] sm:$0x3] %vm276_vm2, %v1835_v1 }
  0x40   : > { %323 = vst.msk [vmem:[#allocation2 + $0x180] sm:$0xff] %vm273_vm1, %v1835_v1 }
  0x41   : > { %324 = vst.msk [vmem:[#allocation2 + $0x188] sm:$0xff] %vm273_vm1, %v1835_v1 }
  0x42   : > { %325 = vst.msk [vmem:[#allocation2 + $0x190] sm:$0x3] %vm276_vm2, %v1835_v1 }
  0x43   : > { %326 = vst.msk [vmem:[#allocation2 + $0x198] sm:$0xff] %vm273_vm1, %v1835_v1 }
  0x44   : > { %327 = vst.msk [vmem:[#allocation2 + $0x1a0] sm:$0xff] %vm273_vm1, %v1835_v1 }
  0x45   : > { %328 = vst.msk [vmem:[#allocation2 + $0x1a8] sm:$0x3] %vm276_vm2, %v1835_v1  ;;  %v250_v1 = vmax.f32 %v218_v39, 0.0 }
  0x46   : > { %334 = vst.msk [vmem:[#allocation2 + $0x49] sm:$0xff] %vm273_vm1, %v245_v29 }
  0x47   : > { %335 = vst.msk [vmem:[#allocation2 + $0x51] sm:$0xff] %vm273_vm1, %v246_v36 }
  0x48   : > { %336 = vst.msk [vmem:[#allocation2 + $0x61] sm:$0xff] %vm273_vm1, %v247_v41 }
  0x49   : > { %337 = vst.msk [vmem:[#allocation2 + $0x69] sm:$0xff] %vm273_vm1, %v248_v46 }
  0x4a   : > { %338 = vst.msk [vmem:[#allocation2 + $0x79] sm:$0xff] %vm273_vm1, %v249_v52 }
  0x4b   : > { %339 = vst.msk [vmem:[#allocation2 + $0x81] sm:$0xff] %vm273_vm1, %v250_v1 }
  0x4c   : > { %340 = vst.msk [vmem:[#allocation2 + $0x91] sm:$0xff] %vm273_vm1, %v251_v53 }
  0x4d   : > { %v2179_v26 = vld [vmem:[#allocation2 + $0x48] sm:$0xff]  ;;  %341 = vst.msk [vmem:[#allocation2 + $0x99] sm:$0xff] %vm273_vm1, %v252_v62 }
  0x4e   : > { %v2181_v27 = vld [vmem:[#allocation2 + $0x49] sm:$0xff]  ;;  %v987_v33 = vmul.f32 %v1960_v30, %v2179_v26  ;;  %v2197_v39 = vld [vmem:[#allocation2 + $0x51] sm:$0xff]  ;;  %344 = vst.msk [vmem:[#allocation2 + $0xc1] sm:$0xff] %vm273_vm1, %v255_v56  ;;  %v694_v56 = vmul.f32 %v1927_v20, %v2179_v26 }
  0x4f   : > { %3200 = vst [vmem:[#allocation3_spill] sm:$0xff] %v2181_v27  ;;  %v1085_v35 = vmul.f32 %v1973_v34, %v2181_v27  ;;  %v2193_v36 = vld [vmem:[#allocation2 + $0x4a] sm:$0xff]  ;;  %v2204_v44 = vld [vmem:[#allocation2 + $0x60] sm:$0xff]  ;;  %v2210_v48 = vld [vmem:[#allocation2 + $0x52] sm:$0xff]  ;;  %v1086_v31 = vmul.f32 %v1973_v34, %v2197_v39 }
  0x50   : > { %3201 = vst [vmem:[#allocation4_spill] sm:$0xff] %v2193_v36  ;;  %v2195_v38 = vld [vmem:[#allocation2 + $0x50] sm:$0xff]  ;;  %v1183_v43 = vmul.f32 %v1989_v42, %v2193_v36  ;;  %v2206_v46 = vld [vmem:[#allocation2 + $0x61] sm:$0xff]  ;;  %v1019_v51 = vadd.f32 %v987_v33, %v920_v9  ;;  %v404_v52 = vmul.f32 %v1883_v2, %v2204_v44 }
  0x51   : > { %3202 = vst [vmem:[#allocation5_spill] sm:$0xff] %v2195_v38  ;;  %v988_v47 = vmul.f32 %v1960_v30, %v2195_v38  ;;  %v502_v1 = vmul.f32 %v1891_v3, %v2206_v46  ;;  %v2220_v53 = vld [vmem:[#allocation2 + $0x62] sm:$0xff]  ;;  %v2231_v57 = vld [vmem:[#allocation2 + $0x78] sm:$0xff]  ;;  %v2239_v63 = vld [vmem:[#allocation2 + $0x6a] sm:$0xff] }
  0x52   : > { %3203 = vst [vmem:[#allocation6_spill] sm:$0xff] %v2197_v39  ;;  %v2224_v54 = vld [vmem:[#allocation2 + $0x68] sm:$0xff]  ;;  %v600_v55 = vmul.f32 %v1905_v4, %v2220_v53  ;;  %v2233_v58 = vld [vmem:[#allocation2 + $0x79] sm:$0xff]  ;;  %v1117_v5 = vadd.f32 %v1085_v35, %v1019_v51  ;;  %v698_v7 = vmul.f32 %v1927_v20, %v2231_v57  ;;  %v601_v15 = vmul.f32 %v1905_v4, %v2239_v63 }
  0x53   : > { %345 = vst.msk [vmem:[#allocation2 + $0xc9] sm:$0xff] %vm273_vm1, %v256_v60  ;;  %v2226_v37 = vld [vmem:[#allocation2 + $0x69] sm:$0xff]  ;;  %v1020_v59 = vadd.f32 %v988_v47, %v921_v18  ;;  %v405_v61 = vmul.f32 %v1883_v2, %v2224_v54  ;;  %v534_v6 = vadd.f32 %v502_v1, %v404_v52  ;;  %v2244_v8 = vld [vmem:[#allocation2 + $0x7a] sm:$0xff]  ;;  %v796_v47 = vmul.f32 %v1932_v21, %v2233_v58 }
  0x54   : > { %3204 = vst [vmem:[#allocation7_spill] sm:$0xff] %v2220_v53  ;;  %v503_v62 = vmul.f32 %v1891_v3, %v2226_v37  ;;  %v2246_v9 = vld [vmem:[#allocation2 + $0x80] sm:$0xff]  ;;  %v2251_v60 = vld [vmem:[#allocation2 + $0x90] sm:$0xff]  ;;  %v1215_v33 = vadd.f32 %v1183_v43, %v1117_v5 }
  0x55   : > { %346 = vst.msk [vmem:[#allocation2 + $0xd9] sm:$0xff] %vm273_vm1, %v257_v13  ;;  %v2253_v13 = vld [vmem:[#allocation2 + $0x91] sm:$0xff]  ;;  %v2259_v18 = vld [vmem:[#allocation2 + $0x81] sm:$0xff]  ;;  %v632_v35 = vadd.f32 %v600_v55, %v534_v6  ;;  %v1118_v52 = vadd.f32 %v1086_v31, %v1020_v59  ;;  %v890_v55 = vmul.f32 %v1941_v23, %v2193_v36  ;;  %v993_v31 = vmul.f32 %v1960_v30, %v2251_v60 }
  0x56   : > { %3205 = vst [vmem:[#allocation8_spill] sm:$0xff] %v2231_v57  ;;  %v535_v45 = vadd.f32 %v503_v62, %v405_v61  ;;  %v2266_v51 = vld [vmem:[#allocation2 + $0x92] sm:$0xff]  ;;  %v2268_v1 = vld [vmem:[#allocation2 + $0x82] sm:$0xff]  ;;  %v894_v61 = vmul.f32 %v1941_v23, %v2244_v8  ;;  %1763 = vmatmul.msk.f32.gmra.mxu0 %vm273_vm1, %v1215_v33  ;;  %v1091_v59 = vmul.f32 %v1973_v34, %v2253_v13  ;;  %v2301_v33 = vld [vmem:[#allocation2 + $0x9a] sm:$0xff] }
  0x57   : > { %3206 = vst [vmem:[#allocation9_spill] sm:$0xff] %v2233_v58  ;;  %v2275_v50 = vld [vmem:[#allocation2 + $0xc0] sm:$0xff]  ;;  %v797_v5 = vmul.f32 %v1932_v21, %v2259_v18  ;;  %v2291_v6 = vld [vmem:[#allocation2 + $0x98] sm:$0xff]  ;;  %v1189_v10 = vmul.f32 %v1989_v42, %v2266_v51 }
  0x58   : > { %347 = vst.msk [vmem:[#allocation2 + $0xe1] sm:$0xff] %vm273_vm1, %v258_v14  ;;  %v1184_v14 = vmul.f32 %v1989_v42, %v2210_v48  ;;  %v633_v62 = vadd.f32 %v601_v15, %v535_v45  ;;  %v2277_v43 = vld [vmem:[#allocation2 + $0xc1] sm:$0xff]  ;;  %v2293_v45 = vld [vmem:[#allocation2 + $0x99] sm:$0xff]  ;;  %v994_v16 = vmul.f32 %v1960_v30, %v2291_v6 }
  0x59   : > { %3207 = vst [vmem:[#allocation10_spill] sm:$0xff] %v2244_v8  ;;  %v510_v36 = vmul.f32 %v1891_v3, %v2277_v43 }
  0x5a   : > { %348 = vst.msk [vmem:[#allocation2 + $0xf1] sm:$0xff] %vm273_vm1, %v259_v19  ;;  %v792_v19 = vmul.f32 %v1932_v21, %v2181_v27  ;;  %v2295_v15 = vld [vmem:[#allocation2 + $0xc2] sm:$0xff]  ;;  %v1216_v29 = vadd.f32 %v1184_v14, %v1118_v52  ;;  %v3216_v27 = vmax.f32 %v2157_v11, 0.0  ;;  %v3218_v52 = vmax.f32 %v2160_v12, 0.0 }
  0x5b   : > { %3208 = vst [vmem:[#allocation11_spill] sm:$0xff] %v2259_v18  ;;  %v1190_v11 = vmul.f32 %v1989_v42, %v2301_v33 }
  0x5c   : > { %349 = vst.msk [vmem:[#allocation2 + $0xf9] sm:$0xff] %vm273_vm1, %v260_v22  ;;  %v699_v22 = vmul.f32 %v1927_v20, %v2246_v9  ;;  %v2305_v41 = vld [vmem:[#allocation2 + $0xd8] sm:$0xff] }
  0x5d   : > { %3209 = vst [vmem:[#allocation12_spill] sm:$0xff] %v2266_v51 }
  0x5e   : > { %3210 = vst [vmem:[#allocation13_spill] sm:$0xff] %v2268_v1  ;;  %1764 = vmatmul.msk.f32.gmra.mxu0 %vm273_vm1, %v1216_v29  ;;  %v2368_v29 = vld [vmem:[#allocation2 + $0xc9] sm:$0xff] }
  0x5f   : > { %342 = vst.msk [vmem:[#allocation2 + $0xa9] sm:$0xff] %vm273_vm1, %v253_v24  ;;  %v730_v24 = vadd.f32 %v698_v7, %v632_v35  ;;  %v895_v7 = vmul.f32 %v1941_v23, %v2268_v1  ;;  %v412_v35 = vmul.f32 %v1883_v2, %v2275_v50  ;;  %v2323_v14 = vld [vmem:[#allocation2 + $0xda] sm:$0xff] }
  0x60   : > { %3211 = vst [vmem:[#allocation14_spill] sm:$0xff] %v2275_v50 }
  0x61   : > { %3212 = vst [vmem:[#allocation15_spill] sm:$0xff] %v2277_v43  ;;  %v828_v32 = vadd.f32 %v796_v47, %v730_v24  ;;  %v726_v47 = vadd.f32 %v694_v56, %v2184_v0  ;;  %v2338_v56 = vld [vmem:[#allocation2 + $0xf0] sm:$0xff] }
  0x62   : > { %343 = vst.msk [vmem:[#allocation2 + $0xb1] sm:$0xff] %vm273_vm1, %v254_v28  ;;  %v731_v28 = vadd.f32 %v699_v22, %v633_v62  ;;  %v608_v62 = vmul.f32 %v1905_v4, %v2295_v15  ;;  %v2314_v22 = vld [vmem:[#allocation2 + $0xd9] sm:$0xff] }
  0x63   : > { %3213 = vst [vmem:[#allocation16_spill] sm:$0xff] %v2295_v15  ;;  %v926_v24 = vadd.f32 %v894_v61, %v828_v32  ;;  %v804_v0 = vmul.f32 %v1932_v21, %v2314_v22  ;;  %v824_v12 = vadd.f32 %v792_v19, %v726_v47  ;;  %v989_v32 = vmul.f32 %v1960_v30, %v2204_v44 }
  0x64   : > { %3214 = vst [vmem:[#allocation17_spill] sm:$0xff] %v2305_v41  ;;  %v829_v50 = vadd.f32 %v797_v5, %v731_v28  ;;  %v706_v5 = vmul.f32 %v1927_v20, %v2305_v41  ;;  %v3219_v28 = vmax.f32 %v2170_v17, 0.0  ;;  %v3220_v61 = vmax.f32 %v2177_v25, 0.0 }
  0x65   : > { %350 = vst.msk [vmem:[#allocation2 + $0x109] sm:$0xff] %vm273_vm1, %v261_v40  ;;  %v1092_v40 = vmul.f32 %v1973_v34, %v2293_v45  ;;  %v902_v17 = vmul.f32 %v1941_v23, %v2323_v14  ;;  %v406_v19 = vmul.f32 %v1883_v2, %v2231_v57  ;;  %v504_v25 = vmul.f32 %v1891_v3, %v2233_v58  ;;  %v2380_v58 = vld [vmem:[#allocation2 + $0xe0] sm:$0xff] }
  0x66   : > { %3215 = vst [vmem:[#allocation18_spill] sm:$0xff] %v2314_v22  ;;  %v927_v15 = vadd.f32 %v895_v7, %v829_v50  ;;  %v1087_v50 = vmul.f32 %v1973_v34, %v2206_v46  ;;  %v2372_v43 = vld [vmem:[#allocation2 + $0xa8] sm:$0xff] }
  0x67   : > { %352 = vst.msk [vmem:[#allocation2 + $0x121] sm:$0xff] %vm273_vm1, %v3216_v27  ;;  %v542_v27 = vadd.f32 %v510_v36, %v412_v35  ;;  %v1025_v36 = vadd.f32 %v993_v31, %v926_v24  ;;  %v2358_v24 = vld [vmem:[#allocation2 + $0xf2] sm:$0xff] }
  0x68   : > { %3217 = vst [vmem:[#allocation19_spill] sm:$0xff] %v2323_v14  ;;  %v1026_v7 = vadd.f32 %v994_v16, %v927_v15  ;;  %v602_v15 = vmul.f32 %v1905_v4, %v2244_v8  ;;  %v798_v8 = vmul.f32 %v1932_v21, %v2253_v13 }
  0x69   : > { %353 = vst.msk [vmem:[#allocation2 + $0x129] sm:$0xff] %vm273_vm1, %v3218_v52  ;;  %v640_v35 = vadd.f32 %v608_v62, %v542_v27  ;;  %v2349_v52 = vld [vmem:[#allocation2 + $0xf1] sm:$0xff]  ;;  %v1123_v47 = vadd.f32 %v1091_v59, %v1025_v36  ;;  %v1001_v62 = vmul.f32 %v1960_v30, %v2338_v56  ;;  %v536_v27 = vadd.f32 %v504_v25, %v406_v19  ;;  %v2366_v59 = vld [vmem:[#allocation2 + $0xc8] sm:$0xff] }
  0x6a   : > { %354 = vst.msk [vmem:[#allocation2 + $0x139] sm:$0xff] %vm273_vm1, %v3219_v28  ;;  %v922_v28 = vadd.f32 %v890_v55, %v824_v12  ;;  %v1185_v55 = vmul.f32 %v1989_v42, %v2220_v53  ;;  %v700_v12 = vmul.f32 %v1927_v20, %v2251_v60  ;;  %v707_v53 = vmul.f32 %v1927_v20, %v2380_v58 }
  0x6b   : > { %355 = vst.msk [vmem:[#allocation2 + $0x141] sm:$0xff] %vm273_vm1, %v3220_v61  ;;  %v738_v31 = vadd.f32 %v706_v5, %v640_v35  ;;  %v1221_v5 = vadd.f32 %v1189_v10, %v1123_v47  ;;  %v1124_v61 = vadd.f32 %v1092_v40, %v1026_v7  ;;  %v1099_v35 = vmul.f32 %v1973_v34, %v2349_v52  ;;  %v2387_v7 = vld [vmem:[#allocation2 + $0xaa] sm:$0xff] }
  0x6c   : > { %v1021_v16 = vadd.f32 %v989_v32, %v922_v28  ;;  %3221 = vst [vmem:[#allocation20_spill] sm:$0xff] %v2366_v59  ;;  %v2374_v32 = vld [vmem:[#allocation2 + $0xca] sm:$0xff]  ;;  %v1197_v28 = vmul.f32 %v1989_v42, %v2358_v24  ;;  %v634_v25 = vadd.f32 %v602_v15, %v536_v27  ;;  %v896_v40 = vmul.f32 %v1941_v23, %v2266_v51  ;;  %v2405_v51 = vld [vmem:[#allocation2 + $0xf9] sm:$0xff] }
  0x6d   : > { %3222 = vst [vmem:[#allocation21_spill] sm:$0xff] %v2368_v29  ;;  %v836_v36 = vadd.f32 %v804_v0, %v738_v31  ;;  %1769 = vmatmul.msk.f32.vlgmr.msra.gmra.mxu1 %vm273_vm1, %v1221_v5  ;;  %v2385_v0 = vld [vmem:[#allocation2 + $0xa9] sm:$0xff]  ;;  %v413_v47 = vmul.f32 %v1883_v2, %v2366_v59  ;;  %v2393_v31 = vld [vmem:[#allocation2 + $0xe1] sm:$0xff]  ;;  %v609_v27 = vmul.f32 %v1905_v4, %v2374_v32 }
  0x6e   : > { %3223 = vst [vmem:[#allocation22_spill] sm:$0xff] %v2374_v32  ;;  %v1119_v19 = vadd.f32 %v1087_v50, %v1021_v16  ;;  %v511_v50 = vmul.f32 %v1891_v3, %v2368_v29  ;;  %v732_v16 = vadd.f32 %v700_v12, %v634_v25  ;;  %v1222_v5 = vadd.f32 %v1190_v11, %v1124_v61  ;;  %v2401_v59 = vld [vmem:[#allocation2 + $0xe2] sm:$0xff]  ;;  %v2403_v29 = vld [vmem:[#allocation2 + $0xf8] sm:$0xff] }
  0x6f   : > { %3224 = vst [vmem:[#allocation23_spill] sm:$0xff] %v2380_v58  ;;  %v934_v10 = vadd.f32 %v902_v17, %v836_v36  ;;  %v995_v17 = vmul.f32 %v1960_v30, %v2372_v43  ;;  %v1093_v12 = vmul.f32 %v1973_v34, %v2385_v0  ;;  %v805_v11 = vmul.f32 %v1932_v21, %v2393_v31 }
  0x70   : > { %3225 = vst [vmem:[#allocation24_spill] sm:$0xff] %v2393_v31  ;;  %v1217_v15 = vadd.f32 %v1185_v55, %v1119_v19  ;;  %v543_v57 = vadd.f32 %v511_v50, %v413_v47  ;;  %v830_v55 = vadd.f32 %v798_v8, %v732_v16  ;;  %v1191_v19 = vmul.f32 %v1989_v42, %v2387_v7 }
  0x71   : > { %v1033_v36 = vadd.f32 %v1001_v62, %v934_v10  ;;  %3226 = vst [vmem:[#allocation25_spill] sm:$0xff] %v2401_v59  ;;  %v695_v25 = vmul.f32 %v1927_v20, %v2195_v38  ;;  %v793_v10 = vmul.f32 %v1932_v21, %v2197_v39  ;;  %v903_v47 = vmul.f32 %v1941_v23, %v2401_v59 }
  0x72   : > { %3227 = vst [vmem:[#allocation26_spill] sm:$0xff] %v2405_v51  ;;  %1765 = vmatmul.msk.f32.gmra.mxu0 %vm273_vm1, %v1217_v15  ;;  %v641_v61 = vadd.f32 %v609_v27, %v543_v57  ;;  %v928_v8 = vadd.f32 %v896_v40, %v830_v55  ;;  %v1002_v50 = vmul.f32 %v1960_v30, %v2403_v29  ;;  %v2425_v57 = vld [vmem:[#allocation2 + $0xfa] sm:$0xff] }
  0x73   : > { %v1131_v62 = vadd.f32 %v1099_v35, %v1033_v36  ;;  %v1100_v16 = vmul.f32 %v1973_v34, %v2405_v51  ;;  %v230_v35 = vld [vmem:[%s1898_s26 + $0xa8] sm:$0xff]  ;;  %v727_v27 = vadd.f32 %v695_v25, %v2213_v49  ;;  %v891_v32 = vmul.f32 %v1941_v23, %v2210_v48 }
  0x74   : > { %v739_v15 = vadd.f32 %v707_v53, %v641_v61  ;;  %v1027_v40 = vadd.f32 %v995_v17, %v928_v8  ;;  %v407_v55 = vmul.f32 %v1883_v2, %v2246_v9  ;;  %v505_v39 = vmul.f32 %v1891_v3, %v2259_v18 }
  0x75   : > { %v1229_v36 = vadd.f32 %v1197_v28, %v1131_v62  ;;  %v603_v38 = vmul.f32 %v1905_v4, %v2268_v1  ;;  %1770 = vmatmul.msk.f32.gmra.mxu1 %vm273_vm1, %v1222_v5  ;;  %v825_v28 = vadd.f32 %v793_v10, %v727_v27  ;;  %v990_v49 = vmul.f32 %v1960_v30, %v2224_v54 }
  0x76   : > { %v837_v53 = vadd.f32 %v805_v11, %v739_v15  ;;  %v262_v62 = vmax.f32 %v230_v35, 0.0  ;;  %v1125_v17 = vadd.f32 %v1093_v12, %v1027_v40  ;;  %v1198_v61 = vmul.f32 %v1989_v42, %v2425_v57  ;;  %v2450_v12 = vld [vmem:[#allocation2 + $0xb1] sm:$0xff] }
  0x77   : > { %1777 = vmatmul.msk.f32.vlgmr.msra.gmra.mxu2 %vm273_vm1, %v1229_v36  ;;  %v537_v25 = vadd.f32 %v505_v39, %v407_v55  ;;  %v701_v8 = vmul.f32 %v1927_v20, %v2291_v6  ;;  %v923_v5 = vadd.f32 %v891_v32, %v825_v28  ;;  %v1088_v11 = vmul.f32 %v1973_v34, %v2226_v37  ;;  %v2448_v36 = vld [vmem:[#allocation2 + $0xb0] sm:$0xff]  ;;  %v236_v28 = vld [vmem:[%s1898_s26 + $0xd8] sm:$0xff] }
  0x78   : > { %v935_v1 = vadd.f32 %v903_v47, %v837_v53  ;;  %v1186_v10 = vmul.f32 %v1989_v42, %v2239_v63  ;;  %3228 = vst [vmem:[#allocation27_spill] sm:$0xff] %v2448_v36  ;;  %v1223_v39 = vadd.f32 %v1191_v19, %v1125_v17  ;;  %v799_v15 = vmul.f32 %v1932_v21, %v2293_v45  ;;  %v235_v53 = vld [vmem:[%s1898_s26 + $0xd0] sm:$0xff] }
  0x79   : > { %3229 = vst [vmem:[#allocation28_spill] sm:$0xff] %v2450_v12  ;;  %v635_v35 = vadd.f32 %v603_v38, %v537_v25  ;;  %v414_v32 = vmul.f32 %v1883_v2, %v2305_v41  ;;  %v1022_v27 = vadd.f32 %v990_v49, %v923_v5  ;;  %v512_v40 = vmul.f32 %v1891_v3, %v2314_v22  ;;  %v2471_v17 = vld [vmem:[#allocation2 + $0xb2] sm:$0xff]  ;;  %v2481_v41 = vld [vmem:[#allocation2 + $0x108] sm:$0xff] }
  0x7a   : > { %351 = vst.msk [vmem:[#allocation2 + $0x111] sm:$0xff] %vm273_vm1, %v262_v62  ;;  %v1034_v47 = vadd.f32 %v1002_v50, %v935_v1  ;;  %v610_v55 = vmul.f32 %v1905_v4, %v2323_v14  ;;  %v897_v38 = vmul.f32 %v1941_v23, %v2301_v33  ;;  %v996_v19 = vmul.f32 %v1960_v30, %v2448_v36  ;;  %v2469_v1 = vld [vmem:[#allocation2 + $0x120] sm:$0xff] }
  0x7b   : > { %v733_v18 = vadd.f32 %v701_v8, %v635_v35  ;;  %v1094_v62 = vmul.f32 %v1973_v34, %v2450_v12  ;;  %3230 = vst [vmem:[#allocation29_spill] sm:$0xff] %v2469_v1  ;;  %v1120_v49 = vadd.f32 %v1088_v11, %v1022_v27  ;;  %v544_v25 = vadd.f32 %v512_v40, %v414_v32  ;;  %v2475_v8 = vld [vmem:[#allocation2 + $0x121] sm:$0xff]  ;;  %v2486_v27 = vld [vmem:[#allocation2 + $0x138] sm:$0xff] }
  0x7c   : > { %v1132_v50 = vadd.f32 %v1100_v16, %v1034_v47  ;;  %3231 = vst [vmem:[#allocation30_spill] sm:$0xff] %v2471_v17  ;;  %v708_v5 = vmul.f32 %v1927_v20, %v2338_v56  ;;  %v2477_v35 = vld [vmem:[#allocation2 + $0x122] sm:$0xff]  ;;  %v806_v22 = vmul.f32 %v1932_v21, %v2349_v52  ;;  %v267_v12 = vmax.f32 %v235_v53, 0.0 }
  0x7d   : > { %3232 = vst [vmem:[#allocation31_spill] sm:$0xff] %v2475_v8  ;;  %v831_v14 = vadd.f32 %v799_v15, %v733_v18  ;;  %v268_v36 = vmax.f32 %v236_v28, 0.0  ;;  %1771 = vmatmul.msk.f32.gmra.mxu1 %vm273_vm1, %v1223_v39  ;;  %v1218_v11 = vadd.f32 %v1186_v10, %v1120_v49  ;;  %v642_v32 = vadd.f32 %v610_v55, %v544_v25  ;;  %v2490_v15 = vld [vmem:[#allocation2 + $0x109] sm:$0xff]  ;;  %v2510_v49 = vld [vmem:[#allocation2 + $0x13a] sm:$0xff] }
  0x7e   : > { %3233 = vst [vmem:[#allocation32_spill] sm:$0xff] %v2477_v35  ;;  %v1230_v16 = vadd.f32 %v1198_v61, %v1132_v50  ;;  %v420_v47 = vmul.f32 %v1883_v2, %v2469_v1  ;;  %v1192_v18 = vmul.f32 %v1989_v42, %v2471_v17  ;;  %v518_v53 = vmul.f32 %v1891_v3, %v2475_v8 }
  0x7f   : > { %3234 = vst [vmem:[#allocation33_spill] sm:$0xff] %v2481_v41  ;;  %v929_v40 = vadd.f32 %v897_v38, %v831_v14  ;;  %v616_v61 = vmul.f32 %v1905_v4, %v2477_v35  ;;  %1766 = vmatmul.msk.f32.gmra.mxu0 %vm273_vm1, %v1218_v11  ;;  %v740_v10 = vadd.f32 %v708_v5, %v642_v32  ;;  %v3235_v11 = vld [vmem:[#allocation3_spill] sm:$0xff] }
  0x80   : > { %356 = vst.msk [vmem:[#allocation2 + $0x151] sm:$0xff] %vm273_vm1, %v267_v12  ;;  %1778 = vmatmul.msk.f32.gmra.mxu2 %vm273_vm1, %v1230_v16  ;;  %v904_v14 = vmul.f32 %v1941_v23, %v2358_v24  ;;  %v1003_v39 = vmul.f32 %v1960_v30, %v2481_v41  ;;  %v2506_v12 = vld [vmem:[#allocation2 + $0x139] sm:$0xff]  ;;  %v550_v38 = vadd.f32 %v518_v53, %v420_v47 }
  0x81   : > { %v2503_v55 = vld [vmem:[#allocation2 + $0x10a] sm:$0xff]  ;;  %357 = vst.msk [vmem:[#allocation2 + $0x159] sm:$0xff] %vm273_vm1, %v268_v36  ;;  %v1028_v28 = vadd.f32 %v996_v19, %v929_v40  ;;  %v714_v50 = vmul.f32 %v1927_v20, %v2486_v27  ;;  %v402_v25 = vmul.f32 %v1883_v2, %v2179_v26  ;;  %v838_v5 = vadd.f32 %v806_v22, %v740_v10  ;;  %v3236_v36 = vld [vmem:[#allocation4_spill] sm:$0xff] }
  0x82   : > { %v1101_v16 = vmul.f32 %v1973_v34, %v2490_v15  ;;  %v500_v32 = vmul.f32 %v1891_v3, %v3235_v11  ;;  %v598_v35 = vmul.f32 %v1905_v4, %v3236_v36  ;;  %v1199_v47 = vmul.f32 %v1989_v42, %v2503_v55 }
  0x83   : > { %v1126_v19 = vadd.f32 %v1094_v62, %v1028_v28  ;;  %v648_v40 = vadd.f32 %v616_v61, %v550_v38  ;;  %v812_v53 = vmul.f32 %v1932_v21, %v2506_v12  ;;  %v936_v8 = vadd.f32 %v904_v14, %v838_v5  ;;  %v3238_v5 = vld [vmem:[#allocation12_spill] sm:$0xff] }
  0x84   : > { %v910_v26 = vmul.f32 %v1941_v23, %v2510_v49  ;;  %v532_v22 = vadd.f32 %v500_v32, %v402_v25  ;;  %v696_v10 = vmul.f32 %v1927_v20, %v2204_v44  ;;  %v794_v62 = vmul.f32 %v1932_v21, %v2206_v46 }
  0x85   : > { %v1224_v11 = vadd.f32 %v1192_v18, %v1126_v19  ;;  %v746_v1 = vadd.f32 %v714_v50, %v648_v40  ;;  %v408_v28 = vmul.f32 %v1883_v2, %v2251_v60  ;;  %v1035_v61 = vadd.f32 %v1003_v39, %v936_v8  ;;  %v3239_v50 = vld [vmem:[#allocation7_spill] sm:$0xff]  ;;  %v3240_v8 = vld [vmem:[#allocation8_spill] sm:$0xff] }
  0x86   : > { %v630_v14 = vadd.f32 %v598_v35, %v532_v22  ;;  %v506_v25 = vmul.f32 %v1891_v3, %v2253_v13  ;;  %v604_v44 = vmul.f32 %v1905_v4, %v3238_v5  ;;  %v892_v60 = vmul.f32 %v1941_v23, %v3239_v50  ;;  %v3242_v5 = vld [vmem:[#allocation10_spill] sm:$0xff] }
  0x87   : > { %v2532_v38 = vld [vmem:[#allocation2 + $0x150] sm:$0xff]  ;;  %1772 = vmatmul.msk.f32.gmra.mxu1 %vm273_vm1, %v1224_v11  ;;  %v844_v18 = vadd.f32 %v812_v53, %v746_v1  ;;  %v991_v39 = vmul.f32 %v1960_v30, %v3240_v8  ;;  %v1133_v32 = vadd.f32 %v1101_v16, %v1035_v61  ;;  %v702_v40 = vmul.f32 %v1927_v20, %v2372_v43  ;;  %v3241_v53 = vld [vmem:[#allocation9_spill] sm:$0xff] }
  0x88   : > { %3237 = vst [vmem:[#allocation3_spill] sm:$0xff] %v2532_v38  ;;  %v2534_v36 = vld [vmem:[#allocation2 + $0x151] sm:$0xff]  ;;  %v1009_v46 = vmul.f32 %v1960_v30, %v2532_v38  ;;  %v728_v19 = vadd.f32 %v696_v10, %v630_v14  ;;  %v538_v13 = vadd.f32 %v506_v25, %v408_v28  ;;  %v1089_v11 = vmul.f32 %v1973_v34, %v3241_v53 }
  0x89   : > { %v2547_v35 = vld [vmem:[#allocation2 + $0x152] sm:$0xff]  ;;  %v942_v22 = vadd.f32 %v910_v26, %v844_v18  ;;  %v1107_v1 = vmul.f32 %v1973_v34, %v2534_v36  ;;  %v1187_v50 = vmul.f32 %v1989_v42, %v3242_v5  ;;  %v1231_v38 = vadd.f32 %v1199_v47, %v1133_v32  ;;  %v3244_v32 = vld [vmem:[#allocation14_spill] sm:$0xff] }
  0x8a   : > { %v826_v8 = vadd.f32 %v794_v62, %v728_v19  ;;  %v636_v16 = vadd.f32 %v604_v44, %v538_v13  ;;  %v800_v10 = vmul.f32 %v1932_v21, %v2385_v0  ;;  %v1205_v61 = vmul.f32 %v1989_v42, %v2547_v35  ;;  %v2570_v44 = vld [vmem:[#allocation2 + $0x128] sm:$0xff] }
  0x8b   : > { %v1041_v28 = vadd.f32 %v1009_v46, %v942_v22  ;;  %v415_v26 = vmul.f32 %v1883_v2, %v2380_v58  ;;  %v513_v14 = vmul.f32 %v1891_v3, %v2393_v31  ;;  %1779 = vmatmul.msk.f32.gmra.mxu2 %vm273_vm1, %v1231_v38  ;;  %v898_v47 = vmul.f32 %v1941_v23, %v2387_v7  ;;  %v2576_v13 = vld [vmem:[#allocation2 + $0x129] sm:$0xff] }
  0x8c   : > { %v924_v25 = vadd.f32 %v892_v60, %v826_v8  ;;  %v734_v18 = vadd.f32 %v702_v40, %v636_v16  ;;  %v611_v62 = vmul.f32 %v1905_v4, %v2401_v59  ;;  %3243 = vst [vmem:[#allocation4_spill] sm:$0xff] %v2570_v44  ;;  %v997_v19 = vmul.f32 %v1960_v30, %v3244_v32  ;;  %v2578_v38 = vld [vmem:[#allocation2 + $0x12a] sm:$0xff]  ;;  %v3248_v4 = vld [vmem:[#allocation16_spill] sm:$0xff] }
  0x8d   : > { %v1139_v46 = vadd.f32 %v1107_v1, %v1041_v28  ;;  %v545_v2 = vadd.f32 %v513_v14, %v415_v26  ;;  %v709_v3 = vmul.f32 %v1927_v20, %v2403_v29  ;;  %3245 = vst [vmem:[#allocation12_spill] sm:$0xff] %v2576_v13  ;;  %v3247_v22 = vld [vmem:[#allocation15_spill] sm:$0xff]  ;;  %v1193_v5 = vmul.f32 %v1989_v42, %v3248_v4  ;;  %v2597_v14 = vld [vmem:[#allocation2 + $0x140] sm:$0xff]  ;;  %v2628_v4 = vld [vmem:[#allocation2 + $0x158] sm:$0xff] }
  0x8e   : > { %3246 = vst [vmem:[#allocation7_spill] sm:$0xff] %v2578_v38  ;;  %v1023_v60 = vadd.f32 %v991_v39, %v924_v25  ;;  %v832_v40 = vadd.f32 %v800_v10, %v734_v18  ;;  %v1095_v53 = vmul.f32 %v1973_v34, %v3247_v22  ;;  %v2584_v1 = vld [vmem:[#allocation2 + $0x110] sm:$0xff]  ;;  %v807_v26 = vmul.f32 %v1932_v21, %v2405_v51  ;;  %v2593_v39 = vld [vmem:[%s3139_s1] ss:$0 sm:$0xff]  ;;  %v2626_v51 = vld [vmem:[#allocation2 + $0x142] sm:$0xff] }
  0x8f   : > { %v2586_v8 = vld [vmem:[#allocation2 + $0x111] sm:$0xff]  ;;  %v1237_v16 = vadd.f32 %v1205_v61, %v1139_v46  ;;  %v643_v28 = vadd.f32 %v611_v62, %v545_v2  ;;  %v421_v10 = vmul.f32 %v2593_v39, %v2570_v44  ;;  %v2604_v61 = vld [vmem:[%s3139_s1 + $0x1] ss:$0 sm:$0xff]  ;;  %v2611_v46 = vld [vmem:[%s3139_s1 + $0x2] ss:$0 sm:$0xff]  ;;  %3250 = vst [vmem:[#allocation9_spill] sm:$0xff] %v2626_v51 }
  0x90   : > { %3249 = vst [vmem:[#allocation8_spill] sm:$0xff] %v2586_v8  ;;  %v1121_v25 = vadd.f32 %v1089_v11, %v1023_v60  ;;  %v930_v18 = vadd.f32 %v898_v47, %v832_v40  ;;  %v2599_v59 = vld [vmem:[#allocation2 + $0x112] sm:$0xff]  ;;  %v519_v62 = vmul.f32 %v2604_v61, %v2576_v13  ;;  %v617_v2 = vmul.f32 %v2611_v46, %v2578_v38  ;;  %v2615_v11 = vld [vmem:[#allocation2 + $0x141] sm:$0xff] }
  0x91   : > { %1785 = vmatmul.msk.f32.vlgmr.msra.gmra.mxu3 %vm273_vm1, %v1237_v16  ;;  %v741_v47 = vadd.f32 %v709_v3, %v643_v28  ;;  %v905_v60 = vmul.f32 %v1941_v23, %v2425_v57  ;;  %v1004_v40 = vmul.f32 %v1960_v30, %v2584_v1  ;;  %v1102_v31 = vmul.f32 %v1973_v34, %v2586_v8  ;;  %v2630_v3 = vld [vmem:[#allocation2 + $0x159] sm:$0xff] }
  0x92   : > { %v1219_v58 = vadd.f32 %v1187_v50, %v1121_v25  ;;  %v1029_v13 = vadd.f32 %v997_v19, %v930_v18  ;;  %v551_v44 = vadd.f32 %v519_v62, %v421_v10  ;;  %v715_v38 = vmul.f32 %v1927_v20, %v2597_v14  ;;  %v3251_v8 = vld [vmem:[#allocation5_spill] sm:$0xff]  ;;  %v3253_v25 = vld [vmem:[#allocation6_spill] sm:$0xff] }
  0x93   : > { %v839_v16 = vadd.f32 %v807_v26, %v741_v47  ;;  %v1200_v23 = vmul.f32 %v1989_v42, %v2599_v59  ;;  %v813_v28 = vmul.f32 %v1932_v21, %v2615_v11  ;;  %v403_v50 = vmul.f32 %v2593_v39, %v3251_v8  ;;  %v2639_v10 = vld [vmem:[#allocation2 + $0x15a] sm:$0xff]  ;;  %v2648_v21 = vld [vmem:[%s3139_s1 + $0x5] ss:$0 sm:$0xff] }
  0x94   : > { %1767 = vmatmul.msk.f32.gmra.mxu0 %vm273_vm1, %v1219_v58  ;;  %v1127_v19 = vadd.f32 %v1095_v53, %v1029_v13  ;;  %v649_v20 = vadd.f32 %v617_v2, %v551_v44  ;;  %3252 = vst [vmem:[#allocation10_spill] sm:$0xff] %v2639_v10  ;;  %v501_v18 = vmul.f32 %v2604_v61, %v3253_v25  ;;  %v3255_v25 = vld [vmem:[#allocation27_spill] sm:$0xff] }
  0x95   : > { %v599_v26 = vmul.f32 %v2611_v46, %v2210_v48  ;;  %v937_v62 = vadd.f32 %v905_v60, %v839_v16  ;;  %v911_v8 = vmul.f32 %v2648_v21, %v2626_v51  ;;  %v1010_v58 = vmul.f32 %v1960_v30, %v2628_v4  ;;  %v2659_v48 = vld [vmem:[%s3139_s1 + $0x3] ss:$0 sm:$0xff]  ;;  %v2668_v30 = vld [vmem:[%s3139_s1 + $0x4] ss:$0 sm:$0xff] }
  0x96   : > { %v1108_v44 = vmul.f32 %v1973_v34, %v2630_v3  ;;  %v1225_v13 = vadd.f32 %v1193_v5, %v1127_v19  ;;  %v747_v53 = vadd.f32 %v715_v38, %v649_v20  ;;  %v533_v2 = vadd.f32 %v501_v18, %v403_v50 }
  0x97   : > { %v697_v47 = vmul.f32 %v2659_v48, %v2224_v54  ;;  %v1036_v60 = vadd.f32 %v1004_v40, %v937_v62  ;;  %v1206_v16 = vmul.f32 %v1989_v42, %v2639_v10  ;;  %v795_v34 = vmul.f32 %v2668_v30, %v2226_v37  ;;  %v2684_v37 = vld [vmem:[%s3139_s1 + $0x6] ss:$0 sm:$0xff] }
  0x98   : > { %v409_v38 = vmul.f32 %v2593_v39, %v2291_v6  ;;  %1773 = vmatmul.msk.f32.gmra.mxu1 %vm273_vm1, %v1225_v13  ;;  %v845_v5 = vadd.f32 %v813_v28, %v747_v53  ;;  %v631_v50 = vadd.f32 %v599_v26, %v533_v2  ;;  %v507_v54 = vmul.f32 %v2604_v61, %v2293_v45  ;;  %v2691_v45 = vld [vmem:[%s3139_s1 + $0x7] ss:$0 sm:$0xff]  ;;  %v3254_v28 = vld [vmem:[#allocation11_spill] sm:$0xff]  ;;  %v3257_v53 = vld [vmem:[#allocation28_spill] sm:$0xff] }
  0x99   : > { %v605_v42 = vmul.f32 %v2611_v46, %v2301_v33  ;;  %v1134_v40 = vadd.f32 %v1102_v31, %v1036_v60  ;;  %v893_v19 = vmul.f32 %v2648_v21, %v2239_v63  ;;  %v992_v6 = vmul.f32 %v2684_v37, %v2246_v9  ;;  %v2700_v9 = vld [vmem:[%s3139_s1 + $0x8] ss:$0 sm:$0xff]  ;;  %v3256_v62 = vld [vmem:[#allocation13_spill] sm:$0xff] }
  0x9a   : > { %v1090_v33 = vmul.f32 %v2691_v45, %v3254_v28  ;;  %v943_v31 = vadd.f32 %v911_v8, %v845_v5  ;;  %v729_v20 = vadd.f32 %v697_v47, %v631_v50  ;;  %v539_v63 = vadd.f32 %v507_v54, %v409_v38  ;;  %v237_v5 = vld [vmem:[%s1898_s26 + $0xe0] sm:$0xff]  ;;  %v3258_v54 = vld [vmem:[#allocation20_spill] sm:$0xff] }
  0x9b   : > { %v703_v18 = vmul.f32 %v2659_v48, %v3255_v25  ;;  %v1232_v26 = vadd.f32 %v1200_v23, %v1134_v40  ;;  %v1188_v13 = vmul.f32 %v2700_v9, %v3256_v62  ;;  %v801_v2 = vmul.f32 %v2668_v30, %v3257_v53 }
  0x9c   : > { %v416_v8 = vmul.f32 %v2593_v39, %v2338_v56  ;;  %v1042_v47 = vadd.f32 %v1010_v58, %v943_v31  ;;  %v827_v60 = vadd.f32 %v795_v34, %v729_v20  ;;  %v637_v38 = vadd.f32 %v605_v42, %v539_v63  ;;  %v3259_v20 = vld [vmem:[#allocation21_spill] sm:$0xff] }
  0x9d   : > { %v514_v23 = vmul.f32 %v2604_v61, %v2349_v52  ;;  %1780 = vmatmul.msk.f32.gmra.mxu2 %vm273_vm1, %v1232_v26  ;;  %v899_v50 = vmul.f32 %v2648_v21, %v2471_v17  ;;  %v998_v40 = vmul.f32 %v2684_v37, %v3258_v54  ;;  %v612_v28 = vmul.f32 %v2611_v46, %v2358_v24  ;;  %v238_v52 = vld [vmem:[%s1898_s26 + $0xe8] sm:$0xff] }
  0x9e   : > { %v710_v56 = vmul.f32 %v2659_v48, %v2481_v41  ;;  %v1140_v58 = vadd.f32 %v1108_v44, %v1042_v47  ;;  %v925_v34 = vadd.f32 %v893_v19, %v827_v60  ;;  %v735_v42 = vadd.f32 %v703_v18, %v637_v38  ;;  %v3260_v26 = vld [vmem:[#allocation22_spill] sm:$0xff]  ;;  %v3262_v38 = vld [vmem:[#allocation3_spill] sm:$0xff] }
  0x9f   : > { %v546_v31 = vadd.f32 %v514_v23, %v416_v8  ;;  %v1096_v63 = vmul.f32 %v2691_v45, %v3259_v20  ;;  %v1194_v62 = vmul.f32 %v2700_v9, %v3260_v26  ;;  %v808_v54 = vmul.f32 %v2668_v30, %v2490_v15 }
  0xa0   : > { %v269_v17 = vmax.f32 %v237_v5, 0.0  ;;  %v1238_v10 = vadd.f32 %v1206_v16, %v1140_v58  ;;  %v1024_v24 = vadd.f32 %v992_v6, %v925_v34  ;;  %v833_v53 = vadd.f32 %v801_v2, %v735_v42  ;;  %v3261_v2 = vld [vmem:[#allocation29_spill] sm:$0xff] }
  0xa1   : > { %v644_v25 = vadd.f32 %v612_v28, %v546_v31  ;;  %v270_v41 = vmax.f32 %v238_v52, 0.0  ;;  %v422_v44 = vmul.f32 %v2593_v39, %v2486_v27  ;;  %v520_v19 = vmul.f32 %v2604_v61, %v2506_v12 }
  0xa2   : > { %358 = vst.msk [vmem:[#allocation2 + $0x169] sm:$0xff] %vm273_vm1, %v269_v17  ;;  %v618_v18 = vmul.f32 %v2611_v46, %v2510_v49  ;;  %1786 = vmatmul.msk.f32.gmra.mxu3 %vm273_vm1, %v1238_v10  ;;  %v1122_v8 = vadd.f32 %v1090_v33, %v1024_v24  ;;  %v931_v47 = vadd.f32 %v899_v50, %v833_v53  ;;  %v3263_v53 = vld [vmem:[#allocation31_spill] sm:$0xff] }
  0xa3   : > { %v742_v16 = vadd.f32 %v710_v56, %v644_v25  ;;  %v906_v6 = vmul.f32 %v2648_v21, %v2503_v55  ;;  %v1005_v17 = vmul.f32 %v2684_v37, %v3261_v2  ;;  %359 = vst.msk [vmem:[#allocation2 + $0x171] sm:$0xff] %vm273_vm1, %v270_v41  ;;  %v552_v60 = vadd.f32 %v520_v19, %v422_v44 }
  0xa4   : > { %v716_v23 = vmul.f32 %v2659_v48, %v3262_v38  ;;  %v410_v5 = vmul.f32 %v2593_v39, %v2372_v43  ;;  %v1220_v28 = vadd.f32 %v1188_v13, %v1122_v8  ;;  %v1030_v10 = vadd.f32 %v998_v40, %v931_v47  ;;  %v3264_v40 = vld [vmem:[#allocation32_spill] sm:$0xff] }
  0xa5   : > { %v840_v33 = vadd.f32 %v808_v54, %v742_v16  ;;  %v508_v25 = vmul.f32 %v2604_v61, %v2385_v0  ;;  %v1103_v50 = vmul.f32 %v2691_v45, %v3263_v53  ;;  %v650_v56 = vadd.f32 %v618_v18, %v552_v60  ;;  %v3265_v47 = vld [vmem:[#allocation16_spill] sm:$0xff] }
  0xa6   : > { %v814_v41 = vmul.f32 %v2668_v30, %v2534_v36  ;;  %v606_v58 = vmul.f32 %v2611_v46, %v2387_v7  ;;  %1768 = vmatmul.msk.f32.gmra.mxu0 %vm273_vm1, %v1220_v28  ;;  %v1128_v34 = vadd.f32 %v1096_v63, %v1030_v10  ;;  %v704_v54 = vmul.f32 %v2659_v48, %v3244_v32 }
  0xa7   : > { %v938_v43 = vadd.f32 %v906_v6, %v840_v33  ;;  %v540_v13 = vadd.f32 %v508_v25, %v410_v5  ;;  %v1201_v0 = vmul.f32 %v2700_v9, %v3264_v40  ;;  %v748_v42 = vadd.f32 %v716_v23, %v650_v56  ;;  %v3266_v6 = vld [vmem:[#allocation26_spill] sm:$0xff]  ;;  %v3267_v23 = vld [vmem:[#allocation17_spill] sm:$0xff] }
  0xa8   : > { %v912_v31 = vmul.f32 %v2648_v21, %v2547_v35  ;;  %v802_v52 = vmul.f32 %v2668_v30, %v3247_v22  ;;  %v1226_v24 = vadd.f32 %v1194_v62, %v1128_v34  ;;  %v417_v32 = vmul.f32 %v2593_v39, %v2403_v29  ;;  %v3269_v34 = vld [vmem:[#allocation19_spill] sm:$0xff] }
  0xa9   : > { %v1037_v7 = vadd.f32 %v1005_v17, %v938_v43  ;;  %v2761_v44 = vld [vmem:[#allocation2 + $0x168] sm:$0xff]  ;;  %v638_v19 = vadd.f32 %v606_v58, %v540_v13  ;;  %v846_v18 = vadd.f32 %v814_v41, %v748_v42  ;;  %v900_v16 = vmul.f32 %v2648_v21, %v3265_v47  ;;  %v3270_v42 = vld [vmem:[#allocation8_spill] sm:$0xff] }
  0xaa   : > { %v2763_v63 = vld [vmem:[#allocation2 + $0x169] sm:$0xff]  ;;  %v1011_v8 = vmul.f32 %v2684_v37, %v2761_v44  ;;  %v515_v22 = vmul.f32 %v2604_v61, %v3266_v6  ;;  %1774 = vmatmul.msk.f32.gmra.mxu1 %vm273_vm1, %v1226_v24  ;;  %v999_v5 = vmul.f32 %v2684_v37, %v3267_v23  ;;  %v613_v29 = vmul.f32 %v2611_v46, %v2425_v57 }
  0xab   : > { %v1135_v62 = vadd.f32 %v1103_v50, %v1037_v7  ;;  %v2774_v17 = vld [vmem:[#allocation2 + $0x16a] sm:$0xff]  ;;  %v736_v60 = vadd.f32 %v704_v54, %v638_v19  ;;  %v944_v28 = vadd.f32 %v912_v31, %v846_v18  ;;  %v1109_v10 = vmul.f32 %v2691_v45, %v2763_v63 }
  0xac   : > { %v547_v33 = vadd.f32 %v515_v22, %v417_v32  ;;  %v711_v25 = vmul.f32 %v2659_v48, %v2584_v1  ;;  %v3268_v50 = vld [vmem:[#allocation18_spill] sm:$0xff]  ;;  %v1195_v43 = vmul.f32 %v2700_v9, %v3269_v34  ;;  %v1207_v57 = vmul.f32 %v2700_v9, %v2774_v17  ;;  %v3272_v22 = vld [vmem:[#allocation12_spill] sm:$0xff]  ;;  %v2807_v23 = vld [vmem:[#allocation2 + $0x170] sm:$0xff] }
  0xad   : > { %v1233_v56 = vadd.f32 %v1201_v0, %v1135_v62  ;;  %v834_v41 = vadd.f32 %v802_v52, %v736_v60  ;;  %v1097_v58 = vmul.f32 %v2691_v45, %v3268_v50  ;;  %v1043_v13 = vadd.f32 %v1011_v8, %v944_v28  ;;  %v3271_v8 = vld [vmem:[#allocation4_spill] sm:$0xff]  ;;  %v3275_v34 = vld [vmem:[#allocation27_spill] sm:$0xff] }
  0xae   : > { %v645_v54 = vadd.f32 %v613_v29, %v547_v33  ;;  %v809_v31 = vmul.f32 %v2668_v30, %v3270_v42  ;;  %v423_v0 = vmul.f32 %v2593_v39, %v2597_v14  ;;  %v521_v52 = vmul.f32 %v2604_v61, %v2615_v11  ;;  %v2815_v50 = vld [vmem:[#allocation2 + $0x172] sm:$0xff] }
  0xaf   : > { %1781 = vmatmul.msk.f32.gmra.mxu2 %vm273_vm1, %v1233_v56  ;;  %v932_v24 = vadd.f32 %v900_v16, %v834_v41  ;;  %v619_v7 = vmul.f32 %v2611_v46, %v2626_v51  ;;  %v1141_v19 = vadd.f32 %v1109_v10, %v1043_v13  ;;  %v907_v18 = vmul.f32 %v2648_v21, %v2599_v59  ;;  %v3273_v10 = vld [vmem:[#allocation7_spill] sm:$0xff] }
  0xb0   : > { %v743_v32 = vadd.f32 %v711_v25, %v645_v54  ;;  %v1006_v47 = vmul.f32 %v2684_v37, %v3271_v8  ;;  %v1104_v16 = vmul.f32 %v2691_v45, %v3272_v22  ;;  %v553_v62 = vadd.f32 %v521_v52, %v423_v0  ;;  %3274 = vst [vmem:[#allocation14_spill] sm:$0xff] %v2815_v50  ;;  %v3276_v54 = vld [vmem:[#allocation28_spill] sm:$0xff]  ;;  %v3278_v52 = vld [vmem:[#allocation30_spill] sm:$0xff] }
  0xb1   : > { %v1031_v6 = vadd.f32 %v999_v5, %v932_v24  ;;  %v717_v60 = vmul.f32 %v2659_v48, %v2628_v4  ;;  %v1239_v29 = vadd.f32 %v1207_v57, %v1141_v19  ;;  %v1202_v33 = vmul.f32 %v2700_v9, %v3273_v10  ;;  %v2813_v5 = vld [vmem:[#allocation2 + $0x171] sm:$0xff] }
  0xb2   : > { %v841_v28 = vadd.f32 %v809_v31, %v743_v32  ;;  %v815_v25 = vmul.f32 %v2668_v30, %v2630_v3  ;;  %v651_v41 = vadd.f32 %v619_v7, %v553_v62  ;;  %v411_v13 = vmul.f32 %v2593_v39, %v3275_v34  ;;  %v3277_v31 = vld [vmem:[#allocation10_spill] sm:$0xff]  ;;  %v3279_v62 = vld [vmem:[#allocation20_spill] sm:$0xff] }
  0xb3   : > { %v1129_v56 = vadd.f32 %v1097_v58, %v1031_v6  ;;  %v509_v24 = vmul.f32 %v2604_v61, %v3276_v54  ;;  %1787 = vmatmul.msk.f32.gmra.mxu3 %vm273_vm1, %v1239_v29  ;;  %v913_v0 = vmul.f32 %v2648_v21, %v3277_v31  ;;  %v1012_v58 = vmul.f32 %v2684_v37, %v2807_v23 }
  0xb4   : > { %v939_v57 = vadd.f32 %v907_v18, %v841_v28  ;;  %v607_v7 = vmul.f32 %v2611_v46, %v3278_v52  ;;  %v749_v32 = vadd.f32 %v717_v60, %v651_v41  ;;  %v705_v34 = vmul.f32 %v2659_v48, %v3279_v62  ;;  %v239_v62 = vld [vmem:[%s1898_s26 + $0xf0] sm:$0xff] }
  0xb5   : > { %v1227_v19 = vadd.f32 %v1195_v43, %v1129_v56  ;;  %v541_v6 = vadd.f32 %v509_v24, %v411_v13  ;;  %v1110_v18 = vmul.f32 %v2691_v45, %v2813_v5  ;;  %v1208_v29 = vmul.f32 %v2700_v9, %v2815_v50  ;;  %v3280_v56 = vld [vmem:[#allocation33_spill] sm:$0xff] }
  0xb6   : > { %v1038_v54 = vadd.f32 %v1006_v47, %v939_v57  ;;  %v803_v28 = vmul.f32 %v2668_v30, %v3259_v20  ;;  %v847_v43 = vadd.f32 %v815_v25, %v749_v32  ;;  %v418_v41 = vmul.f32 %v2593_v39, %v3280_v56  ;;  %v3281_v57 = vld [vmem:[#allocation23_spill] sm:$0xff] }
  0xb7   : > { %1775 = vmatmul.msk.f32.gmra.mxu1 %vm273_vm1, %v1227_v19  ;;  %v639_v60 = vadd.f32 %v607_v7, %v541_v6  ;;  %v516_v47 = vmul.f32 %v2604_v61, %v2490_v15  ;;  %v901_v24 = vmul.f32 %v2648_v21, %v3260_v26  ;;  %v1000_v52 = vmul.f32 %v2684_v37, %v3281_v57  ;;  %v240_v6 = vld [vmem:[%s1898_s26 + $0xf8] sm:$0xff] }
  0xb8   : > { %v1136_v13 = vadd.f32 %v1104_v16, %v1038_v54  ;;  %v614_v20 = vmul.f32 %v2611_v46, %v2503_v55  ;;  %v945_v19 = vadd.f32 %v913_v0, %v847_v43  ;;  %v712_v32 = vmul.f32 %v2659_v48, %v3261_v2  ;;  %v3282_v15 = vld [vmem:[#allocation24_spill] sm:$0xff]  ;;  %v3283_v54 = vld [vmem:[#allocation25_spill] sm:$0xff] }
  0xb9   : > { %v737_v25 = vadd.f32 %v705_v34, %v639_v60  ;;  %v548_v7 = vadd.f32 %v516_v47, %v418_v41  ;;  %v1098_v16 = vmul.f32 %v2691_v45, %v3282_v15  ;;  %v1196_v26 = vmul.f32 %v2700_v9, %v3283_v54 }
  0xba   : > { %v1234_v56 = vadd.f32 %v1202_v33, %v1136_v13  ;;  %v810_v57 = vmul.f32 %v2668_v30, %v3263_v53  ;;  %v1044_v51 = vadd.f32 %v1012_v58, %v945_v19  ;;  %v271_v0 = vmax.f32 %v239_v62, 0.0 }
  0xbb   : > { %v835_v55 = vadd.f32 %v803_v28, %v737_v25  ;;  %v646_v50 = vadd.f32 %v614_v20, %v548_v7  ;;  %v272_v34 = vmax.f32 %v240_v6, 0.0  ;;  %v424_v2 = vmul.f32 %v2593_v39, %v3262_v38 }
  0xbc   : > { %1782 = vmatmul.msk.f32.gmra.mxu2 %vm273_vm1, %v1234_v56  ;;  %v522_v33 = vmul.f32 %v2604_v61, %v2534_v36  ;;  %v620_v43 = vmul.f32 %v2611_v46, %v2547_v35  ;;  %v1142_v60 = vadd.f32 %v1110_v18, %v1044_v51  ;;  %v908_v53 = vmul.f32 %v2648_v21, %v3264_v40 }
  0xbd   : > { %v933_v41 = vadd.f32 %v901_v24, %v835_v55  ;;  %v744_v47 = vadd.f32 %v712_v32, %v646_v50  ;;  %360 = vst.msk [vmem:[#allocation2 + $0x181] sm:$0xff] %vm273_vm1, %v271_v0  ;;  %v1007_v58 = vmul.f32 %v2684_v37, %v2486_v27  ;;  %v718_v36 = vmul.f32 %v2659_v48, %v2761_v44  ;;  %v1363_v0 = vpop.f32.mrf.mxu0 }
  0xbe   : > { %361 = vst.msk [vmem:[#allocation2 + $0x189] sm:$0xff] %vm273_vm1, %v272_v34  ;;  %v554_v38 = vadd.f32 %v522_v33, %v424_v2  ;;  %v419_v35 = vmul.f32 %v2593_v39, %v2584_v1  ;;  %v1240_v51 = vadd.f32 %v1208_v29, %v1142_v60  ;;  %v517_v40 = vmul.f32 %v2604_v61, %v3270_v42 }
  0xbf   : > { %v1032_v18 = vadd.f32 %v1000_v52, %v933_v41  ;;  %v842_v50 = vadd.f32 %v810_v57, %v744_v47  ;;  %v1105_v28 = vmul.f32 %v2691_v45, %v2506_v12  ;;  %v816_v27 = vmul.f32 %v2668_v30, %v2763_v63  ;;  %1632 = vst.msk [vmem:[%s2902_s12] sm:$0xff] %vm273_vm1, %v1363_v0 }
  0xc0   : > { %v652_v13 = vadd.f32 %v620_v43, %v554_v38  ;;  %v615_v24 = vmul.f32 %v2611_v46, %v2599_v59  ;;  %1788 = vmatmul.msk.f32.gmra.mxu3 %vm273_vm1, %v1240_v51  ;;  %v549_v29 = vadd.f32 %v517_v40, %v419_v35  ;;  %v713_v52 = vmul.f32 %v2659_v48, %v3271_v8  ;;  %v3284_v51 = vld [vmem:[#allocation14_spill] sm:$0xff]  ;;  %v3285_v40 = vld [vmem:[#allocation9_spill] sm:$0xff] }
  0xc1   : > { %v1130_v20 = vadd.f32 %v1098_v16, %v1032_v18  ;;  %v940_v1 = vadd.f32 %v908_v53, %v842_v50  ;;  %v1203_v42 = vmul.f32 %v2700_v9, %v2510_v49  ;;  %v914_v62 = vmul.f32 %v2648_v21, %v2774_v17 }
  0xc2   : > { %v750_v12 = vadd.f32 %v718_v36, %v652_v13  ;;  %v811_v19 = vmul.f32 %v2668_v30, %v3272_v22  ;;  %v647_v7 = vadd.f32 %v615_v24, %v549_v29  ;;  %v425_v32 = vmul.f32 %v2593_v39, %v2628_v4 }
  0xc3   : > { %v1228_v59 = vadd.f32 %v1196_v26, %v1130_v20  ;;  %v1039_v25 = vadd.f32 %v1007_v58, %v940_v1  ;;  %v523_v8 = vmul.f32 %v2604_v61, %v2630_v3  ;;  %v621_v49 = vmul.f32 %v2611_v46, %v3277_v31 }
  0xc4   : > { %v848_v6 = vadd.f32 %v816_v27, %v750_v12  ;;  %v979_v56 = vld [vmem:[#allocation2 + $0x180] sm:$0xff]  ;;  %v745_v54 = vadd.f32 %v713_v52, %v647_v7  ;;  %v909_v3 = vmul.f32 %v2648_v21, %v3273_v10  ;;  %v719_v55 = vmul.f32 %v2659_v48, %v2807_v23 }
  0xc5   : > { %v1077_v15 = vld [vmem:[#allocation2 + $0x181] sm:$0xff]  ;;  %1776 = vmatmul.msk.f32.gmra.mxu1 %vm273_vm1, %v1228_v59  ;;  %v1137_v22 = vadd.f32 %v1105_v28, %v1039_v25  ;;  %v1013_v4 = vmul.f32 %v2684_v37, %v979_v56  ;;  %v555_v57 = vadd.f32 %v523_v8, %v425_v32  ;;  %v1008_v33 = vmul.f32 %v2684_v37, %v2597_v14  ;;  %v1078_v13 = vld [vmem:[#allocation2 + $0x189] sm:$0xff]  ;;  %v1079_v12 = vld [vmem:[#allocation2 + $0x199] sm:$0xff] }
  0xc6   : > { %v1175_v16 = vld [vmem:[#allocation2 + $0x182] sm:$0xff]  ;;  %v946_v26 = vadd.f32 %v914_v62, %v848_v6  ;;  %v1111_v31 = vmul.f32 %v2691_v45, %v1077_v15  ;;  %v843_v2 = vadd.f32 %v811_v19, %v745_v54  ;;  %v1106_v43 = vmul.f32 %v2691_v45, %v2615_v11  ;;  %v1176_v29 = vld [vmem:[#allocation2 + $0x18a] sm:$0xff]  ;;  %v1366_v6 = vpop.f32.mrf.mxu0 }
  0xc7   : > { %v1235_v34 = vadd.f32 %v1203_v42, %v1137_v22  ;;  %v1209_v10 = vmul.f32 %v2700_v9, %v1175_v16  ;;  %v653_v41 = vadd.f32 %v621_v49, %v555_v57  ;;  %v817_v47 = vmul.f32 %v2668_v30, %v2813_v5  ;;  %v980_v58 = vld [vmem:[#allocation2 + $0x188] sm:$0xff]  ;;  %v981_v42 = vld [vmem:[#allocation2 + $0x198] sm:$0xff]  ;;  %1633 = vst.msk [vmem:[%s2902_s12 + $0x8] sm:$0xff] %vm273_vm1, %v1366_v6 }
  0xc8   : > { %v1045_v60 = vadd.f32 %v1013_v4, %v946_v26  ;;  %v941_v53 = vadd.f32 %v909_v3, %v843_v2  ;;  %v426_v38 = vmul.f32 %v2593_v39, %v2761_v44  ;;  %v524_v14 = vmul.f32 %v2604_v61, %v2763_v63  ;;  %v1177_v57 = vld [vmem:[#allocation2 + $0x19a] sm:$0xff] }
  0xc9   : > { %1783 = vmatmul.msk.f32.gmra.mxu2 %vm273_vm1, %v1235_v34  ;;  %v622_v11 = vmul.f32 %v2611_v46, %v2774_v17  ;;  %v751_v35 = vadd.f32 %v719_v55, %v653_v41  ;;  %v915_v18 = vmul.f32 %v2648_v21, %v3284_v51  ;;  %v1204_v28 = vmul.f32 %v2700_v9, %v3285_v40  ;;  %v982_v2 = vld [vmem:[#allocation2 + $0x1a0] sm:$0xff] }
  0xca   : > { %v1143_v36 = vadd.f32 %v1111_v31, %v1045_v60  ;;  %v1040_v50 = vadd.f32 %v1008_v33, %v941_v53  ;;  %v556_v27 = vadd.f32 %v524_v14, %v426_v38  ;;  %v720_v24 = vmul.f32 %v2659_v48, %v979_v56 }
  0xcb   : > { %v849_v20 = vadd.f32 %v817_v47, %v751_v35  ;;  %v1014_v63 = vmul.f32 %v2684_v37, %v980_v58  ;;  %v818_v1 = vmul.f32 %v2668_v30, %v1077_v15  ;;  %v427_v62 = vmul.f32 %v2593_v39, %v2807_v23  ;;  %v1178_v35 = vld [vmem:[#allocation2 + $0x1a2] sm:$0xff] }
  0xcc   : > { %v1241_v44 = vadd.f32 %v1209_v10, %v1143_v36  ;;  %v1138_v17 = vadd.f32 %v1106_v43, %v1040_v50  ;;  %v654_v52 = vadd.f32 %v622_v11, %v556_v27  ;;  %v525_v19 = vmul.f32 %v2604_v61, %v2813_v5 }
  0xcd   : > { %v947_v59 = vadd.f32 %v915_v18, %v849_v20  ;;  %v1112_v25 = vmul.f32 %v2691_v45, %v1078_v13  ;;  %v916_v7 = vmul.f32 %v2648_v21, %v1175_v16  ;;  %v623_v32 = vmul.f32 %v2611_v46, %v3284_v51 }
  0xce   : > { %1789 = vmatmul.msk.f32.gmra.mxu3 %vm273_vm1, %v1241_v44  ;;  %v1236_v56 = vadd.f32 %v1204_v28, %v1138_v17  ;;  %v752_v15 = vadd.f32 %v720_v24, %v654_v52  ;;  %v557_v8 = vadd.f32 %v525_v19, %v427_v62  ;;  %v721_v49 = vmul.f32 %v2659_v48, %v980_v58 }
  0xcf   : > { %v1046_v39 = vadd.f32 %v1014_v63, %v947_v59  ;;  %v1210_v61 = vmul.f32 %v2700_v9, %v1176_v29  ;;  %v1015_v23 = vmul.f32 %v2684_v37, %v981_v42  ;;  %v1113_v5 = vmul.f32 %v2691_v45, %v1079_v12 }
  0xd0   : > { %v850_v22 = vadd.f32 %v818_v1, %v752_v15  ;;  %v655_v4 = vadd.f32 %v623_v32, %v557_v8  ;;  %v819_v46 = vmul.f32 %v2668_v30, %v1078_v13  ;;  %v1530_v16 = vmul.f32 %v1363_v0, %v1363_v0 }
  0xd1   : > { %1784 = vmatmul.msk.f32.gmra.mxu2 %vm273_vm1, %v1236_v56  ;;  %v1144_v54 = vadd.f32 %v1112_v25, %v1046_v39  ;;  %v1459_v3 = vsel %vm273_vm1, %v1363_v0, 0.0  ;;  %v1460_v48 = vsel %vm273_vm1, %v1366_v6, 0.0  ;;  %v1531_v26 = vmul.f32 %v1366_v6, %v1366_v6 }
  0xd2   : > { %v948_v31 = vadd.f32 %v916_v7, %v850_v22  ;;  %v753_v55 = vadd.f32 %v721_v49, %v655_v4  ;;  %v917_v34 = vmul.f32 %v2648_v21, %v1176_v29  ;;  %v1461_v33 = vadd.f32 %v1460_v48, %v1459_v3  ;;  %v1080_v21 = vld [vmem:[#allocation2 + $0x1a1] sm:$0xff] }
  0xd3   : > { %v1242_v43 = vadd.f32 %v1210_v61, %v1144_v54  ;;  %v1562_v60 = vsel %vm273_vm1, %v1530_v16, 0.0  ;;  %v1563_v10 = vsel %vm273_vm1, %v1531_v26, 0.0  ;;  %v1211_v0 = vmul.f32 %v2700_v9, %v1177_v57  ;;  %v1369_v50 = vpop.f32.mrf.mxu0 }
  0xd4   : > { %v1047_v30 = vadd.f32 %v1015_v23, %v948_v31  ;;  %v851_v41 = vadd.f32 %v819_v46, %v753_v55  ;;  %v1564_v47 = vadd.f32 %v1563_v10, %v1562_v60  ;;  %v1016_v53 = vmul.f32 %v2684_v37, %v982_v2  ;;  %1634 = vst.msk [vmem:[%s2902_s12 + $0x10] sm:$0xff] %vm273_vm1, %v1369_v50 }
  0xd5   : > { %v1114_v36 = vmul.f32 %v2691_v45, %v1080_v21  ;;  %v1212_v18 = vmul.f32 %v2700_v9, %v1178_v35  ;;  %v1462_v40 = vsel %vm273_vm1, %v1369_v50, 0.0  ;;  %v1532_v28 = vmul.f32 %v1369_v50, %v1369_v50 }
  0xd6   : > { %1790 = vmatmul.msk.f32.gmra.mxu3 %vm273_vm1, %v1242_v43  ;;  %v1145_v58 = vadd.f32 %v1113_v5, %v1047_v30  ;;  %v949_v38 = vadd.f32 %v917_v34, %v851_v41  ;;  %v1463_v13 = vadd.f32 %v1462_v40, %v1461_v33 }
  0xd7   : > { %v1565_v27 = vsel %vm273_vm1, %v1532_v28, 0.0 }
  0xd8   : > { %v1243_v14 = vadd.f32 %v1211_v0, %v1145_v58  ;;  %v1048_v11 = vadd.f32 %v1016_v53, %v949_v38  ;;  %v1566_v45 = vadd.f32 %v1565_v27, %v1564_v47 }
  0xda   : > { %v1146_v51 = vadd.f32 %v1114_v36, %v1048_v11 }
  0xdb   : > { %v1372_v24 = vpop.f32.mrf.mxu0 }
  0xdc   : > { %v1244_v37 = vadd.f32 %v1212_v18, %v1146_v51  ;;  %v1464_v44 = vsel %vm273_vm1, %v1372_v24, 0.0  ;;  %v1533_v9 = vmul.f32 %v1372_v24, %v1372_v24  ;;  %1635 = vst.msk [vmem:[%s2902_s12 + $0x18] sm:$0xff] %vm273_vm1, %v1372_v24 }
  0xdd   : > { %v1465_v20 = vadd.f32 %v1464_v44, %v1463_v13 }
  0xde   : > { %1791 = vmatmul.msk.f32.gmra.mxu3 %vm273_vm1, %v1243_v14  ;;  %v1567_v63 = vsel %vm273_vm1, %v1533_v9, 0.0 }
  0xdf   : > { %v1568_v17 = vadd.f32 %v1567_v63, %v1566_v45 }
  0xe6   : > { %1792 = vmatmul.msk.f32.gmra.mxu3 %vm273_vm1, %v1244_v37 }
  0xea   : > { %v1387_v1 = vpop.f32.mrf.mxu1 }
  0xeb   : > { %1640 = vst.msk [vmem:[%s2902_s12 + $0x40] sm:$0xff] %vm273_vm1, %v1387_v1  ;;  %v1538_v31 = vmul.f32 %v1387_v1, %v1387_v1  ;;  %v1474_v43 = vsel %vm273_vm1, %v1387_v1, 0.0 }
  0xed   : > { %v1577_v0 = vsel %vm273_vm1, %v1538_v31, 0.0 }
  0xef   : > { %v1375_v29 = vpop.f32.mrf.mxu0 }
  0xf0   : > { %v1466_v52 = vsel %vm273_vm1, %v1375_v29, 0.0  ;;  %v1534_v42 = vmul.f32 %v1375_v29, %v1375_v29  ;;  %1636 = vst.msk [vmem:[%s2902_s12 + $0x20] sm:$0xff] %vm273_vm1, %v1375_v29 }
  0xf1   : > { %v1467_v12 = vadd.f32 %v1466_v52, %v1465_v20 }
  0xf2   : > { %v1569_v62 = vsel %vm273_vm1, %v1534_v42, 0.0  ;;  %v1390_v19 = vpop.f32.mrf.mxu1 }
  0xf3   : > { %v1570_v59 = vadd.f32 %v1569_v62, %v1568_v17  ;;  %1641 = vst.msk [vmem:[%s2902_s12 + $0x48] sm:$0xff] %vm273_vm1, %v1390_v19  ;;  %v1539_v60 = vmul.f32 %v1390_v19, %v1390_v19  ;;  %v1476_v53 = vsel %vm273_vm1, %v1390_v19, 0.0 }
  0xf5   : > { %v1579_v14 = vsel %vm273_vm1, %v1539_v60, 0.0 }
  0xfa   : > { %v2979_v25 = vpop.f32.mrf.mxu2  ;;  %v1393_v7 = vpop.f32.mrf.mxu1 }
  0xfb   : > { %1648 = vst.msk [vmem:[%s2902_s12 + $0x80] sm:$0xff] %vm273_vm1, %v2979_v25  ;;  %v1540_v58 = vmul.f32 %v1393_v7, %v1393_v7  ;;  %v1478_v11 = vsel %vm273_vm1, %v1393_v7, 0.0 }
  0xfc   : > { %1642 = vst.msk [vmem:[%s2902_s12 + $0x50] sm:$0xff] %vm273_vm1, %v1393_v7  ;;  %v1378_v32 = vpop.f32.mrf.mxu0 }
  0xfd   : > { %1637 = vst.msk [vmem:[%s2902_s12 + $0x28] sm:$0xff] %vm273_vm1, %v1378_v32  ;;  %v1535_v61 = vmul.f32 %v1378_v32, %v1378_v32  ;;  %v1468_v23 = vsel %vm273_vm1, %v1378_v32, 0.0  ;;  %v1581_v51 = vsel %vm273_vm1, %v1540_v58, 0.0 }
  0xfe   : > { %v1469_v16 = vadd.f32 %v1468_v23, %v1467_v12 }
  0xff   : > { %v1571_v22 = vsel %vm273_vm1, %v1535_v61, 0.0 }
 0x100   : > { %v1572_v3 = vadd.f32 %v1571_v22, %v1570_v59 }
 0x103   : > { %v2988_v6 = vpop.f32.mrf.mxu2 }
 0x104   : > { %v1396_v56 = vpop.f32.mrf.mxu1  ;;  %1649 = vst.msk [vmem:[%s2902_s12 + $0x88] sm:$0xff] %vm273_vm1, %v2988_v6  ;;  %v1492_v31 = vsel %vm273_vm1, %v2988_v6, 0.0 }
 0x105   : > { %1643 = vst.msk [vmem:[%s2902_s12 + $0x58] sm:$0xff] %vm273_vm1, %v1396_v56  ;;  %v1541_v50 = vmul.f32 %v1396_v56, %v1396_v56  ;;  %v1480_v28 = vsel %vm273_vm1, %v1396_v56, 0.0 }
 0x107   : > { %v1583_v27 = vsel %vm273_vm1, %v1541_v50, 0.0 }
 0x10e   : > { %v2995_v15 = vpop.f32.mrf.mxu2 }
 0x10f   : > { %1650 = vst.msk [vmem:[%s2902_s12 + $0x90] sm:$0xff] %vm273_vm1, %v2995_v15 }
 0x111   : > { %v1381_v8 = vpop.f32.mrf.mxu0 }
 0x112   : > { %1638 = vst.msk [vmem:[%s2902_s12 + $0x30] sm:$0xff] %vm273_vm1, %v1381_v8  ;;  %v1536_v5 = vmul.f32 %v1381_v8, %v1381_v8  ;;  %v1470_v4 = vsel %vm273_vm1, %v1381_v8, 0.0 }
 0x113   : > { %v1471_v48 = vadd.f32 %v1470_v4, %v1469_v16  ;;  %v1490_v4 = vsel %vm273_vm1, %v2979_v25, 0.0  ;;  %v1547_v16 = vmul.f32 %v2988_v6, %v2988_v6 }
 0x114   : > { %v3002_v49 = vpop.f32.mrf.mxu3  ;;  %v1573_v54 = vsel %vm273_vm1, %v1536_v5, 0.0 }
 0x115   : > { %v1399_v39 = vpop.f32.mrf.mxu1  ;;  %1656 = vst.msk [vmem:[%s2902_s12 + $0xc0] sm:$0xff] %vm273_vm1, %v3002_v49  ;;  %v1574_v34 = vadd.f32 %v1573_v54, %v1572_v3 }
 0x116   : > { %1644 = vst.msk [vmem:[%s2902_s12 + $0x60] sm:$0xff] %vm273_vm1, %v1399_v39  ;;  %v1542_v45 = vmul.f32 %v1399_v39, %v1399_v39  ;;  %v1482_v44 = vsel %vm273_vm1, %v1399_v39, 0.0  ;;  %v1546_v39 = vmul.f32 %v2979_v25, %v2979_v25 }
 0x118   : > { %v1585_v63 = vsel %vm273_vm1, %v1542_v45, 0.0 }
 0x120   : > { %v3012_v46 = vpop.f32.mrf.mxu2 }
 0x121   : > { %1651 = vst.msk [vmem:[%s2902_s12 + $0x98] sm:$0xff] %vm273_vm1, %v3012_v46  ;;  %v1496_v6 = vsel %vm273_vm1, %v3012_v46, 0.0 }
 0x123   : > { %v1384_v26 = vpop.f32.mrf.mxu0 }
 0x124   : > { %v1472_v57 = vsel %vm273_vm1, %v1384_v26, 0.0  ;;  %v1537_v55 = vmul.f32 %v1384_v26, %v1384_v26  ;;  %1639 = vst.msk [vmem:[%s2902_s12 + $0x38] sm:$0xff] %vm273_vm1, %v1384_v26  ;;  %v1593_v26 = vsel %vm273_vm1, %v1546_v39, 0.0 }
 0x125   : > { %v1473_v2 = vadd.f32 %v1472_v57, %v1471_v48  ;;  %v3021_v33 = vpop.f32.mrf.mxu3  ;;  %v1548_v57 = vmul.f32 %v2995_v15, %v2995_v15 }
 0x126   : > { %v1575_v10 = vsel %vm273_vm1, %v1537_v55, 0.0  ;;  %1657 = vst.msk [vmem:[%s2902_s12 + $0xc8] sm:$0xff] %vm273_vm1, %v3021_v33 }
 0x127   : > { %v1475_v30 = vadd.f32 %v1474_v43, %v1473_v2  ;;  %v1576_v41 = vadd.f32 %v1575_v10, %v1574_v34  ;;  %v1402_v47 = vpop.f32.mrf.mxu1  ;;  %v1595_v34 = vsel %vm273_vm1, %v1547_v16, 0.0  ;;  %v1494_v2 = vsel %vm273_vm1, %v2995_v15, 0.0 }
 0x128   : > { %1645 = vst.msk [vmem:[%s2902_s12 + $0x68] sm:$0xff] %vm273_vm1, %v1402_v47  ;;  %v1543_v1 = vmul.f32 %v1402_v47, %v1402_v47  ;;  %v1484_v29 = vsel %vm273_vm1, %v1402_v47, 0.0  ;;  %v1549_v43 = vmul.f32 %v3012_v46, %v3012_v46 }
 0x129   : > { %v1477_v38 = vadd.f32 %v1476_v53, %v1475_v30  ;;  %v1578_v21 = vadd.f32 %v1577_v0, %v1576_v41  ;;  %v1597_v30 = vsel %vm273_vm1, %v1548_v57, 0.0 }
 0x12a   : > { %v1587_v42 = vsel %vm273_vm1, %v1543_v1, 0.0  ;;  %v1599_v58 = vsel %vm273_vm1, %v1549_v43, 0.0  ;;  %v1506_v1 = vsel %vm273_vm1, %v3002_v49, 0.0 }
 0x12b   : > { %v1479_v36 = vadd.f32 %v1478_v11, %v1477_v38  ;;  %v1580_v35 = vadd.f32 %v1579_v14, %v1578_v21 }
 0x12d   : > { %v1582_v18 = vadd.f32 %v1581_v51, %v1580_v35  ;;  %v1481_v37 = vadd.f32 %v1480_v28, %v1479_v36 }
 0x12f   : > { %v1584_v24 = vadd.f32 %v1583_v27, %v1582_v18  ;;  %v1483_v20 = vadd.f32 %v1482_v44, %v1481_v37 }
 0x131   : > { %v1586_v17 = vadd.f32 %v1585_v63, %v1584_v24  ;;  %v1485_v52 = vadd.f32 %v1484_v29, %v1483_v20  ;;  %v1554_v24 = vmul.f32 %v3002_v49, %v3002_v49 }
 0x132   : > { %v1423_v40 = vpop.f32.mrf.mxu2 }
 0x133   : > { %1652 = vst.msk [vmem:[%s2902_s12 + $0xa0] sm:$0xff] %vm273_vm1, %v1423_v40  ;;  %v1588_v62 = vadd.f32 %v1587_v42, %v1586_v17  ;;  %v1550_v41 = vmul.f32 %v1423_v40, %v1423_v40  ;;  %v1498_v38 = vsel %vm273_vm1, %v1423_v40, 0.0  ;;  %v1555_v17 = vmul.f32 %v3021_v33, %v3021_v33 }
 0x134   : > { %v1405_v13 = vpop.f32.mrf.mxu1 }
 0x135   : > { %1646 = vst.msk [vmem:[%s2902_s12 + $0x70] sm:$0xff] %vm273_vm1, %v1405_v13  ;;  %v1544_v12 = vmul.f32 %v1405_v13, %v1405_v13  ;;  %v1486_v19 = vsel %vm273_vm1, %v1405_v13, 0.0  ;;  %v1601_v11 = vsel %vm273_vm1, %v1550_v41, 0.0  ;;  %v1611_v49 = vsel %vm273_vm1, %v1555_v17, 0.0 }
 0x136   : > { %v3042_v9 = vpop.f32.mrf.mxu3  ;;  %v1487_v7 = vadd.f32 %v1486_v19, %v1485_v52 }
 0x137   : > { %1658 = vst.msk [vmem:[%s2902_s12 + $0xd0] sm:$0xff] %vm273_vm1, %v3042_v9  ;;  %v1589_v32 = vsel %vm273_vm1, %v1544_v12, 0.0  ;;  %v1609_v12 = vsel %vm273_vm1, %v1554_v24, 0.0  ;;  %v1556_v19 = vmul.f32 %v3042_v9, %v3042_v9 }
 0x138   : > { %v1590_v56 = vadd.f32 %v1589_v32, %v1588_v62  ;;  %v1508_v62 = vsel %vm273_vm1, %v3021_v33, 0.0 }
 0x139   : > { %v1613_v33 = vsel %vm273_vm1, %v1556_v19, 0.0 }
 0x13f   : > { %v1426_v59 = vpop.f32.mrf.mxu2 }
 0x140   : > { %1653 = vst.msk [vmem:[%s2902_s12 + $0xa8] sm:$0xff] %vm273_vm1, %v1426_v59  ;;  %v1551_v15 = vmul.f32 %v1426_v59, %v1426_v59  ;;  %v1500_v36 = vsel %vm273_vm1, %v1426_v59, 0.0 }
 0x142   : > { %v1408_v8 = vpop.f32.mrf.mxu1  ;;  %v1603_v18 = vsel %vm273_vm1, %v1551_v15, 0.0 }
 0x143   : > { %v1488_v61 = vsel %vm273_vm1, %v1408_v8, 0.0  ;;  %v1545_v23 = vmul.f32 %v1408_v8, %v1408_v8  ;;  %1647 = vst.msk [vmem:[%s2902_s12 + $0x78] sm:$0xff] %vm273_vm1, %v1408_v8  ;;  %v3059_v22 = vpop.f32.mrf.mxu3 }
 0x144   : > { %v1489_v5 = vadd.f32 %v1488_v61, %v1487_v7  ;;  %1659 = vst.msk [vmem:[%s2902_s12 + $0xd8] sm:$0xff] %vm273_vm1, %v3059_v22  ;;  %v1557_v8 = vmul.f32 %v3059_v22, %v3059_v22 }
 0x145   : > { %v1591_v54 = vsel %vm273_vm1, %v1545_v23, 0.0  ;;  %v1512_v23 = vsel %vm273_vm1, %v3059_v22, 0.0 }
 0x146   : > { %v1491_v3 = vadd.f32 %v1490_v4, %v1489_v5  ;;  %v1592_v48 = vadd.f32 %v1591_v54, %v1590_v56  ;;  %v1510_v56 = vsel %vm273_vm1, %v3042_v9, 0.0  ;;  %v1615_v54 = vsel %vm273_vm1, %v1557_v8, 0.0 }
 0x148   : > { %v1493_v55 = vadd.f32 %v1492_v31, %v1491_v3  ;;  %v1594_v25 = vadd.f32 %v1593_v26, %v1592_v48 }
 0x14a   : > { %v1495_v60 = vadd.f32 %v1494_v2, %v1493_v55  ;;  %v1596_v10 = vadd.f32 %v1595_v34, %v1594_v25 }
 0x14c   : > { %v1598_v47 = vadd.f32 %v1597_v30, %v1596_v10  ;;  %v1497_v0 = vadd.f32 %v1496_v6, %v1495_v60  ;;  %v1429_v53 = vpop.f32.mrf.mxu2 }
 0x14d   : > { %1654 = vst.msk [vmem:[%s2902_s12 + $0xb0] sm:$0xff] %vm273_vm1, %v1429_v53  ;;  %v1552_v46 = vmul.f32 %v1429_v53, %v1429_v53  ;;  %v1502_v50 = vsel %vm273_vm1, %v1429_v53, 0.0 }
 0x14e   : > { %v1499_v21 = vadd.f32 %v1498_v38, %v1497_v0  ;;  %v1600_v14 = vadd.f32 %v1599_v58, %v1598_v47 }
 0x14f   : > { %v1605_v13 = vsel %vm273_vm1, %v1552_v46, 0.0 }
 0x150   : > { %v1501_v35 = vadd.f32 %v1500_v36, %v1499_v21  ;;  %v1602_v51 = vadd.f32 %v1601_v11, %v1600_v14 }
 0x151   : > { %v1447_v28 = vpop.f32.mrf.mxu3 }
 0x152   : > { %v1604_v37 = vadd.f32 %v1603_v18, %v1602_v51  ;;  %v1503_v40 = vadd.f32 %v1502_v50, %v1501_v35  ;;  %1660 = vst.msk [vmem:[%s2902_s12 + $0xe0] sm:$0xff] %vm273_vm1, %v1447_v28  ;;  %v1558_v5 = vmul.f32 %v1447_v28, %v1447_v28  ;;  %v1514_v3 = vsel %vm273_vm1, %v1447_v28, 0.0 }
 0x154   : > { %v1606_v27 = vadd.f32 %v1605_v13, %v1604_v37  ;;  %v1432_v45 = vpop.f32.mrf.mxu2  ;;  %v1617_v31 = vsel %vm273_vm1, %v1558_v5, 0.0 }
 0x155   : > { %v1504_v44 = vsel %vm273_vm1, %v1432_v45, 0.0  ;;  %v1553_v20 = vmul.f32 %v1432_v45, %v1432_v45  ;;  %1655 = vst.msk [vmem:[%s2902_s12 + $0xb8] sm:$0xff] %vm273_vm1, %v1432_v45 }
 0x156   : > { %v1505_v63 = vadd.f32 %v1504_v44, %v1503_v40 }
 0x157   : > { %v1607_v29 = vsel %vm273_vm1, %v1553_v20, 0.0 }
 0x158   : > { %v1507_v52 = vadd.f32 %v1506_v1, %v1505_v63  ;;  %v1608_v42 = vadd.f32 %v1607_v29, %v1606_v27 }
 0x159   : > { %v1450_v59 = vpop.f32.mrf.mxu3 }
 0x15a   : > { %v1509_v7 = vadd.f32 %v1508_v62, %v1507_v52  ;;  %v1610_v32 = vadd.f32 %v1609_v12, %v1608_v42  ;;  %1661 = vst.msk [vmem:[%s2902_s12 + $0xe8] sm:$0xff] %vm273_vm1, %v1450_v59  ;;  %v1559_v9 = vmul.f32 %v1450_v59, %v1450_v59  ;;  %v1516_v55 = vsel %vm273_vm1, %v1450_v59, 0.0 }
 0x15c   : > { %v1511_v39 = vadd.f32 %v1510_v56, %v1509_v7  ;;  %v1612_v61 = vadd.f32 %v1611_v49, %v1610_v32  ;;  %v1619_v34 = vsel %vm273_vm1, %v1559_v9, 0.0 }
 0x15e   : > { %v1614_v4 = vadd.f32 %v1613_v33, %v1612_v61  ;;  %v1513_v16 = vadd.f32 %v1512_v23, %v1511_v39 }
 0x160   : > { %v1515_v48 = vadd.f32 %v1514_v3, %v1513_v16  ;;  %v1616_v26 = vadd.f32 %v1615_v54, %v1614_v4 }
 0x161   : > { %v1453_v57 = vpop.f32.mrf.mxu3 }
 0x162   : > { %v1618_v25 = vadd.f32 %v1617_v31, %v1616_v26  ;;  %1662 = vst.msk [vmem:[%s2902_s12 + $0xf0] sm:$0xff] %vm273_vm1, %v1453_v57  ;;  %v1517_v22 = vadd.f32 %v1516_v55, %v1515_v48  ;;  %v1560_v2 = vmul.f32 %v1453_v57, %v1453_v57  ;;  %v1518_v60 = vsel %vm273_vm1, %v1453_v57, 0.0 }
 0x164   : > { %v1620_v43 = vadd.f32 %v1619_v34, %v1618_v25  ;;  %v1519_v10 = vadd.f32 %v1518_v60, %v1517_v22  ;;  %v1621_v30 = vsel %vm273_vm1, %v1560_v2, 0.0 }
 0x166   : > { %v1622_v6 = vadd.f32 %v1621_v30, %v1620_v43 }
 0x169   : > { %v1456_v41 = vpop.f32.mrf.mxu3 }
 0x16a   : > { %v1520_v47 = vsel %vm273_vm1, %v1456_v41, 0.0  ;;  %v1561_v0 = vmul.f32 %v1456_v41, %v1456_v41  ;;  %1663 = vst.msk [vmem:[%s2902_s12 + $0xf8] sm:$0xff] %vm273_vm1, %v1456_v41 }
 0x16b   : > { %v1521_v53 = vadd.f32 %v1520_v47, %v1519_v10 }
 0x16c   : > { %v1623_v58 = vsel %vm273_vm1, %v1561_v0, 0.0 }
 0x16d   : > { %v1522_v38 = vrot.slane %v1521_v53, 4  ;;  %v1624_v15 = vadd.f32 %v1623_v58, %v1622_v6 }
 0x16f   : > { %v1523_v21 = vadd.f32 %v1522_v38, %v1521_v53  ;;  %v1625_v14 = vrot.slane %v1624_v15, 4 }
 0x171   : > { %v1524_v11 = vrot.slane %v1523_v21, 2  ;;  %v1626_v36 = vadd.f32 %v1625_v14, %v1624_v15 }
 0x173   : > { %v1525_v46 = vadd.f32 %v1524_v11, %v1523_v21  ;;  %v1627_v35 = vrot.slane %v1626_v36, 2 }
 0x175   : > { %v1526_v51 = vrot.slane %v1525_v46, 1  ;;  %v1628_v18 = vadd.f32 %v1627_v35, %v1626_v36 }
 0x177   : > { %v1527_v50 = vadd.f32 %v1526_v51, %v1525_v46  ;;  %v1629_v28 = vrot.slane %v1628_v18, 1 }
 0x179   : > { %1529 = vst.msk [vmem:[%s208_s17] sm:$0x1] %vm1528_vm3, %v1527_v50  ;;  %v1630_v37 = vadd.f32 %v1629_v28, %v1628_v18 }
 0x17b   : > { %1631 = vst.msk [vmem:[%s208_s17 + $0x1] sm:$0x1] %vm1528_vm3, %v1630_v37 }
 0x17c PF: > { %s15_s15 = sadd.s32 1, %s1833_s15  }
 0x17d   : > { %p12_p4 = scmp.ge.s32.totalorder %s15_s15, 4  }
 0x17f   :  { %14 = sbr.rel (!%p12_p4) target bundleno = 1 (0x1), region = 76 }

</bundles_post_ra>
